<compile_context>
chip_gen: v5e
topology: v5e:2x2
jax: 0.10.0
libtpu: 0.0.40
codegen_flags: <defaults>
</compile_context>

<pallas_src>
import math

import jax
import jax.numpy as jnp
from jax.experimental import pallas as pl
from jax.experimental.pallas import tpu as pltpu

# ----- hyperparameters (small, consistent with DVAE_PYG.__init__) -----
MAX_N = 6          # max number of vertices per graph
NVT = 5            # number of vertex types
START_TYPE = 0
END_TYPE = 1
HS = 32            # hidden size
NZ = 8             # latent size
VID = True
TOPO_FEAT_SCALE = 0.01
BETA = 0.005
GS = HS * 2
VS = HS + MAX_N    # vid=True -> vertex-state size fed to gate/mapper
F_IN = NVT + 1     # one-hot type + scalar feat
B = 3              # real graphs per call
BP = 8             # padded batch stride (8 sublanes -> aligned per-vertex blocks)
NUB = MAX_N * BP   # row stride between target vertices in the flat adjacency mask
PCOLS = 128        # lane width of the packed-parameter buffer


def _pack_params(named):
    """Pack an ordered dict of 2-D f32 arrays into one [R, 128] buffer (8-row aligned)."""
    offsets = {}
    rows = []
    off = 0
    for name, arr in named.items():
        r, c = arr.shape
        assert c <= PCOLS
        offsets[name] = (off, r, c)
        a = arr.astype(jnp.float32)
        if c < PCOLS:
            a = jnp.concatenate([a, jnp.zeros((r, PCOLS - c), jnp.float32)], axis=1)
        rows.append(a)
        pad = (-r) % 8
        if pad:
            rows.append(jnp.zeros((pad, PCOLS), jnp.float32))
        off += r + pad
    return jnp.concatenate(rows, axis=0), offsets


def _make_kernel(offsets):
    def kernel(x_ref, amb_ref, p_ref, out_ref,
               enc_ref, dec_ref, gmp_e_ref, gmp_d_ref, hvi_ref):
        def par(name):
            off, r, c = offsets[name]
            return p_ref[off:off + r, :c]

        X = x_ref[...]                                    # [MAX_N*BP, F_IN], row v*BP+b

        e_wih, e_whh, e_bih, e_bhh = par('e_wih'), par('e_whh'), par('e_bih'), par('e_bhh')
        d_wih, d_whh, d_bih, d_bhh = par('d_wih'), par('d_whh'), par('d_bih'), par('d_bhh')
        gm_wh, gm_vid, g_b = par('gm_wh'), par('gm_vid'), par('g_b')
        fc12_w, fc12_b = par('fc12_w'), par('fc12_b')
        fc3_w, fc3_b = par('fc3_w'), par('fc3_b')
        head_w1, head_b1 = par('head_w1'), par('head_b1')
        head_w2, head_b2 = par('head_w2'), par('head_b2')
        ae_w1h, ae_w1c, ae_b1 = par('ae_w1h'), par('ae_w1c'), par('ae_b1')
        ae_w2, ae_b2 = par('ae_w2'), par('ae_b2')
        vmask = par('vmask')                              # [MAX_N*BP, 1] valid-row mask
        vmb = vmask[0:BP]                                 # [BP, 1]

        def dot(a, b):
            return jnp.dot(a, b, preferred_element_type=jnp.float32)

        def gru_h(gi, h, whh, bhh):
            # GRUCell update with input projection gi = x @ W_ih + b_ih precomputed.
            gh = dot(h, whh) + bhh
            r = jax.nn.sigmoid(gi[:, 0:HS] + gh[:, 0:HS])
            zg = jax.nn.sigmoid(gi[:, HS:2 * HS] + gh[:, HS:2 * HS])
            n = jnp.tanh(gi[:, 2 * HS:3 * HS] + r * gh[:, 2 * HS:3 * HS])
            return (1.0 - zg) * n + zg * h

        def gru_h0(gi, bhh):
            # h == 0 special case: no h-matmul, h' = (1 - z) * n.
            r = jax.nn.sigmoid(gi[:, 0:HS] + bhh[:, 0:HS])
            zg = jax.nn.sigmoid(gi[:, HS:2 * HS] + bhh[:, HS:2 * HS])
            n = jnp.tanh(gi[:, 2 * HS:3 * HS] + r * bhh[:, 2 * HS:3 * HS])
            return (1.0 - zg) * n

        def gm_row(h, u):
            # fused (gate | mapper) contribution of vertex u, unmasked: one matmul;
            # vid one-hot folded into the batch-pre-repeated weight rows gm_vid.
            t = dot(h, gm_wh) + gm_vid[u * BP:(u + 1) * BP]
            g = jax.nn.sigmoid(t[:, 0:HS] + g_b)
            return g * t[:, HS:2 * HS]

        # ---------------- encode ----------------
        GI_enc = dot(X, e_wih) + e_bih                    # [MAX_N*BP, 3*HS] batched
        h = gru_h0(GI_enc[0:BP], e_bhh)                   # v = 0, H0 = zero hidden
        enc_ref[0:BP, :] = h
        gmp_e_ref[0:BP, :] = gm_row(h, 0)
        for v in range(1, MAX_N):
            msk = amb_ref[v * NUB: v * NUB + v * BP, :]   # A[b,u,v] broadcast to HS lanes
            contrib = msk * gmp_e_ref[0:v * BP, :]        # masked gated contributions
            h_in = contrib[0:BP]                          # VALU block-sum over predecessors
            for u in range(1, v):
                h_in = h_in + contrib[u * BP:(u + 1) * BP]
            h = gru_h(GI_enc[v * BP:(v + 1) * BP], h_in, e_whh, e_bhh)
            enc_ref[v * BP:(v + 1) * BP, :] = h
            if v < MAX_N - 1:                             # last vertex never a predecessor
                gmp_e_ref[v * BP:(v + 1) * BP, :] = gm_row(h, v)

        hg = enc_ref[(MAX_N - 1) * BP: MAX_N * BP, :]     # graph state (last vertex)
        # TODO(synk): reference declares fc1/fc2 = Linear(gs=2*hs, nz) but (bidir=False)
        # feeds an hs-dim graph state (shape-inconsistent in PyTorch); the first hs input
        # rows of the declared weights are applied.
        mulv = dot(hg, fc12_w) + fc12_b                   # fused mu|logvar
        mu = mulv[:, 0:NZ] * vmb
        logvar = mulv[:, NZ:2 * NZ] * vmb

        # ---------------- loss (teacher-forced decode) ----------------
        # TODO(synk): training-mode reparameterize adds eps*std with eps~N(0, 0.01^2);
        # deterministic eval path (z = mu) is used here.
        z = mu
        h0 = jnp.tanh(dot(z, fc3_w) + fc3_b)              # [BP, HS]

        GI_dec = dot(X, d_wih) + d_bih                    # batched input projections
        gi0 = d_wih[0:1, :] + d_bih                       # x0 = onehot(START), feat 0
        h = gru_h(gi0, h0, d_whh, d_bhh)                  # decode-graph vertex 0
        dec_ref[0:BP, :] = h
        gmp_d_ref[0:BP, :] = gm_row(h, 0)
        hvi_ref[0:BP, :] = dot(h, ae_w1h) + ae_b1         # cached add_edge Hvi half

        ell = jnp.zeros((1, 1), jnp.float32)
        for v in range(1, MAX_N):
            gi_v = GI_dec[v * BP:(v + 1) * BP]
            msk = amb_ref[v * NUB: v * NUB + v * BP, :]
            gated = msk * gmp_d_ref[0:v * BP, :]          # [v*BP, HS]
            # suffix sums cum[j] = sum_{u>=j} gated[u] (cum[v] = 0): reverse cumsum,
            # pure VALU adds (no matmul on the chain).
            blocks = [None] * (v + 1)
            run = jnp.zeros((BP, HS), jnp.float32)
            blocks[v] = run
            for u in range(v - 1, -1, -1):
                run = run + gated[u * BP:(u + 1) * BP]
                blocks[u] = run
            hin = jnp.concatenate(blocks, axis=0)         # [(v+1)*BP, HS]
            giv = jnp.concatenate([gi_v] * (v + 1), axis=0)
            cur_all = gru_h(giv, hin, d_whh, d_bhh)       # ONE batched GRU step
            # edge logits: state before adding edge vi  <->  cur_all block (vi+1)
            l1 = jax.nn.relu(hvi_ref[0:v * BP, :]
                             + dot(cur_all[BP:(v + 1) * BP], ae_w1c))
            logit = dot(l1, ae_w2) + ae_b2                # [v*BP, 1]
            gt = msk[:, 0:1]
            sp = jnp.maximum(logit, 0.0) + jnp.log(1.0 + jnp.exp(-jnp.abs(logit)))
            # batched -BCE in logits form, masked to valid graph rows
            ell = ell + jnp.sum(vmask[0:v * BP] * (gt * logit - sp), keepdims=True)
            h = cur_all[0:BP]                             # final state (full predecessor sum)
            dec_ref[v * BP:(v + 1) * BP, :] = h
            if v < MAX_N - 1:
                gmp_d_ref[v * BP:(v + 1) * BP, :] = gm_row(h, v)
                hvi_ref[v * BP:(v + 1) * BP, :] = dot(h, ae_w1h) + ae_b1

        # vertex-type / feature prediction losses, batched over v = 1..MAX_N-1 with the
        # fused add_vertex|fc_feat heads (layer-1 fills all 128 lanes).
        HGD = dec_ref[0:(MAX_N - 1) * BP, :]              # hg_d for each prediction step
        hid = jax.nn.relu(dot(HGD, head_w1) + head_b1)    # [(MAX_N-1)*BP, 128]
        heads = dot(hid, head_w2) + head_b2               # [(MAX_N-1)*BP, NVT+1]
        ts = heads[:, 0:NVT]
        mmax = jnp.max(ts, axis=1, keepdims=True)
        logsm = ts - (mmax + jnp.log(jnp.sum(jnp.exp(ts - mmax), axis=1, keepdims=True)))
        vll = jnp.sum(X[BP:MAX_N * BP, 0:NVT] * logsm, keepdims=True)
        pf = heads[:, NVT:NVT + 1]
        tf = X[BP:MAX_N * BP, NVT:NVT + 1]
        vl2 = TOPO_FEAT_SCALE * jnp.sum(vmask[BP:MAX_N * BP] * (pf - tf) ** 2,
                                        keepdims=True) / 100.0

        res = -(vll - vl2 + ell)
        kterm = 1.0 + logvar - mu * mu - jnp.exp(logvar)
        kld = -0.5 * jnp.sum(vmb * kterm, keepdims=True)
        loss = res + BETA * kld

        # single lane-dense [8, 128] output slab: mu | logvar | loss | zero pad
        out_ref[...] = jnp.zeros((BP, PCOLS), jnp.float32)
        out_ref[:, 0:NZ] = mu
        out_ref[:, NZ:2 * NZ] = logvar
        out_ref[:, 2 * NZ:2 * NZ + 1] = jnp.broadcast_to(loss, (BP, 1))

    return kernel


def build_forward(offsets):
    kernel = _make_kernel(offsets)
    vmem = lambda: pl.BlockSpec(memory_space=pltpu.MemorySpace.VMEM)
    call = pl.pallas_call(
        kernel,
        out_shape=jax.ShapeDtypeStruct((BP, PCOLS), jnp.float32),
        in_specs=[vmem(), vmem(), vmem()],
        out_specs=vmem(),
        scratch_shapes=[
            pltpu.VMEM((MAX_N * BP, HS), jnp.float32),       # encoder vertex states
            pltpu.VMEM((MAX_N * BP, HS), jnp.float32),       # decoder vertex states
            pltpu.VMEM((MAX_N * BP, HS), jnp.float32),       # cached enc gate*mapper rows
            pltpu.VMEM((MAX_N * BP, HS), jnp.float32),       # cached dec gate*mapper rows
            pltpu.VMEM((MAX_N * BP, 4 * HS), jnp.float32),   # cached dec add_edge Hvi rows
        ],
    )

    @jax.jit
    def forward(X, A, packed):
        # pad batch to the 8-sublane stride; vertex-major flat layouts (row v*BP+b)
        Xp = jnp.zeros((BP, MAX_N, F_IN), jnp.float32).at[:B].set(X)
        Ap = jnp.zeros((BP, MAX_N, MAX_N), jnp.float32).at[:B].set(A)
        X_flat = jnp.transpose(Xp, (1, 0, 2)).reshape(MAX_N * BP, F_IN)
        # flat mask: row v*NUB + u*BP + b = A[b, u, v], pre-broadcast to HS lanes
        AM = jnp.transpose(Ap, (2, 1, 0)).reshape(MAX_N * MAX_N * BP, 1)
        AMB = jnp.broadcast_to(AM, (MAX_N * MAX_N * BP, HS))
        out = call(X_flat, AMB, packed)
        loss = out[0:1, 2 * NZ:2 * NZ + 1]
        mu = out[:B, 0:NZ]
        logvar = out[:B, NZ:2 * NZ]
        return loss, mu, logvar

    return forward


def _uinit(key, shape, fan_in):
    bound = 1.0 / math.sqrt(fan_in)
    return jax.random.uniform(key, shape, jnp.float32, -bound, bound)


def make_params(key):
    ks = iter(jax.random.split(key, 48))
    nxt = lambda: next(ks)
    p = {}
    # encoder GRUCell (grue_forward[0]): in = F_IN, hidden = HS
    p['e_wih'] = _uinit(nxt(), (F_IN, 3 * HS), HS)
    p['e_whh'] = _uinit(nxt(), (HS, 3 * HS), HS)
    p['e_bih'] = _uinit(nxt(), (1, 3 * HS), HS)
    p['e_bhh'] = _uinit(nxt(), (1, 3 * HS), HS)
    # decoder GRUCell (grud[0])
    p['d_wih'] = _uinit(nxt(), (F_IN, 3 * HS), HS)
    p['d_whh'] = _uinit(nxt(), (HS, 3 * HS), HS)
    p['d_bih'] = _uinit(nxt(), (1, 3 * HS), HS)
    p['d_bhh'] = _uinit(nxt(), (1, 3 * HS), HS)
    # gate_forward[0] / mapper_forward[0]: Linear(VS, HS); fused gate|mapper weight, vid
    # one-hot rows split out and pre-repeated over the padded batch stride (row u*BP+b)
    g_w = _uinit(nxt(), (VS, HS), VS)
    m_w = _uinit(nxt(), (VS, HS), VS)
    p['gm_wh'] = jnp.concatenate([g_w[:HS], m_w[:HS]], axis=1)               # [HS, 2*HS]
    p['gm_vid'] = jnp.concatenate([jnp.repeat(g_w[HS:], BP, axis=0),
                                   jnp.repeat(m_w[HS:], BP, axis=0)], axis=1)
    p['g_b'] = _uinit(nxt(), (1, HS), VS)
    # fc1 | fc2 fused (declared Linear(GS, NZ); first HS input rows used)
    fc1_w = _uinit(nxt(), (GS, NZ), GS)
    fc2_w = _uinit(nxt(), (GS, NZ), GS)
    p['fc12_w'] = jnp.concatenate([fc1_w[:HS], fc2_w[:HS]], axis=1)          # [HS, 2*NZ]
    p['fc12_b'] = jnp.concatenate([_uinit(nxt(), (1, NZ), GS),
                                   _uinit(nxt(), (1, NZ), GS)], axis=1)
    # fc3: Linear(NZ, HS)
    p['fc3_w'] = _uinit(nxt(), (NZ, HS), NZ)
    p['fc3_b'] = _uinit(nxt(), (1, HS), NZ)
    # fused prediction heads: add_vertex (HS->2HS->NVT) | fc_feat (HS->64->1)
    av_w1 = _uinit(nxt(), (HS, 2 * HS), HS)
    av_b1 = _uinit(nxt(), (1, 2 * HS), HS)
    av_w2 = _uinit(nxt(), (2 * HS, NVT), 2 * HS)
    av_b2 = _uinit(nxt(), (1, NVT), 2 * HS)
    ff_w1 = _uinit(nxt(), (HS, 64), HS)
    ff_b1 = _uinit(nxt(), (1, 64), HS)
    ff_w2 = _uinit(nxt(), (64, 1), 64)
    ff_b2 = _uinit(nxt(), (1, 1), 64)
    p['head_w1'] = jnp.concatenate([av_w1, ff_w1], axis=1)                   # [HS, 128]
    p['head_b1'] = jnp.concatenate([av_b1, ff_b1], axis=1)
    hw2 = jnp.zeros((2 * HS + 64, NVT + 1), jnp.float32)
    hw2 = hw2.at[0:2 * HS, 0:NVT].set(av_w2).at[2 * HS:, NVT:NVT + 1].set(ff_w2)
    p['head_w2'] = hw2                                                       # block-diag
    p['head_b2'] = jnp.concatenate([av_b2, ff_b2], axis=1)
    # add_edge: Linear(2HS, 4HS) -> ReLU -> Linear(4HS, 1); layer-1 split Hvi/cur halves
    ae_w1 = _uinit(nxt(), (2 * HS, 4 * HS), 2 * HS)
    p['ae_w1h'] = ae_w1[:HS]
    p['ae_w1c'] = ae_w1[HS:]
    p['ae_b1'] = _uinit(nxt(), (1, 4 * HS), 2 * HS)
    p['ae_w2'] = _uinit(nxt(), (4 * HS, 1), 4 * HS)
    p['ae_b2'] = _uinit(nxt(), (1, 1), 4 * HS)
    # valid-row mask for the padded batch stride (row u*BP+b -> 1.0 iff b < B)
    vm = (jnp.arange(BP) < B).astype(jnp.float32)
    p['vmask'] = jnp.tile(vm, (MAX_N,)).reshape(MAX_N * BP, 1)
    return p


def make_graphs(key):
    k_type, k_feat, k_adj = jax.random.split(key, 3)
    # vertex types: 0 = START, last = END, middle in [2, NVT)
    types = jax.random.randint(k_type, (B, MAX_N), 2, NVT)
    types = types.at[:, 0].set(START_TYPE).at[:, -1].set(END_TYPE)
    one_hot = jax.nn.one_hot(types, NVT, dtype=jnp.float32)
    feats = 0.1 * jax.random.normal(k_feat, (B, MAX_N, 1), jnp.float32)
    feats = feats.at[:, 0, :].set(0.0)
    X = jnp.concatenate([one_hot, feats], axis=-1)                    # [B, MAX_N, F_IN]

    # dense DAG adjacency: chain edge (v-1)->v always + random earlier edges u<v-1
    u_idx = jnp.arange(MAX_N)[:, None]
    v_idx = jnp.arange(MAX_N)[None, :]
    chain = (u_idx == v_idx - 1).astype(jnp.float32)                  # [MAX_N, MAX_N]
    strict = (u_idx < v_idx - 1).astype(jnp.float32)
    rand = jax.random.uniform(k_adj, (B, MAX_N, MAX_N))
    A = chain[None] + strict[None] * (rand < 0.4).astype(jnp.float32)
    return X, A


if __name__ == "__main__":
    key = jax.random.PRNGKey(0)
    k_data, k_params = jax.random.split(key)
    X, A = make_graphs(k_data)
    params = make_params(k_params)
    packed, offsets = _pack_params(params)

    forward = build_forward(offsets)
    loss, mu, logvar = forward(X, A, packed)
    jax.block_until_ready((loss, mu, logvar))

    assert loss.shape == (1, 1)
    assert mu.shape == (B, NZ) and logvar.shape == (B, NZ)
    assert bool(jnp.isfinite(loss).all())
    assert bool(jnp.isfinite(mu).all()) and bool(jnp.isfinite(logvar).all())
    print("KERNEL_OK")
</pallas_src>

<mosaic_0001>
module attributes {stable_mosaic.version = 11 : i64} {
  func.func @kernel(%arg0: memref<48x6xf32, #tpu.memory_space<vmem>>, %arg1: memref<288x32xf32, #tpu.memory_space<vmem>>, %arg2: memref<688x128xf32, #tpu.memory_space<vmem>>, %arg3: memref<8x128xf32, #tpu.memory_space<vmem>>, %arg4: memref<48x32xf32, #tpu.memory_space<vmem>>, %arg5: memref<48x32xf32, #tpu.memory_space<vmem>>, %arg6: memref<48x32xf32, #tpu.memory_space<vmem>>, %arg7: memref<48x32xf32, #tpu.memory_space<vmem>>, %arg8: memref<48x128xf32, #tpu.memory_space<vmem>>) attributes {dimension_semantics = [], scalar_prefetch = 0 : i64, scratch_operands = 5 : i64, tpu.core_type = #tpu.core_type<tc>} {
    %c0 = arith.constant 0 : index
    %c0_0 = arith.constant 0 : index
    %0 = vector.load %arg0[%c0, %c0_0] : memref<48x6xf32, #tpu.memory_space<vmem>>, vector<48x6xf32>
    %c0_1 = arith.constant 0 : index
    %c0_2 = arith.constant 0 : index
    %1 = vector.load %arg2[%c0_1, %c0_2] : memref<688x128xf32, #tpu.memory_space<vmem>>, vector<6x96xf32>
    %c8 = arith.constant 8 : index
    %c0_3 = arith.constant 0 : index
    %2 = vector.load %arg2[%c8, %c0_3] : memref<688x128xf32, #tpu.memory_space<vmem>>, vector<32x96xf32>
    %c40 = arith.constant 40 : index
    %c0_4 = arith.constant 0 : index
    %3 = vector.load %arg2[%c40, %c0_4] : memref<688x128xf32, #tpu.memory_space<vmem>>, vector<1x96xf32>
    %c48 = arith.constant 48 : index
    %c0_5 = arith.constant 0 : index
    %4 = vector.load %arg2[%c48, %c0_5] : memref<688x128xf32, #tpu.memory_space<vmem>>, vector<1x96xf32>
    %c56 = arith.constant 56 : index
    %c0_6 = arith.constant 0 : index
    %5 = vector.load %arg2[%c56, %c0_6] : memref<688x128xf32, #tpu.memory_space<vmem>>, vector<6x96xf32>
    %c64 = arith.constant 64 : index
    %c0_7 = arith.constant 0 : index
    %6 = vector.load %arg2[%c64, %c0_7] : memref<688x128xf32, #tpu.memory_space<vmem>>, vector<32x96xf32>
    %c96 = arith.constant 96 : index
    %c0_8 = arith.constant 0 : index
    %7 = vector.load %arg2[%c96, %c0_8] : memref<688x128xf32, #tpu.memory_space<vmem>>, vector<1x96xf32>
    %c104 = arith.constant 104 : index
    %c0_9 = arith.constant 0 : index
    %8 = vector.load %arg2[%c104, %c0_9] : memref<688x128xf32, #tpu.memory_space<vmem>>, vector<1x96xf32>
    %c112 = arith.constant 112 : index
    %c0_10 = arith.constant 0 : index
    %9 = vector.load %arg2[%c112, %c0_10] : memref<688x128xf32, #tpu.memory_space<vmem>>, vector<32x64xf32>
    %c144 = arith.constant 144 : index
    %c0_11 = arith.constant 0 : index
    %10 = vector.load %arg2[%c144, %c0_11] : memref<688x128xf32, #tpu.memory_space<vmem>>, vector<48x64xf32>
    %c192 = arith.constant 192 : index
    %c0_12 = arith.constant 0 : index
    %11 = vector.load %arg2[%c192, %c0_12] : memref<688x128xf32, #tpu.memory_space<vmem>>, vector<1x32xf32>
    %c200 = arith.constant 200 : index
    %c0_13 = arith.constant 0 : index
    %12 = vector.load %arg2[%c200, %c0_13] : memref<688x128xf32, #tpu.memory_space<vmem>>, vector<32x16xf32>
    %c232 = arith.constant 232 : index
    %c0_14 = arith.constant 0 : index
    %13 = vector.load %arg2[%c232, %c0_14] : memref<688x128xf32, #tpu.memory_space<vmem>>, vector<1x16xf32>
    %c240 = arith.constant 240 : index
    %c0_15 = arith.constant 0 : index
    %14 = vector.load %arg2[%c240, %c0_15] : memref<688x128xf32, #tpu.memory_space<vmem>>, vector<8x32xf32>
    %c248 = arith.constant 248 : index
    %c0_16 = arith.constant 0 : index
    %15 = vector.load %arg2[%c248, %c0_16] : memref<688x128xf32, #tpu.memory_space<vmem>>, vector<1x32xf32>
    %c256 = arith.constant 256 : index
    %c0_17 = arith.constant 0 : index
    %16 = vector.load %arg2[%c256, %c0_17] : memref<688x128xf32, #tpu.memory_space<vmem>>, vector<32x128xf32>
    %c288 = arith.constant 288 : index
    %c0_18 = arith.constant 0 : index
    %17 = vector.load %arg2[%c288, %c0_18] : memref<688x128xf32, #tpu.memory_space<vmem>>, vector<1x128xf32>
    %c296 = arith.constant 296 : index
    %c0_19 = arith.constant 0 : index
    %18 = vector.load %arg2[%c296, %c0_19] : memref<688x128xf32, #tpu.memory_space<vmem>>, vector<128x6xf32>
    %c424 = arith.constant 424 : index
    %c0_20 = arith.constant 0 : index
    %19 = vector.load %arg2[%c424, %c0_20] : memref<688x128xf32, #tpu.memory_space<vmem>>, vector<1x6xf32>
    %c432 = arith.constant 432 : index
    %c0_21 = arith.constant 0 : index
    %20 = vector.load %arg2[%c432, %c0_21] : memref<688x128xf32, #tpu.memory_space<vmem>>, vector<32x128xf32>
    %c464 = arith.constant 464 : index
    %c0_22 = arith.constant 0 : index
    %21 = vector.load %arg2[%c464, %c0_22] : memref<688x128xf32, #tpu.memory_space<vmem>>, vector<32x128xf32>
    %c496 = arith.constant 496 : index
    %c0_23 = arith.constant 0 : index
    %22 = vector.load %arg2[%c496, %c0_23] : memref<688x128xf32, #tpu.memory_space<vmem>>, vector<1x128xf32>
    %c504 = arith.constant 504 : index
    %c0_24 = arith.constant 0 : index
    %23 = vector.load %arg2[%c504, %c0_24] : memref<688x128xf32, #tpu.memory_space<vmem>>, vector<128x1xf32>
    %c632 = arith.constant 632 : index
    %c0_25 = arith.constant 0 : index
    %24 = vector.load %arg2[%c632, %c0_25] : memref<688x128xf32, #tpu.memory_space<vmem>>, vector<1x1xf32>
    %c640 = arith.constant 640 : index
    %c0_26 = arith.constant 0 : index
    %25 = vector.load %arg2[%c640, %c0_26] : memref<688x128xf32, #tpu.memory_space<vmem>>, vector<48x1xf32>
    %26 = vector.extract_strided_slice %25 {offsets = [0, 0], sizes = [8, 1], strides = [1, 1]} : vector<48x1xf32> to vector<8x1xf32>
    %cst = arith.constant dense<0.000000e+00> : vector<48x96xf32>
    %27 = tpu.matmul %0, %1, %cst {dimension_numbers = #tpu.dot_dimension_numbers<[1], [0], [0], [1], [0, 0, 1, 1], [], []>} : vector<48x6xf32>, vector<6x96xf32>, vector<48x96xf32> -> vector<48x96xf32>
    %28 = vector.broadcast %3 : vector<1x96xf32> to vector<48x96xf32>
    %29 = arith.addf %27, %28 : vector<48x96xf32>
    %30 = vector.extract_strided_slice %29 {offsets = [0, 0], sizes = [8, 96], strides = [1, 1]} : vector<48x96xf32> to vector<8x96xf32>
    %31 = vector.extract_strided_slice %30 {offsets = [0, 0], sizes = [8, 32], strides = [1, 1]} : vector<8x96xf32> to vector<8x32xf32>
    %32 = vector.extract_strided_slice %4 {offsets = [0, 0], sizes = [1, 32], strides = [1, 1]} : vector<1x96xf32> to vector<1x32xf32>
    %33 = vector.broadcast %32 : vector<1x32xf32> to vector<8x32xf32>
    %34 = arith.addf %31, %33 : vector<8x32xf32>
    %35 = arith.negf %34 : vector<8x32xf32>
    %36 = math.exp %35 : vector<8x32xf32>
    %cst_27 = arith.constant 1.000000e+00 : f32
    %37 = vector.broadcast %cst_27 : f32 to vector<8x32xf32>
    %38 = arith.addf %37, %36 : vector<8x32xf32>
    %39 = arith.divf %37, %38 : vector<8x32xf32>
    %40 = vector.extract_strided_slice %30 {offsets = [0, 32], sizes = [8, 32], strides = [1, 1]} : vector<8x96xf32> to vector<8x32xf32>
    %41 = vector.extract_strided_slice %4 {offsets = [0, 32], sizes = [1, 32], strides = [1, 1]} : vector<1x96xf32> to vector<1x32xf32>
    %42 = vector.broadcast %41 : vector<1x32xf32> to vector<8x32xf32>
    %43 = arith.addf %40, %42 : vector<8x32xf32>
    %44 = arith.negf %43 : vector<8x32xf32>
    %45 = math.exp %44 : vector<8x32xf32>
    %cst_28 = arith.constant 1.000000e+00 : f32
    %46 = vector.broadcast %cst_28 : f32 to vector<8x32xf32>
    %47 = arith.addf %46, %45 : vector<8x32xf32>
    %48 = arith.divf %46, %47 : vector<8x32xf32>
    %49 = vector.extract_strided_slice %30 {offsets = [0, 64], sizes = [8, 32], strides = [1, 1]} : vector<8x96xf32> to vector<8x32xf32>
    %50 = vector.extract_strided_slice %4 {offsets = [0, 64], sizes = [1, 32], strides = [1, 1]} : vector<1x96xf32> to vector<1x32xf32>
    %51 = vector.broadcast %50 : vector<1x32xf32> to vector<8x32xf32>
    %52 = arith.mulf %39, %51 : vector<8x32xf32>
    %53 = arith.addf %49, %52 : vector<8x32xf32>
    %54 = math.tanh %53 : vector<8x32xf32>
    %cst_29 = arith.constant 1.000000e+00 : f32
    %55 = vector.broadcast %cst_29 : f32 to vector<8x32xf32>
    %56 = arith.subf %55, %48 : vector<8x32xf32>
    %57 = arith.mulf %56, %54 : vector<8x32xf32>
    %c0_30 = arith.constant 0 : index
    %c0_31 = arith.constant 0 : index
    %58 = vector.load %arg4[%c0_30, %c0_31] : memref<48x32xf32, #tpu.memory_space<vmem>>, vector<8x32xf32>
    tpu.vector_store %arg4[%c0_30, %c0_31], %57 {strides = array<i32>} : memref<48x32xf32, #tpu.memory_space<vmem>>, vector<8x32xf32>,
    %cst_32 = arith.constant dense<0.000000e+00> : vector<8x64xf32>
    %59 = tpu.matmul %57, %9, %cst_32 {dimension_numbers = #tpu.dot_dimension_numbers<[1], [0], [0], [1], [0, 0, 1, 1], [], []>} : vector<8x32xf32>, vector<32x64xf32>, vector<8x64xf32> -> vector<8x64xf32>
    %60 = vector.extract_strided_slice %10 {offsets = [0, 0], sizes = [8, 64], strides = [1, 1]} : vector<48x64xf32> to vector<8x64xf32>
    %61 = arith.addf %59, %60 : vector<8x64xf32>
    %62 = vector.extract_strided_slice %61 {offsets = [0, 0], sizes = [8, 32], strides = [1, 1]} : vector<8x64xf32> to vector<8x32xf32>
    %63 = vector.broadcast %11 : vector<1x32xf32> to vector<8x32xf32>
    %64 = arith.addf %62, %63 : vector<8x32xf32>
    %65 = arith.negf %64 : vector<8x32xf32>
    %66 = math.exp %65 : vector<8x32xf32>
    %cst_33 = arith.constant 1.000000e+00 : f32
    %67 = vector.broadcast %cst_33 : f32 to vector<8x32xf32>
    %68 = arith.addf %67, %66 : vector<8x32xf32>
    %69 = arith.divf %67, %68 : vector<8x32xf32>
    %70 = vector.extract_strided_slice %61 {offsets = [0, 32], sizes = [8, 32], strides = [1, 1]} : vector<8x64xf32> to vector<8x32xf32>
    %71 = arith.mulf %69, %70 : vector<8x32xf32>
    %c0_34 = arith.constant 0 : index
    %c0_35 = arith.constant 0 : index
    %72 = vector.load %arg6[%c0_34, %c0_35] : memref<48x32xf32, #tpu.memory_space<vmem>>, vector<8x32xf32>
    tpu.vector_store %arg6[%c0_34, %c0_35], %71 {strides = array<i32>} : memref<48x32xf32, #tpu.memory_space<vmem>>, vector<8x32xf32>,
    %c48_36 = arith.constant 48 : index
    %c0_37 = arith.constant 0 : index
    %73 = vector.load %arg1[%c48_36, %c0_37] : memref<288x32xf32, #tpu.memory_space<vmem>>, vector<8x32xf32>
    %c0_38 = arith.constant 0 : index
    %c0_39 = arith.constant 0 : index
    %74 = vector.load %arg6[%c0_38, %c0_39] : memref<48x32xf32, #tpu.memory_space<vmem>>, vector<8x32xf32>
    %75 = arith.mulf %73, %74 : vector<8x32xf32>
    %76 = vector.extract_strided_slice %29 {offsets = [8, 0], sizes = [8, 96], strides = [1, 1]} : vector<48x96xf32> to vector<8x96xf32>
    %cst_40 = arith.constant dense<0.000000e+00> : vector<8x96xf32>
    %77 = tpu.matmul %75, %2, %cst_40 {dimension_numbers = #tpu.dot_dimension_numbers<[1], [0], [0], [1], [0, 0, 1, 1], [], []>} : vector<8x32xf32>, vector<32x96xf32>, vector<8x96xf32> -> vector<8x96xf32>
    %78 = vector.broadcast %4 : vector<1x96xf32> to vector<8x96xf32>
    %79 = arith.addf %77, %78 : vector<8x96xf32>
    %80 = vector.extract_strided_slice %76 {offsets = [0, 0], sizes = [8, 32], strides = [1, 1]} : vector<8x96xf32> to vector<8x32xf32>
    %81 = vector.extract_strided_slice %79 {offsets = [0, 0], sizes = [8, 32], strides = [1, 1]} : vector<8x96xf32> to vector<8x32xf32>
    %82 = arith.addf %80, %81 : vector<8x32xf32>
    %83 = arith.negf %82 : vector<8x32xf32>
    %84 = math.exp %83 : vector<8x32xf32>
    %cst_41 = arith.constant 1.000000e+00 : f32
    %85 = vector.broadcast %cst_41 : f32 to vector<8x32xf32>
    %86 = arith.addf %85, %84 : vector<8x32xf32>
    %87 = arith.divf %85, %86 : vector<8x32xf32>
    %88 = vector.extract_strided_slice %76 {offsets = [0, 32], sizes = [8, 32], strides = [1, 1]} : vector<8x96xf32> to vector<8x32xf32>
    %89 = vector.extract_strided_slice %79 {offsets = [0, 32], sizes = [8, 32], strides = [1, 1]} : vector<8x96xf32> to vector<8x32xf32>
    %90 = arith.addf %88, %89 : vector<8x32xf32>
    %91 = arith.negf %90 : vector<8x32xf32>
    %92 = math.exp %91 : vector<8x32xf32>
    %cst_42 = arith.constant 1.000000e+00 : f32
    %93 = vector.broadcast %cst_42 : f32 to vector<8x32xf32>
    %94 = arith.addf %93, %92 : vector<8x32xf32>
    %95 = arith.divf %93, %94 : vector<8x32xf32>
    %96 = vector.extract_strided_slice %76 {offsets = [0, 64], sizes = [8, 32], strides = [1, 1]} : vector<8x96xf32> to vector<8x32xf32>
    %97 = vector.extract_strided_slice %79 {offsets = [0, 64], sizes = [8, 32], strides = [1, 1]} : vector<8x96xf32> to vector<8x32xf32>
    %98 = arith.mulf %87, %97 : vector<8x32xf32>
    %99 = arith.addf %96, %98 : vector<8x32xf32>
    %100 = math.tanh %99 : vector<8x32xf32>
    %cst_43 = arith.constant 1.000000e+00 : f32
    %101 = vector.broadcast %cst_43 : f32 to vector<8x32xf32>
    %102 = arith.subf %101, %95 : vector<8x32xf32>
    %103 = arith.mulf %102, %100 : vector<8x32xf32>
    %104 = arith.mulf %95, %75 : vector<8x32xf32>
    %105 = arith.addf %103, %104 : vector<8x32xf32>
    %c8_44 = arith.constant 8 : index
    %c0_45 = arith.constant 0 : index
    %106 = vector.load %arg4[%c8_44, %c0_45] : memref<48x32xf32, #tpu.memory_space<vmem>>, vector<8x32xf32>
    tpu.vector_store %arg4[%c8_44, %c0_45], %105 {strides = array<i32>} : memref<48x32xf32, #tpu.memory_space<vmem>>, vector<8x32xf32>,
    %cst_46 = arith.constant dense<0.000000e+00> : vector<8x64xf32>
    %107 = tpu.matmul %105, %9, %cst_46 {dimension_numbers = #tpu.dot_dimension_numbers<[1], [0], [0], [1], [0, 0, 1, 1], [], []>} : vector<8x32xf32>, vector<32x64xf32>, vector<8x64xf32> -> vector<8x64xf32>
    %108 = vector.extract_strided_slice %10 {offsets = [8, 0], sizes = [8, 64], strides = [1, 1]} : vector<48x64xf32> to vector<8x64xf32>
    %109 = arith.addf %107, %108 : vector<8x64xf32>
    %110 = vector.extract_strided_slice %109 {offsets = [0, 0], sizes = [8, 32], strides = [1, 1]} : vector<8x64xf32> to vector<8x32xf32>
    %111 = vector.broadcast %11 : vector<1x32xf32> to vector<8x32xf32>
    %112 = arith.addf %110, %111 : vector<8x32xf32>
    %113 = arith.negf %112 : vector<8x32xf32>
    %114 = math.exp %113 : vector<8x32xf32>
    %cst_47 = arith.constant 1.000000e+00 : f32
    %115 = vector.broadcast %cst_47 : f32 to vector<8x32xf32>
    %116 = arith.addf %115, %114 : vector<8x32xf32>
    %117 = arith.divf %115, %116 : vector<8x32xf32>
    %118 = vector.extract_strided_slice %109 {offsets = [0, 32], sizes = [8, 32], strides = [1, 1]} : vector<8x64xf32> to vector<8x32xf32>
    %119 = arith.mulf %117, %118 : vector<8x32xf32>
    %c8_48 = arith.constant 8 : index
    %c0_49 = arith.constant 0 : index
    %120 = vector.load %arg6[%c8_48, %c0_49] : memref<48x32xf32, #tpu.memory_space<vmem>>, vector<8x32xf32>
    tpu.vector_store %arg6[%c8_48, %c0_49], %119 {strides = array<i32>} : memref<48x32xf32, #tpu.memory_space<vmem>>, vector<8x32xf32>,
    %c96_50 = arith.constant 96 : index
    %c0_51 = arith.constant 0 : index
    %121 = vector.load %arg1[%c96_50, %c0_51] : memref<288x32xf32, #tpu.memory_space<vmem>>, vector<16x32xf32>
    %c0_52 = arith.constant 0 : index
    %c0_53 = arith.constant 0 : index
    %122 = vector.load %arg6[%c0_52, %c0_53] : memref<48x32xf32, #tpu.memory_space<vmem>>, vector<16x32xf32>
    %123 = arith.mulf %121, %122 : vector<16x32xf32>
    %124 = vector.extract_strided_slice %123 {offsets = [0, 0], sizes = [8, 32], strides = [1, 1]} : vector<16x32xf32> to vector<8x32xf32>
    %125 = vector.extract_strided_slice %123 {offsets = [8, 0], sizes = [8, 32], strides = [1, 1]} : vector<16x32xf32> to vector<8x32xf32>
    %126 = arith.addf %124, %125 : vector<8x32xf32>
    %127 = vector.extract_strided_slice %29 {offsets = [16, 0], sizes = [8, 96], strides = [1, 1]} : vector<48x96xf32> to vector<8x96xf32>
    %cst_54 = arith.constant dense<0.000000e+00> : vector<8x96xf32>
    %128 = tpu.matmul %126, %2, %cst_54 {dimension_numbers = #tpu.dot_dimension_numbers<[1], [0], [0], [1], [0, 0, 1, 1], [], []>} : vector<8x32xf32>, vector<32x96xf32>, vector<8x96xf32> -> vector<8x96xf32>
    %129 = vector.broadcast %4 : vector<1x96xf32> to vector<8x96xf32>
    %130 = arith.addf %128, %129 : vector<8x96xf32>
    %131 = vector.extract_strided_slice %127 {offsets = [0, 0], sizes = [8, 32], strides = [1, 1]} : vector<8x96xf32> to vector<8x32xf32>
    %132 = vector.extract_strided_slice %130 {offsets = [0, 0], sizes = [8, 32], strides = [1, 1]} : vector<8x96xf32> to vector<8x32xf32>
    %133 = arith.addf %131, %132 : vector<8x32xf32>
    %134 = arith.negf %133 : vector<8x32xf32>
    %135 = math.exp %134 : vector<8x32xf32>
    %cst_55 = arith.constant 1.000000e+00 : f32
    %136 = vector.broadcast %cst_55 : f32 to vector<8x32xf32>
    %137 = arith.addf %136, %135 : vector<8x32xf32>
    %138 = arith.divf %136, %137 : vector<8x32xf32>
    %139 = vector.extract_strided_slice %127 {offsets = [0, 32], sizes = [8, 32], strides = [1, 1]} : vector<8x96xf32> to vector<8x32xf32>
    %140 = vector.extract_strided_slice %130 {offsets = [0, 32], sizes = [8, 32], strides = [1, 1]} : vector<8x96xf32> to vector<8x32xf32>
    %141 = arith.addf %139, %140 : vector<8x32xf32>
    %142 = arith.negf %141 : vector<8x32xf32>
    %143 = math.exp %142 : vector<8x32xf32>
    %cst_56 = arith.constant 1.000000e+00 : f32
    %144 = vector.broadcast %cst_56 : f32 to vector<8x32xf32>
    %145 = arith.addf %144, %143 : vector<8x32xf32>
    %146 = arith.divf %144, %145 : vector<8x32xf32>
    %147 = vector.extract_strided_slice %127 {offsets = [0, 64], sizes = [8, 32], strides = [1, 1]} : vector<8x96xf32> to vector<8x32xf32>
    %148 = vector.extract_strided_slice %130 {offsets = [0, 64], sizes = [8, 32], strides = [1, 1]} : vector<8x96xf32> to vector<8x32xf32>
    %149 = arith.mulf %138, %148 : vector<8x32xf32>
    %150 = arith.addf %147, %149 : vector<8x32xf32>
    %151 = math.tanh %150 : vector<8x32xf32>
    %cst_57 = arith.constant 1.000000e+00 : f32
    %152 = vector.broadcast %cst_57 : f32 to vector<8x32xf32>
    %153 = arith.subf %152, %146 : vector<8x32xf32>
    %154 = arith.mulf %153, %151 : vector<8x32xf32>
    %155 = arith.mulf %146, %126 : vector<8x32xf32>
    %156 = arith.addf %154, %155 : vector<8x32xf32>
    %c16 = arith.constant 16 : index
    %c0_58 = arith.constant 0 : index
    %157 = vector.load %arg4[%c16, %c0_58] : memref<48x32xf32, #tpu.memory_space<vmem>>, vector<8x32xf32>
    tpu.vector_store %arg4[%c16, %c0_58], %156 {strides = array<i32>} : memref<48x32xf32, #tpu.memory_space<vmem>>, vector<8x32xf32>,
    %cst_59 = arith.constant dense<0.000000e+00> : vector<8x64xf32>
    %158 = tpu.matmul %156, %9, %cst_59 {dimension_numbers = #tpu.dot_dimension_numbers<[1], [0], [0], [1], [0, 0, 1, 1], [], []>} : vector<8x32xf32>, vector<32x64xf32>, vector<8x64xf32> -> vector<8x64xf32>
    %159 = vector.extract_strided_slice %10 {offsets = [16, 0], sizes = [8, 64], strides = [1, 1]} : vector<48x64xf32> to vector<8x64xf32>
    %160 = arith.addf %158, %159 : vector<8x64xf32>
    %161 = vector.extract_strided_slice %160 {offsets = [0, 0], sizes = [8, 32], strides = [1, 1]} : vector<8x64xf32> to vector<8x32xf32>
    %162 = vector.broadcast %11 : vector<1x32xf32> to vector<8x32xf32>
    %163 = arith.addf %161, %162 : vector<8x32xf32>
    %164 = arith.negf %163 : vector<8x32xf32>
    %165 = math.exp %164 : vector<8x32xf32>
    %cst_60 = arith.constant 1.000000e+00 : f32
    %166 = vector.broadcast %cst_60 : f32 to vector<8x32xf32>
    %167 = arith.addf %166, %165 : vector<8x32xf32>
    %168 = arith.divf %166, %167 : vector<8x32xf32>
    %169 = vector.extract_strided_slice %160 {offsets = [0, 32], sizes = [8, 32], strides = [1, 1]} : vector<8x64xf32> to vector<8x32xf32>
    %170 = arith.mulf %168, %169 : vector<8x32xf32>
    %c16_61 = arith.constant 16 : index
    %c0_62 = arith.constant 0 : index
    %171 = vector.load %arg6[%c16_61, %c0_62] : memref<48x32xf32, #tpu.memory_space<vmem>>, vector<8x32xf32>
    tpu.vector_store %arg6[%c16_61, %c0_62], %170 {strides = array<i32>} : memref<48x32xf32, #tpu.memory_space<vmem>>, vector<8x32xf32>,
    %c144_63 = arith.constant 144 : index
    %c0_64 = arith.constant 0 : index
    %172 = vector.load %arg1[%c144_63, %c0_64] : memref<288x32xf32, #tpu.memory_space<vmem>>, vector<24x32xf32>
    %c0_65 = arith.constant 0 : index
    %c0_66 = arith.constant 0 : index
    %173 = vector.load %arg6[%c0_65, %c0_66] : memref<48x32xf32, #tpu.memory_space<vmem>>, vector<24x32xf32>
    %174 = arith.mulf %172, %173 : vector<24x32xf32>
    %175 = vector.extract_strided_slice %174 {offsets = [0, 0], sizes = [8, 32], strides = [1, 1]} : vector<24x32xf32> to vector<8x32xf32>
    %176 = vector.extract_strided_slice %174 {offsets = [8, 0], sizes = [8, 32], strides = [1, 1]} : vector<24x32xf32> to vector<8x32xf32>
    %177 = arith.addf %175, %176 : vector<8x32xf32>
    %178 = vector.extract_strided_slice %174 {offsets = [16, 0], sizes = [8, 32], strides = [1, 1]} : vector<24x32xf32> to vector<8x32xf32>
    %179 = arith.addf %177, %178 : vector<8x32xf32>
    %180 = vector.extract_strided_slice %29 {offsets = [24, 0], sizes = [8, 96], strides = [1, 1]} : vector<48x96xf32> to vector<8x96xf32>
    %cst_67 = arith.constant dense<0.000000e+00> : vector<8x96xf32>
    %181 = tpu.matmul %179, %2, %cst_67 {dimension_numbers = #tpu.dot_dimension_numbers<[1], [0], [0], [1], [0, 0, 1, 1], [], []>} : vector<8x32xf32>, vector<32x96xf32>, vector<8x96xf32> -> vector<8x96xf32>
    %182 = vector.broadcast %4 : vector<1x96xf32> to vector<8x96xf32>
    %183 = arith.addf %181, %182 : vector<8x96xf32>
    %184 = vector.extract_strided_slice %180 {offsets = [0, 0], sizes = [8, 32], strides = [1, 1]} : vector<8x96xf32> to vector<8x32xf32>
    %185 = vector.extract_strided_slice %183 {offsets = [0, 0], sizes = [8, 32], strides = [1, 1]} : vector<8x96xf32> to vector<8x32xf32>
    %186 = arith.addf %184, %185 : vector<8x32xf32>
    %187 = arith.negf %186 : vector<8x32xf32>
    %188 = math.exp %187 : vector<8x32xf32>
    %cst_68 = arith.constant 1.000000e+00 : f32
    %189 = vector.broadcast %cst_68 : f32 to vector<8x32xf32>
    %190 = arith.addf %189, %188 : vector<8x32xf32>
    %191 = arith.divf %189, %190 : vector<8x32xf32>
    %192 = vector.extract_strided_slice %180 {offsets = [0, 32], sizes = [8, 32], strides = [1, 1]} : vector<8x96xf32> to vector<8x32xf32>
    %193 = vector.extract_strided_slice %183 {offsets = [0, 32], sizes = [8, 32], strides = [1, 1]} : vector<8x96xf32> to vector<8x32xf32>
    %194 = arith.addf %192, %193 : vector<8x32xf32>
    %195 = arith.negf %194 : vector<8x32xf32>
    %196 = math.exp %195 : vector<8x32xf32>
    %cst_69 = arith.constant 1.000000e+00 : f32
    %197 = vector.broadcast %cst_69 : f32 to vector<8x32xf32>
    %198 = arith.addf %197, %196 : vector<8x32xf32>
    %199 = arith.divf %197, %198 : vector<8x32xf32>
    %200 = vector.extract_strided_slice %180 {offsets = [0, 64], sizes = [8, 32], strides = [1, 1]} : vector<8x96xf32> to vector<8x32xf32>
    %201 = vector.extract_strided_slice %183 {offsets = [0, 64], sizes = [8, 32], strides = [1, 1]} : vector<8x96xf32> to vector<8x32xf32>
    %202 = arith.mulf %191, %201 : vector<8x32xf32>
    %203 = arith.addf %200, %202 : vector<8x32xf32>
    %204 = math.tanh %203 : vector<8x32xf32>
    %cst_70 = arith.constant 1.000000e+00 : f32
    %205 = vector.broadcast %cst_70 : f32 to vector<8x32xf32>
    %206 = arith.subf %205, %199 : vector<8x32xf32>
    %207 = arith.mulf %206, %204 : vector<8x32xf32>
    %208 = arith.mulf %199, %179 : vector<8x32xf32>
    %209 = arith.addf %207, %208 : vector<8x32xf32>
    %c24 = arith.constant 24 : index
    %c0_71 = arith.constant 0 : index
    %210 = vector.load %arg4[%c24, %c0_71] : memref<48x32xf32, #tpu.memory_space<vmem>>, vector<8x32xf32>
    tpu.vector_store %arg4[%c24, %c0_71], %209 {strides = array<i32>} : memref<48x32xf32, #tpu.memory_space<vmem>>, vector<8x32xf32>,
    %cst_72 = arith.constant dense<0.000000e+00> : vector<8x64xf32>
    %211 = tpu.matmul %209, %9, %cst_72 {dimension_numbers = #tpu.dot_dimension_numbers<[1], [0], [0], [1], [0, 0, 1, 1], [], []>} : vector<8x32xf32>, vector<32x64xf32>, vector<8x64xf32> -> vector<8x64xf32>
    %212 = vector.extract_strided_slice %10 {offsets = [24, 0], sizes = [8, 64], strides = [1, 1]} : vector<48x64xf32> to vector<8x64xf32>
    %213 = arith.addf %211, %212 : vector<8x64xf32>
    %214 = vector.extract_strided_slice %213 {offsets = [0, 0], sizes = [8, 32], strides = [1, 1]} : vector<8x64xf32> to vector<8x32xf32>
    %215 = vector.broadcast %11 : vector<1x32xf32> to vector<8x32xf32>
    %216 = arith.addf %214, %215 : vector<8x32xf32>
    %217 = arith.negf %216 : vector<8x32xf32>
    %218 = math.exp %217 : vector<8x32xf32>
    %cst_73 = arith.constant 1.000000e+00 : f32
    %219 = vector.broadcast %cst_73 : f32 to vector<8x32xf32>
    %220 = arith.addf %219, %218 : vector<8x32xf32>
    %221 = arith.divf %219, %220 : vector<8x32xf32>
    %222 = vector.extract_strided_slice %213 {offsets = [0, 32], sizes = [8, 32], strides = [1, 1]} : vector<8x64xf32> to vector<8x32xf32>
    %223 = arith.mulf %221, %222 : vector<8x32xf32>
    %c24_74 = arith.constant 24 : index
    %c0_75 = arith.constant 0 : index
    %224 = vector.load %arg6[%c24_74, %c0_75] : memref<48x32xf32, #tpu.memory_space<vmem>>, vector<8x32xf32>
    tpu.vector_store %arg6[%c24_74, %c0_75], %223 {strides = array<i32>} : memref<48x32xf32, #tpu.memory_space<vmem>>, vector<8x32xf32>,
    %c192_76 = arith.constant 192 : index
    %c0_77 = arith.constant 0 : index
    %225 = vector.load %arg1[%c192_76, %c0_77] : memref<288x32xf32, #tpu.memory_space<vmem>>, vector<32x32xf32>
    %c0_78 = arith.constant 0 : index
    %c0_79 = arith.constant 0 : index
    %226 = vector.load %arg6[%c0_78, %c0_79] : memref<48x32xf32, #tpu.memory_space<vmem>>, vector<32x32xf32>
    %227 = arith.mulf %225, %226 : vector<32x32xf32>
    %228 = vector.extract_strided_slice %227 {offsets = [0, 0], sizes = [8, 32], strides = [1, 1]} : vector<32x32xf32> to vector<8x32xf32>
    %229 = vector.extract_strided_slice %227 {offsets = [8, 0], sizes = [8, 32], strides = [1, 1]} : vector<32x32xf32> to vector<8x32xf32>
    %230 = arith.addf %228, %229 : vector<8x32xf32>
    %231 = vector.extract_strided_slice %227 {offsets = [16, 0], sizes = [8, 32], strides = [1, 1]} : vector<32x32xf32> to vector<8x32xf32>
    %232 = arith.addf %230, %231 : vector<8x32xf32>
    %233 = vector.extract_strided_slice %227 {offsets = [24, 0], sizes = [8, 32], strides = [1, 1]} : vector<32x32xf32> to vector<8x32xf32>
    %234 = arith.addf %232, %233 : vector<8x32xf32>
    %235 = vector.extract_strided_slice %29 {offsets = [32, 0], sizes = [8, 96], strides = [1, 1]} : vector<48x96xf32> to vector<8x96xf32>
    %cst_80 = arith.constant dense<0.000000e+00> : vector<8x96xf32>
    %236 = tpu.matmul %234, %2, %cst_80 {dimension_numbers = #tpu.dot_dimension_numbers<[1], [0], [0], [1], [0, 0, 1, 1], [], []>} : vector<8x32xf32>, vector<32x96xf32>, vector<8x96xf32> -> vector<8x96xf32>
    %237 = vector.broadcast %4 : vector<1x96xf32> to vector<8x96xf32>
    %238 = arith.addf %236, %237 : vector<8x96xf32>
    %239 = vector.extract_strided_slice %235 {offsets = [0, 0], sizes = [8, 32], strides = [1, 1]} : vector<8x96xf32> to vector<8x32xf32>
    %240 = vector.extract_strided_slice %238 {offsets = [0, 0], sizes = [8, 32], strides = [1, 1]} : vector<8x96xf32> to vector<8x32xf32>
    %241 = arith.addf %239, %240 : vector<8x32xf32>
    %242 = arith.negf %241 : vector<8x32xf32>
    %243 = math.exp %242 : vector<8x32xf32>
    %cst_81 = arith.constant 1.000000e+00 : f32
    %244 = vector.broadcast %cst_81 : f32 to vector<8x32xf32>
    %245 = arith.addf %244, %243 : vector<8x32xf32>
    %246 = arith.divf %244, %245 : vector<8x32xf32>
    %247 = vector.extract_strided_slice %235 {offsets = [0, 32], sizes = [8, 32], strides = [1, 1]} : vector<8x96xf32> to vector<8x32xf32>
    %248 = vector.extract_strided_slice %238 {offsets = [0, 32], sizes = [8, 32], strides = [1, 1]} : vector<8x96xf32> to vector<8x32xf32>
    %249 = arith.addf %247, %248 : vector<8x32xf32>
    %250 = arith.negf %249 : vector<8x32xf32>
    %251 = math.exp %250 : vector<8x32xf32>
    %cst_82 = arith.constant 1.000000e+00 : f32
    %252 = vector.broadcast %cst_82 : f32 to vector<8x32xf32>
    %253 = arith.addf %252, %251 : vector<8x32xf32>
    %254 = arith.divf %252, %253 : vector<8x32xf32>
    %255 = vector.extract_strided_slice %235 {offsets = [0, 64], sizes = [8, 32], strides = [1, 1]} : vector<8x96xf32> to vector<8x32xf32>
    %256 = vector.extract_strided_slice %238 {offsets = [0, 64], sizes = [8, 32], strides = [1, 1]} : vector<8x96xf32> to vector<8x32xf32>
    %257 = arith.mulf %246, %256 : vector<8x32xf32>
    %258 = arith.addf %255, %257 : vector<8x32xf32>
    %259 = math.tanh %258 : vector<8x32xf32>
    %cst_83 = arith.constant 1.000000e+00 : f32
    %260 = vector.broadcast %cst_83 : f32 to vector<8x32xf32>
    %261 = arith.subf %260, %254 : vector<8x32xf32>
    %262 = arith.mulf %261, %259 : vector<8x32xf32>
    %263 = arith.mulf %254, %234 : vector<8x32xf32>
    %264 = arith.addf %262, %263 : vector<8x32xf32>
    %c32 = arith.constant 32 : index
    %c0_84 = arith.constant 0 : index
    %265 = vector.load %arg4[%c32, %c0_84] : memref<48x32xf32, #tpu.memory_space<vmem>>, vector<8x32xf32>
    tpu.vector_store %arg4[%c32, %c0_84], %264 {strides = array<i32>} : memref<48x32xf32, #tpu.memory_space<vmem>>, vector<8x32xf32>,
    %cst_85 = arith.constant dense<0.000000e+00> : vector<8x64xf32>
    %266 = tpu.matmul %264, %9, %cst_85 {dimension_numbers = #tpu.dot_dimension_numbers<[1], [0], [0], [1], [0, 0, 1, 1], [], []>} : vector<8x32xf32>, vector<32x64xf32>, vector<8x64xf32> -> vector<8x64xf32>
    %267 = vector.extract_strided_slice %10 {offsets = [32, 0], sizes = [8, 64], strides = [1, 1]} : vector<48x64xf32> to vector<8x64xf32>
    %268 = arith.addf %266, %267 : vector<8x64xf32>
    %269 = vector.extract_strided_slice %268 {offsets = [0, 0], sizes = [8, 32], strides = [1, 1]} : vector<8x64xf32> to vector<8x32xf32>
    %270 = vector.broadcast %11 : vector<1x32xf32> to vector<8x32xf32>
    %271 = arith.addf %269, %270 : vector<8x32xf32>
    %272 = arith.negf %271 : vector<8x32xf32>
    %273 = math.exp %272 : vector<8x32xf32>
    %cst_86 = arith.constant 1.000000e+00 : f32
    %274 = vector.broadcast %cst_86 : f32 to vector<8x32xf32>
    %275 = arith.addf %274, %273 : vector<8x32xf32>
    %276 = arith.divf %274, %275 : vector<8x32xf32>
    %277 = vector.extract_strided_slice %268 {offsets = [0, 32], sizes = [8, 32], strides = [1, 1]} : vector<8x64xf32> to vector<8x32xf32>
    %278 = arith.mulf %276, %277 : vector<8x32xf32>
    %c32_87 = arith.constant 32 : index
    %c0_88 = arith.constant 0 : index
    %279 = vector.load %arg6[%c32_87, %c0_88] : memref<48x32xf32, #tpu.memory_space<vmem>>, vector<8x32xf32>
    tpu.vector_store %arg6[%c32_87, %c0_88], %278 {strides = array<i32>} : memref<48x32xf32, #tpu.memory_space<vmem>>, vector<8x32xf32>,
    %c240_89 = arith.constant 240 : index
    %c0_90 = arith.constant 0 : index
    %280 = vector.load %arg1[%c240_89, %c0_90] : memref<288x32xf32, #tpu.memory_space<vmem>>, vector<40x32xf32>
    %c0_91 = arith.constant 0 : index
    %c0_92 = arith.constant 0 : index
    %281 = vector.load %arg6[%c0_91, %c0_92] : memref<48x32xf32, #tpu.memory_space<vmem>>, vector<40x32xf32>
    %282 = arith.mulf %280, %281 : vector<40x32xf32>
    %283 = vector.extract_strided_slice %282 {offsets = [0, 0], sizes = [8, 32], strides = [1, 1]} : vector<40x32xf32> to vector<8x32xf32>
    %284 = vector.extract_strided_slice %282 {offsets = [8, 0], sizes = [8, 32], strides = [1, 1]} : vector<40x32xf32> to vector<8x32xf32>
    %285 = arith.addf %283, %284 : vector<8x32xf32>
    %286 = vector.extract_strided_slice %282 {offsets = [16, 0], sizes = [8, 32], strides = [1, 1]} : vector<40x32xf32> to vector<8x32xf32>
    %287 = arith.addf %285, %286 : vector<8x32xf32>
    %288 = vector.extract_strided_slice %282 {offsets = [24, 0], sizes = [8, 32], strides = [1, 1]} : vector<40x32xf32> to vector<8x32xf32>
    %289 = arith.addf %287, %288 : vector<8x32xf32>
    %290 = vector.extract_strided_slice %282 {offsets = [32, 0], sizes = [8, 32], strides = [1, 1]} : vector<40x32xf32> to vector<8x32xf32>
    %291 = arith.addf %289, %290 : vector<8x32xf32>
    %292 = vector.extract_strided_slice %29 {offsets = [40, 0], sizes = [8, 96], strides = [1, 1]} : vector<48x96xf32> to vector<8x96xf32>
    %cst_93 = arith.constant dense<0.000000e+00> : vector<8x96xf32>
    %293 = tpu.matmul %291, %2, %cst_93 {dimension_numbers = #tpu.dot_dimension_numbers<[1], [0], [0], [1], [0, 0, 1, 1], [], []>} : vector<8x32xf32>, vector<32x96xf32>, vector<8x96xf32> -> vector<8x96xf32>
    %294 = vector.broadcast %4 : vector<1x96xf32> to vector<8x96xf32>
    %295 = arith.addf %293, %294 : vector<8x96xf32>
    %296 = vector.extract_strided_slice %292 {offsets = [0, 0], sizes = [8, 32], strides = [1, 1]} : vector<8x96xf32> to vector<8x32xf32>
    %297 = vector.extract_strided_slice %295 {offsets = [0, 0], sizes = [8, 32], strides = [1, 1]} : vector<8x96xf32> to vector<8x32xf32>
    %298 = arith.addf %296, %297 : vector<8x32xf32>
    %299 = arith.negf %298 : vector<8x32xf32>
    %300 = math.exp %299 : vector<8x32xf32>
    %cst_94 = arith.constant 1.000000e+00 : f32
    %301 = vector.broadcast %cst_94 : f32 to vector<8x32xf32>
    %302 = arith.addf %301, %300 : vector<8x32xf32>
    %303 = arith.divf %301, %302 : vector<8x32xf32>
    %304 = vector.extract_strided_slice %292 {offsets = [0, 32], sizes = [8, 32], strides = [1, 1]} : vector<8x96xf32> to vector<8x32xf32>
    %305 = vector.extract_strided_slice %295 {offsets = [0, 32], sizes = [8, 32], strides = [1, 1]} : vector<8x96xf32> to vector<8x32xf32>
    %306 = arith.addf %304, %305 : vector<8x32xf32>
    %307 = arith.negf %306 : vector<8x32xf32>
    %308 = math.exp %307 : vector<8x32xf32>
    %cst_95 = arith.constant 1.000000e+00 : f32
    %309 = vector.broadcast %cst_95 : f32 to vector<8x32xf32>
    %310 = arith.addf %309, %308 : vector<8x32xf32>
    %311 = arith.divf %309, %310 : vector<8x32xf32>
    %312 = vector.extract_strided_slice %292 {offsets = [0, 64], sizes = [8, 32], strides = [1, 1]} : vector<8x96xf32> to vector<8x32xf32>
    %313 = vector.extract_strided_slice %295 {offsets = [0, 64], sizes = [8, 32], strides = [1, 1]} : vector<8x96xf32> to vector<8x32xf32>
    %314 = arith.mulf %303, %313 : vector<8x32xf32>
    %315 = arith.addf %312, %314 : vector<8x32xf32>
    %316 = math.tanh %315 : vector<8x32xf32>
    %cst_96 = arith.constant 1.000000e+00 : f32
    %317 = vector.broadcast %cst_96 : f32 to vector<8x32xf32>
    %318 = arith.subf %317, %311 : vector<8x32xf32>
    %319 = arith.mulf %318, %316 : vector<8x32xf32>
    %320 = arith.mulf %311, %291 : vector<8x32xf32>
    %321 = arith.addf %319, %320 : vector<8x32xf32>
    %c40_97 = arith.constant 40 : index
    %c0_98 = arith.constant 0 : index
    %322 = vector.load %arg4[%c40_97, %c0_98] : memref<48x32xf32, #tpu.memory_space<vmem>>, vector<8x32xf32>
    tpu.vector_store %arg4[%c40_97, %c0_98], %321 {strides = array<i32>} : memref<48x32xf32, #tpu.memory_space<vmem>>, vector<8x32xf32>,
    %c40_99 = arith.constant 40 : index
    %c0_100 = arith.constant 0 : index
    %323 = vector.load %arg4[%c40_99, %c0_100] : memref<48x32xf32, #tpu.memory_space<vmem>>, vector<8x32xf32>
    %cst_101 = arith.constant dense<0.000000e+00> : vector<8x16xf32>
    %324 = tpu.matmul %323, %12, %cst_101 {dimension_numbers = #tpu.dot_dimension_numbers<[1], [0], [0], [1], [0, 0, 1, 1], [], []>} : vector<8x32xf32>, vector<32x16xf32>, vector<8x16xf32> -> vector<8x16xf32>
    %325 = vector.broadcast %13 : vector<1x16xf32> to vector<8x16xf32>
    %326 = arith.addf %324, %325 : vector<8x16xf32>
    %327 = vector.extract_strided_slice %326 {offsets = [0, 0], sizes = [8, 8], strides = [1, 1]} : vector<8x16xf32> to vector<8x8xf32>
    %328 = vector.broadcast %26 : vector<8x1xf32> to vector<8x8xf32>
    %329 = arith.mulf %327, %328 : vector<8x8xf32>
    %330 = vector.extract_strided_slice %326 {offsets = [0, 8], sizes = [8, 8], strides = [1, 1]} : vector<8x16xf32> to vector<8x8xf32>
    %331 = vector.broadcast %26 : vector<8x1xf32> to vector<8x8xf32>
    %332 = arith.mulf %330, %331 : vector<8x8xf32>
    %cst_102 = arith.constant dense<0.000000e+00> : vector<8x32xf32>
    %333 = tpu.matmul %329, %14, %cst_102 {dimension_numbers = #tpu.dot_dimension_numbers<[1], [0], [0], [1], [0, 0, 1, 1], [], []>} : vector<8x8xf32>, vector<8x32xf32>, vector<8x32xf32> -> vector<8x32xf32>
    %334 = vector.broadcast %15 : vector<1x32xf32> to vector<8x32xf32>
    %335 = arith.addf %333, %334 : vector<8x32xf32>
    %336 = math.tanh %335 : vector<8x32xf32>
    %cst_103 = arith.constant dense<0.000000e+00> : vector<48x96xf32>
    %337 = tpu.matmul %0, %5, %cst_103 {dimension_numbers = #tpu.dot_dimension_numbers<[1], [0], [0], [1], [0, 0, 1, 1], [], []>} : vector<48x6xf32>, vector<6x96xf32>, vector<48x96xf32> -> vector<48x96xf32>
    %338 = vector.broadcast %7 : vector<1x96xf32> to vector<48x96xf32>
    %339 = arith.addf %337, %338 : vector<48x96xf32>
    %340 = vector.extract_strided_slice %5 {offsets = [0, 0], sizes = [1, 96], strides = [1, 1]} : vector<6x96xf32> to vector<1x96xf32>
    %341 = arith.addf %340, %7 : vector<1x96xf32>
    %cst_104 = arith.constant dense<0.000000e+00> : vector<8x96xf32>
    %342 = tpu.matmul %336, %6, %cst_104 {dimension_numbers = #tpu.dot_dimension_numbers<[1], [0], [0], [1], [0, 0, 1, 1], [], []>} : vector<8x32xf32>, vector<32x96xf32>, vector<8x96xf32> -> vector<8x96xf32>
    %343 = vector.broadcast %8 : vector<1x96xf32> to vector<8x96xf32>
    %344 = arith.addf %342, %343 : vector<8x96xf32>
    %345 = vector.extract_strided_slice %341 {offsets = [0, 0], sizes = [1, 32], strides = [1, 1]} : vector<1x96xf32> to vector<1x32xf32>
    %346 = vector.extract_strided_slice %344 {offsets = [0, 0], sizes = [8, 32], strides = [1, 1]} : vector<8x96xf32> to vector<8x32xf32>
    %347 = vector.broadcast %345 : vector<1x32xf32> to vector<8x32xf32>
    %348 = arith.addf %347, %346 : vector<8x32xf32>
    %349 = arith.negf %348 : vector<8x32xf32>
    %350 = math.exp %349 : vector<8x32xf32>
    %cst_105 = arith.constant 1.000000e+00 : f32
    %351 = vector.broadcast %cst_105 : f32 to vector<8x32xf32>
    %352 = arith.addf %351, %350 : vector<8x32xf32>
    %353 = arith.divf %351, %352 : vector<8x32xf32>
    %354 = vector.extract_strided_slice %341 {offsets = [0, 32], sizes = [1, 32], strides = [1, 1]} : vector<1x96xf32> to vector<1x32xf32>
    %355 = vector.extract_strided_slice %344 {offsets = [0, 32], sizes = [8, 32], strides = [1, 1]} : vector<8x96xf32> to vector<8x32xf32>
    %356 = vector.broadcast %354 : vector<1x32xf32> to vector<8x32xf32>
    %357 = arith.addf %356, %355 : vector<8x32xf32>
    %358 = arith.negf %357 : vector<8x32xf32>
    %359 = math.exp %358 : vector<8x32xf32>
    %cst_106 = arith.constant 1.000000e+00 : f32
    %360 = vector.broadcast %cst_106 : f32 to vector<8x32xf32>
    %361 = arith.addf %360, %359 : vector<8x32xf32>
    %362 = arith.divf %360, %361 : vector<8x32xf32>
    %363 = vector.extract_strided_slice %341 {offsets = [0, 64], sizes = [1, 32], strides = [1, 1]} : vector<1x96xf32> to vector<1x32xf32>
    %364 = vector.extract_strided_slice %344 {offsets = [0, 64], sizes = [8, 32], strides = [1, 1]} : vector<8x96xf32> to vector<8x32xf32>
    %365 = arith.mulf %353, %364 : vector<8x32xf32>
    %366 = vector.broadcast %363 : vector<1x32xf32> to vector<8x32xf32>
    %367 = arith.addf %366, %365 : vector<8x32xf32>
    %368 = math.tanh %367 : vector<8x32xf32>
    %cst_107 = arith.constant 1.000000e+00 : f32
    %369 = vector.broadcast %cst_107 : f32 to vector<8x32xf32>
    %370 = arith.subf %369, %362 : vector<8x32xf32>
    %371 = arith.mulf %370, %368 : vector<8x32xf32>
    %372 = arith.mulf %362, %336 : vector<8x32xf32>
    %373 = arith.addf %371, %372 : vector<8x32xf32>
    %c0_108 = arith.constant 0 : index
    %c0_109 = arith.constant 0 : index
    %374 = vector.load %arg5[%c0_108, %c0_109] : memref<48x32xf32, #tpu.memory_space<vmem>>, vector<8x32xf32>
    tpu.vector_store %arg5[%c0_108, %c0_109], %373 {strides = array<i32>} : memref<48x32xf32, #tpu.memory_space<vmem>>, vector<8x32xf32>,
    %cst_110 = arith.constant dense<0.000000e+00> : vector<8x64xf32>
    %375 = tpu.matmul %373, %9, %cst_110 {dimension_numbers = #tpu.dot_dimension_numbers<[1], [0], [0], [1], [0, 0, 1, 1], [], []>} : vector<8x32xf32>, vector<32x64xf32>, vector<8x64xf32> -> vector<8x64xf32>
    %376 = vector.extract_strided_slice %10 {offsets = [0, 0], sizes = [8, 64], strides = [1, 1]} : vector<48x64xf32> to vector<8x64xf32>
    %377 = arith.addf %375, %376 : vector<8x64xf32>
    %378 = vector.extract_strided_slice %377 {offsets = [0, 0], sizes = [8, 32], strides = [1, 1]} : vector<8x64xf32> to vector<8x32xf32>
    %379 = vector.broadcast %11 : vector<1x32xf32> to vector<8x32xf32>
    %380 = arith.addf %378, %379 : vector<8x32xf32>
    %381 = arith.negf %380 : vector<8x32xf32>
    %382 = math.exp %381 : vector<8x32xf32>
    %cst_111 = arith.constant 1.000000e+00 : f32
    %383 = vector.broadcast %cst_111 : f32 to vector<8x32xf32>
    %384 = arith.addf %383, %382 : vector<8x32xf32>
    %385 = arith.divf %383, %384 : vector<8x32xf32>
    %386 = vector.extract_strided_slice %377 {offsets = [0, 32], sizes = [8, 32], strides = [1, 1]} : vector<8x64xf32> to vector<8x32xf32>
    %387 = arith.mulf %385, %386 : vector<8x32xf32>
    %c0_112 = arith.constant 0 : index
    %c0_113 = arith.constant 0 : index
    %388 = vector.load %arg7[%c0_112, %c0_113] : memref<48x32xf32, #tpu.memory_space<vmem>>, vector<8x32xf32>
    tpu.vector_store %arg7[%c0_112, %c0_113], %387 {strides = array<i32>} : memref<48x32xf32, #tpu.memory_space<vmem>>, vector<8x32xf32>,
    %cst_114 = arith.constant dense<0.000000e+00> : vector<8x128xf32>
    %389 = tpu.matmul %373, %20, %cst_114 {dimension_numbers = #tpu.dot_dimension_numbers<[1], [0], [0], [1], [0, 0, 1, 1], [], []>} : vector<8x32xf32>, vector<32x128xf32>, vector<8x128xf32> -> vector<8x128xf32>
    %390 = vector.broadcast %22 : vector<1x128xf32> to vector<8x128xf32>
    %391 = arith.addf %389, %390 : vector<8x128xf32>
    %c0_115 = arith.constant 0 : index
    %c0_116 = arith.constant 0 : index
    %392 = vector.load %arg8[%c0_115, %c0_116] : memref<48x128xf32, #tpu.memory_space<vmem>>, vector<8x128xf32>
    tpu.vector_store %arg8[%c0_115, %c0_116], %391 {strides = array<i32>} : memref<48x128xf32, #tpu.memory_space<vmem>>, vector<8x128xf32>,
    %cst_117 = arith.constant 0.000000e+00 : f32
    %393 = vector.broadcast %cst_117 : f32 to vector<1x1xf32>
    %394 = vector.extract_strided_slice %339 {offsets = [8, 0], sizes = [8, 96], strides = [1, 1]} : vector<48x96xf32> to vector<8x96xf32>
    %c48_118 = arith.constant 48 : index
    %c0_119 = arith.constant 0 : index
    %395 = vector.load %arg1[%c48_118, %c0_119] : memref<288x32xf32, #tpu.memory_space<vmem>>, vector<8x32xf32>
    %c0_120 = arith.constant 0 : index
    %c0_121 = arith.constant 0 : index
    %396 = vector.load %arg7[%c0_120, %c0_121] : memref<48x32xf32, #tpu.memory_space<vmem>>, vector<8x32xf32>
    %397 = arith.mulf %395, %396 : vector<8x32xf32>
    %cst_122 = arith.constant 0.000000e+00 : f32
    %398 = vector.broadcast %cst_122 : f32 to vector<8x32xf32>
    %399 = arith.addf %398, %397 : vector<8x32xf32>
    %400 = tpu.concatenate %399, %398 in 0 : vector<8x32xf32>, vector<8x32xf32> -> vector<16x32xf32>
    %401 = tpu.concatenate %394, %394 in 0 : vector<8x96xf32>, vector<8x96xf32> -> vector<16x96xf32>
    %cst_123 = arith.constant dense<0.000000e+00> : vector<16x96xf32>
    %402 = tpu.matmul %400, %6, %cst_123 {dimension_numbers = #tpu.dot_dimension_numbers<[1], [0], [0], [1], [0, 0, 1, 1], [], []>} : vector<16x32xf32>, vector<32x96xf32>, vector<16x96xf32> -> vector<16x96xf32>
    %403 = vector.broadcast %8 : vector<1x96xf32> to vector<16x96xf32>
    %404 = arith.addf %402, %403 : vector<16x96xf32>
    %405 = vector.extract_strided_slice %401 {offsets = [0, 0], sizes = [16, 32], strides = [1, 1]} : vector<16x96xf32> to vector<16x32xf32>
    %406 = vector.extract_strided_slice %404 {offsets = [0, 0], sizes = [16, 32], strides = [1, 1]} : vector<16x96xf32> to vector<16x32xf32>
    %407 = arith.addf %405, %406 : vector<16x32xf32>
    %408 = arith.negf %407 : vector<16x32xf32>
    %409 = math.exp %408 : vector<16x32xf32>
    %cst_124 = arith.constant 1.000000e+00 : f32
    %410 = vector.broadcast %cst_124 : f32 to vector<16x32xf32>
    %411 = arith.addf %410, %409 : vector<16x32xf32>
    %412 = arith.divf %410, %411 : vector<16x32xf32>
    %413 = vector.extract_strided_slice %401 {offsets = [0, 32], sizes = [16, 32], strides = [1, 1]} : vector<16x96xf32> to vector<16x32xf32>
    %414 = vector.extract_strided_slice %404 {offsets = [0, 32], sizes = [16, 32], strides = [1, 1]} : vector<16x96xf32> to vector<16x32xf32>
    %415 = arith.addf %413, %414 : vector<16x32xf32>
    %416 = arith.negf %415 : vector<16x32xf32>
    %417 = math.exp %416 : vector<16x32xf32>
    %cst_125 = arith.constant 1.000000e+00 : f32
    %418 = vector.broadcast %cst_125 : f32 to vector<16x32xf32>
    %419 = arith.addf %418, %417 : vector<16x32xf32>
    %420 = arith.divf %418, %419 : vector<16x32xf32>
    %421 = vector.extract_strided_slice %401 {offsets = [0, 64], sizes = [16, 32], strides = [1, 1]} : vector<16x96xf32> to vector<16x32xf32>
    %422 = vector.extract_strided_slice %404 {offsets = [0, 64], sizes = [16, 32], strides = [1, 1]} : vector<16x96xf32> to vector<16x32xf32>
    %423 = arith.mulf %412, %422 : vector<16x32xf32>
    %424 = arith.addf %421, %423 : vector<16x32xf32>
    %425 = math.tanh %424 : vector<16x32xf32>
    %cst_126 = arith.constant 1.000000e+00 : f32
    %426 = vector.broadcast %cst_126 : f32 to vector<16x32xf32>
    %427 = arith.subf %426, %420 : vector<16x32xf32>
    %428 = arith.mulf %427, %425 : vector<16x32xf32>
    %429 = arith.mulf %420, %400 : vector<16x32xf32>
    %430 = arith.addf %428, %429 : vector<16x32xf32>
    %c0_127 = arith.constant 0 : index
    %c0_128 = arith.constant 0 : index
    %431 = vector.load %arg8[%c0_127, %c0_128] : memref<48x128xf32, #tpu.memory_space<vmem>>, vector<8x128xf32>
    %432 = vector.extract_strided_slice %430 {offsets = [8, 0], sizes = [8, 32], strides = [1, 1]} : vector<16x32xf32> to vector<8x32xf32>
    %cst_129 = arith.constant dense<0.000000e+00> : vector<8x128xf32>
    %433 = tpu.matmul %432, %21, %cst_129 {dimension_numbers = #tpu.dot_dimension_numbers<[1], [0], [0], [1], [0, 0, 1, 1], [], []>} : vector<8x32xf32>, vector<32x128xf32>, vector<8x128xf32> -> vector<8x128xf32>
    %434 = arith.addf %431, %433 : vector<8x128xf32>
    %cst_130 = arith.constant 0.000000e+00 : f32
    %435 = vector.broadcast %cst_130 : f32 to vector<8x128xf32>
    %436 = arith.maximumf %434, %435 : vector<8x128xf32>
    %cst_131 = arith.constant dense<0.000000e+00> : vector<8x1xf32>
    %437 = tpu.matmul %436, %23, %cst_131 {dimension_numbers = #tpu.dot_dimension_numbers<[1], [0], [0], [1], [0, 0, 1, 1], [], []>} : vector<8x128xf32>, vector<128x1xf32>, vector<8x1xf32> -> vector<8x1xf32>
    %438 = vector.broadcast %24 : vector<1x1xf32> to vector<8x1xf32>
    %439 = arith.addf %437, %438 : vector<8x1xf32>
    %440 = vector.extract_strided_slice %395 {offsets = [0, 0], sizes = [8, 1], strides = [1, 1]} : vector<8x32xf32> to vector<8x1xf32>
    %cst_132 = arith.constant 0.000000e+00 : f32
    %441 = vector.broadcast %cst_132 : f32 to vector<8x1xf32>
    %442 = arith.maximumf %439, %441 : vector<8x1xf32>
    %443 = math.absf %439 : vector<8x1xf32>
    %cst_133 = arith.constant 0.000000e+00 : f32
    %444 = vector.broadcast %cst_133 : f32 to vector<8x1xf32>
    %445 = arith.subf %444, %443 : vector<8x1xf32>
    %446 = math.exp %445 : vector<8x1xf32>
    %cst_134 = arith.constant 1.000000e+00 : f32
    %447 = vector.broadcast %cst_134 : f32 to vector<8x1xf32>
    %448 = arith.addf %447, %446 : vector<8x1xf32>
    %449 = math.log %448 : vector<8x1xf32>
    %450 = arith.addf %442, %449 : vector<8x1xf32>
    %451 = vector.extract_strided_slice %25 {offsets = [0, 0], sizes = [8, 1], strides = [1, 1]} : vector<48x1xf32> to vector<8x1xf32>
    %452 = arith.mulf %440, %439 : vector<8x1xf32>
    %453 = arith.subf %452, %450 : vector<8x1xf32>
    %454 = arith.mulf %451, %453 : vector<8x1xf32>
    %455 = vector.shape_cast %454 : vector<8x1xf32> to vector<1x8x1xf32>
    %cst_135 = arith.constant dense<0.000000e+00> : vector<1xf32>
    %456 = vector.multi_reduction <add>, %455, %cst_135 [1, 2] : vector<1x8x1xf32> to vector<1xf32>
    %457 = vector.shape_cast %456 : vector<1xf32> to vector<1x1x1xf32>
    %458 = vector.extract %457[0, 0, 0] : f32 from vector<1x1x1xf32>
    %459 = vector.broadcast %458 : f32 to vector<1x1xf32>
    %460 = arith.addf %393, %459 : vector<1x1xf32>
    %461 = vector.extract_strided_slice %430 {offsets = [0, 0], sizes = [8, 32], strides = [1, 1]} : vector<16x32xf32> to vector<8x32xf32>
    %c8_136 = arith.constant 8 : index
    %c0_137 = arith.constant 0 : index
    %462 = vector.load %arg5[%c8_136, %c0_137] : memref<48x32xf32, #tpu.memory_space<vmem>>, vector<8x32xf32>
    tpu.vector_store %arg5[%c8_136, %c0_137], %461 {strides = array<i32>} : memref<48x32xf32, #tpu.memory_space<vmem>>, vector<8x32xf32>,
    %cst_138 = arith.constant dense<0.000000e+00> : vector<8x64xf32>
    %463 = tpu.matmul %461, %9, %cst_138 {dimension_numbers = #tpu.dot_dimension_numbers<[1], [0], [0], [1], [0, 0, 1, 1], [], []>} : vector<8x32xf32>, vector<32x64xf32>, vector<8x64xf32> -> vector<8x64xf32>
    %464 = vector.extract_strided_slice %10 {offsets = [8, 0], sizes = [8, 64], strides = [1, 1]} : vector<48x64xf32> to vector<8x64xf32>
    %465 = arith.addf %463, %464 : vector<8x64xf32>
    %466 = vector.extract_strided_slice %465 {offsets = [0, 0], sizes = [8, 32], strides = [1, 1]} : vector<8x64xf32> to vector<8x32xf32>
    %467 = vector.broadcast %11 : vector<1x32xf32> to vector<8x32xf32>
    %468 = arith.addf %466, %467 : vector<8x32xf32>
    %469 = arith.negf %468 : vector<8x32xf32>
    %470 = math.exp %469 : vector<8x32xf32>
    %cst_139 = arith.constant 1.000000e+00 : f32
    %471 = vector.broadcast %cst_139 : f32 to vector<8x32xf32>
    %472 = arith.addf %471, %470 : vector<8x32xf32>
    %473 = arith.divf %471, %472 : vector<8x32xf32>
    %474 = vector.extract_strided_slice %465 {offsets = [0, 32], sizes = [8, 32], strides = [1, 1]} : vector<8x64xf32> to vector<8x32xf32>
    %475 = arith.mulf %473, %474 : vector<8x32xf32>
    %c8_140 = arith.constant 8 : index
    %c0_141 = arith.constant 0 : index
    %476 = vector.load %arg7[%c8_140, %c0_141] : memref<48x32xf32, #tpu.memory_space<vmem>>, vector<8x32xf32>
    tpu.vector_store %arg7[%c8_140, %c0_141], %475 {strides = array<i32>} : memref<48x32xf32, #tpu.memory_space<vmem>>, vector<8x32xf32>,
    %cst_142 = arith.constant dense<0.000000e+00> : vector<8x128xf32>
    %477 = tpu.matmul %461, %20, %cst_142 {dimension_numbers = #tpu.dot_dimension_numbers<[1], [0], [0], [1], [0, 0, 1, 1], [], []>} : vector<8x32xf32>, vector<32x128xf32>, vector<8x128xf32> -> vector<8x128xf32>
    %478 = vector.broadcast %22 : vector<1x128xf32> to vector<8x128xf32>
    %479 = arith.addf %477, %478 : vector<8x128xf32>
    %c8_143 = arith.constant 8 : index
    %c0_144 = arith.constant 0 : index
    %480 = vector.load %arg8[%c8_143, %c0_144] : memref<48x128xf32, #tpu.memory_space<vmem>>, vector<8x128xf32>
    tpu.vector_store %arg8[%c8_143, %c0_144], %479 {strides = array<i32>} : memref<48x128xf32, #tpu.memory_space<vmem>>, vector<8x128xf32>,
    %481 = vector.extract_strided_slice %339 {offsets = [16, 0], sizes = [8, 96], strides = [1, 1]} : vector<48x96xf32> to vector<8x96xf32>
    %c96_145 = arith.constant 96 : index
    %c0_146 = arith.constant 0 : index
    %482 = vector.load %arg1[%c96_145, %c0_146] : memref<288x32xf32, #tpu.memory_space<vmem>>, vector<16x32xf32>
    %c0_147 = arith.constant 0 : index
    %c0_148 = arith.constant 0 : index
    %483 = vector.load %arg7[%c0_147, %c0_148] : memref<48x32xf32, #tpu.memory_space<vmem>>, vector<16x32xf32>
    %484 = arith.mulf %482, %483 : vector<16x32xf32>
    %cst_149 = arith.constant 0.000000e+00 : f32
    %485 = vector.broadcast %cst_149 : f32 to vector<8x32xf32>
    %486 = vector.extract_strided_slice %484 {offsets = [8, 0], sizes = [8, 32], strides = [1, 1]} : vector<16x32xf32> to vector<8x32xf32>
    %487 = arith.addf %485, %486 : vector<8x32xf32>
    %488 = vector.extract_strided_slice %484 {offsets = [0, 0], sizes = [8, 32], strides = [1, 1]} : vector<16x32xf32> to vector<8x32xf32>
    %489 = arith.addf %487, %488 : vector<8x32xf32>
    %490 = tpu.concatenate %489, %487, %485 in 0 : vector<8x32xf32>, vector<8x32xf32>, vector<8x32xf32> -> vector<24x32xf32>
    %491 = tpu.concatenate %481, %481, %481 in 0 : vector<8x96xf32>, vector<8x96xf32>, vector<8x96xf32> -> vector<24x96xf32>
    %cst_150 = arith.constant dense<0.000000e+00> : vector<24x96xf32>
    %492 = tpu.matmul %490, %6, %cst_150 {dimension_numbers = #tpu.dot_dimension_numbers<[1], [0], [0], [1], [0, 0, 1, 1], [], []>} : vector<24x32xf32>, vector<32x96xf32>, vector<24x96xf32> -> vector<24x96xf32>
    %493 = vector.broadcast %8 : vector<1x96xf32> to vector<24x96xf32>
    %494 = arith.addf %492, %493 : vector<24x96xf32>
    %495 = vector.extract_strided_slice %491 {offsets = [0, 0], sizes = [24, 32], strides = [1, 1]} : vector<24x96xf32> to vector<24x32xf32>
    %496 = vector.extract_strided_slice %494 {offsets = [0, 0], sizes = [24, 32], strides = [1, 1]} : vector<24x96xf32> to vector<24x32xf32>
    %497 = arith.addf %495, %496 : vector<24x32xf32>
    %498 = arith.negf %497 : vector<24x32xf32>
    %499 = math.exp %498 : vector<24x32xf32>
    %cst_151 = arith.constant 1.000000e+00 : f32
    %500 = vector.broadcast %cst_151 : f32 to vector<24x32xf32>
    %501 = arith.addf %500, %499 : vector<24x32xf32>
    %502 = arith.divf %500, %501 : vector<24x32xf32>
    %503 = vector.extract_strided_slice %491 {offsets = [0, 32], sizes = [24, 32], strides = [1, 1]} : vector<24x96xf32> to vector<24x32xf32>
    %504 = vector.extract_strided_slice %494 {offsets = [0, 32], sizes = [24, 32], strides = [1, 1]} : vector<24x96xf32> to vector<24x32xf32>
    %505 = arith.addf %503, %504 : vector<24x32xf32>
    %506 = arith.negf %505 : vector<24x32xf32>
    %507 = math.exp %506 : vector<24x32xf32>
    %cst_152 = arith.constant 1.000000e+00 : f32
    %508 = vector.broadcast %cst_152 : f32 to vector<24x32xf32>
    %509 = arith.addf %508, %507 : vector<24x32xf32>
    %510 = arith.divf %508, %509 : vector<24x32xf32>
    %511 = vector.extract_strided_slice %491 {offsets = [0, 64], sizes = [24, 32], strides = [1, 1]} : vector<24x96xf32> to vector<24x32xf32>
    %512 = vector.extract_strided_slice %494 {offsets = [0, 64], sizes = [24, 32], strides = [1, 1]} : vector<24x96xf32> to vector<24x32xf32>
    %513 = arith.mulf %502, %512 : vector<24x32xf32>
    %514 = arith.addf %511, %513 : vector<24x32xf32>
    %515 = math.tanh %514 : vector<24x32xf32>
    %cst_153 = arith.constant 1.000000e+00 : f32
    %516 = vector.broadcast %cst_153 : f32 to vector<24x32xf32>
    %517 = arith.subf %516, %510 : vector<24x32xf32>
    %518 = arith.mulf %517, %515 : vector<24x32xf32>
    %519 = arith.mulf %510, %490 : vector<24x32xf32>
    %520 = arith.addf %518, %519 : vector<24x32xf32>
    %c0_154 = arith.constant 0 : index
    %c0_155 = arith.constant 0 : index
    %521 = vector.load %arg8[%c0_154, %c0_155] : memref<48x128xf32, #tpu.memory_space<vmem>>, vector<16x128xf32>
    %522 = vector.extract_strided_slice %520 {offsets = [8, 0], sizes = [16, 32], strides = [1, 1]} : vector<24x32xf32> to vector<16x32xf32>
    %cst_156 = arith.constant dense<0.000000e+00> : vector<16x128xf32>
    %523 = tpu.matmul %522, %21, %cst_156 {dimension_numbers = #tpu.dot_dimension_numbers<[1], [0], [0], [1], [0, 0, 1, 1], [], []>} : vector<16x32xf32>, vector<32x128xf32>, vector<16x128xf32> -> vector<16x128xf32>
    %524 = arith.addf %521, %523 : vector<16x128xf32>
    %cst_157 = arith.constant 0.000000e+00 : f32
    %525 = vector.broadcast %cst_157 : f32 to vector<16x128xf32>
    %526 = arith.maximumf %524, %525 : vector<16x128xf32>
    %cst_158 = arith.constant dense<0.000000e+00> : vector<16x1xf32>
    %527 = tpu.matmul %526, %23, %cst_158 {dimension_numbers = #tpu.dot_dimension_numbers<[1], [0], [0], [1], [0, 0, 1, 1], [], []>} : vector<16x128xf32>, vector<128x1xf32>, vector<16x1xf32> -> vector<16x1xf32>
    %528 = vector.broadcast %24 : vector<1x1xf32> to vector<16x1xf32>
    %529 = arith.addf %527, %528 : vector<16x1xf32>
    %530 = vector.extract_strided_slice %482 {offsets = [0, 0], sizes = [16, 1], strides = [1, 1]} : vector<16x32xf32> to vector<16x1xf32>
    %cst_159 = arith.constant 0.000000e+00 : f32
    %531 = vector.broadcast %cst_159 : f32 to vector<16x1xf32>
    %532 = arith.maximumf %529, %531 : vector<16x1xf32>
    %533 = math.absf %529 : vector<16x1xf32>
    %cst_160 = arith.constant 0.000000e+00 : f32
    %534 = vector.broadcast %cst_160 : f32 to vector<16x1xf32>
    %535 = arith.subf %534, %533 : vector<16x1xf32>
    %536 = math.exp %535 : vector<16x1xf32>
    %cst_161 = arith.constant 1.000000e+00 : f32
    %537 = vector.broadcast %cst_161 : f32 to vector<16x1xf32>
    %538 = arith.addf %537, %536 : vector<16x1xf32>
    %539 = math.log %538 : vector<16x1xf32>
    %540 = arith.addf %532, %539 : vector<16x1xf32>
    %541 = vector.extract_strided_slice %25 {offsets = [0, 0], sizes = [16, 1], strides = [1, 1]} : vector<48x1xf32> to vector<16x1xf32>
    %542 = arith.mulf %530, %529 : vector<16x1xf32>
    %543 = arith.subf %542, %540 : vector<16x1xf32>
    %544 = arith.mulf %541, %543 : vector<16x1xf32>
    %545 = vector.shape_cast %544 : vector<16x1xf32> to vector<1x16x1xf32>
    %cst_162 = arith.constant dense<0.000000e+00> : vector<1xf32>
    %546 = vector.multi_reduction <add>, %545, %cst_162 [1, 2] : vector<1x16x1xf32> to vector<1xf32>
    %547 = vector.shape_cast %546 : vector<1xf32> to vector<1x1x1xf32>
    %548 = vector.extract %547[0, 0, 0] : f32 from vector<1x1x1xf32>
    %549 = vector.broadcast %548 : f32 to vector<1x1xf32>
    %550 = arith.addf %460, %549 : vector<1x1xf32>
    %551 = vector.extract_strided_slice %520 {offsets = [0, 0], sizes = [8, 32], strides = [1, 1]} : vector<24x32xf32> to vector<8x32xf32>
    %c16_163 = arith.constant 16 : index
    %c0_164 = arith.constant 0 : index
    %552 = vector.load %arg5[%c16_163, %c0_164] : memref<48x32xf32, #tpu.memory_space<vmem>>, vector<8x32xf32>
    tpu.vector_store %arg5[%c16_163, %c0_164], %551 {strides = array<i32>} : memref<48x32xf32, #tpu.memory_space<vmem>>, vector<8x32xf32>,
    %cst_165 = arith.constant dense<0.000000e+00> : vector<8x64xf32>
    %553 = tpu.matmul %551, %9, %cst_165 {dimension_numbers = #tpu.dot_dimension_numbers<[1], [0], [0], [1], [0, 0, 1, 1], [], []>} : vector<8x32xf32>, vector<32x64xf32>, vector<8x64xf32> -> vector<8x64xf32>
    %554 = vector.extract_strided_slice %10 {offsets = [16, 0], sizes = [8, 64], strides = [1, 1]} : vector<48x64xf32> to vector<8x64xf32>
    %555 = arith.addf %553, %554 : vector<8x64xf32>
    %556 = vector.extract_strided_slice %555 {offsets = [0, 0], sizes = [8, 32], strides = [1, 1]} : vector<8x64xf32> to vector<8x32xf32>
    %557 = vector.broadcast %11 : vector<1x32xf32> to vector<8x32xf32>
    %558 = arith.addf %556, %557 : vector<8x32xf32>
    %559 = arith.negf %558 : vector<8x32xf32>
    %560 = math.exp %559 : vector<8x32xf32>
    %cst_166 = arith.constant 1.000000e+00 : f32
    %561 = vector.broadcast %cst_166 : f32 to vector<8x32xf32>
    %562 = arith.addf %561, %560 : vector<8x32xf32>
    %563 = arith.divf %561, %562 : vector<8x32xf32>
    %564 = vector.extract_strided_slice %555 {offsets = [0, 32], sizes = [8, 32], strides = [1, 1]} : vector<8x64xf32> to vector<8x32xf32>
    %565 = arith.mulf %563, %564 : vector<8x32xf32>
    %c16_167 = arith.constant 16 : index
    %c0_168 = arith.constant 0 : index
    %566 = vector.load %arg7[%c16_167, %c0_168] : memref<48x32xf32, #tpu.memory_space<vmem>>, vector<8x32xf32>
    tpu.vector_store %arg7[%c16_167, %c0_168], %565 {strides = array<i32>} : memref<48x32xf32, #tpu.memory_space<vmem>>, vector<8x32xf32>,
    %cst_169 = arith.constant dense<0.000000e+00> : vector<8x128xf32>
    %567 = tpu.matmul %551, %20, %cst_169 {dimension_numbers = #tpu.dot_dimension_numbers<[1], [0], [0], [1], [0, 0, 1, 1], [], []>} : vector<8x32xf32>, vector<32x128xf32>, vector<8x128xf32> -> vector<8x128xf32>
    %568 = vector.broadcast %22 : vector<1x128xf32> to vector<8x128xf32>
    %569 = arith.addf %567, %568 : vector<8x128xf32>
    %c16_170 = arith.constant 16 : index
    %c0_171 = arith.constant 0 : index
    %570 = vector.load %arg8[%c16_170, %c0_171] : memref<48x128xf32, #tpu.memory_space<vmem>>, vector<8x128xf32>
    tpu.vector_store %arg8[%c16_170, %c0_171], %569 {strides = array<i32>} : memref<48x128xf32, #tpu.memory_space<vmem>>, vector<8x128xf32>,
    %571 = vector.extract_strided_slice %339 {offsets = [24, 0], sizes = [8, 96], strides = [1, 1]} : vector<48x96xf32> to vector<8x96xf32>
    %c144_172 = arith.constant 144 : index
    %c0_173 = arith.constant 0 : index
    %572 = vector.load %arg1[%c144_172, %c0_173] : memref<288x32xf32, #tpu.memory_space<vmem>>, vector<24x32xf32>
    %c0_174 = arith.constant 0 : index
    %c0_175 = arith.constant 0 : index
    %573 = vector.load %arg7[%c0_174, %c0_175] : memref<48x32xf32, #tpu.memory_space<vmem>>, vector<24x32xf32>
    %574 = arith.mulf %572, %573 : vector<24x32xf32>
    %cst_176 = arith.constant 0.000000e+00 : f32
    %575 = vector.broadcast %cst_176 : f32 to vector<8x32xf32>
    %576 = vector.extract_strided_slice %574 {offsets = [16, 0], sizes = [8, 32], strides = [1, 1]} : vector<24x32xf32> to vector<8x32xf32>
    %577 = arith.addf %575, %576 : vector<8x32xf32>
    %578 = vector.extract_strided_slice %574 {offsets = [8, 0], sizes = [8, 32], strides = [1, 1]} : vector<24x32xf32> to vector<8x32xf32>
    %579 = arith.addf %577, %578 : vector<8x32xf32>
    %580 = vector.extract_strided_slice %574 {offsets = [0, 0], sizes = [8, 32], strides = [1, 1]} : vector<24x32xf32> to vector<8x32xf32>
    %581 = arith.addf %579, %580 : vector<8x32xf32>
    %582 = tpu.concatenate %581, %579, %577, %575 in 0 : vector<8x32xf32>, vector<8x32xf32>, vector<8x32xf32>, vector<8x32xf32> -> vector<32x32xf32>
    %583 = tpu.concatenate %571, %571, %571, %571 in 0 : vector<8x96xf32>, vector<8x96xf32>, vector<8x96xf32>, vector<8x96xf32> -> vector<32x96xf32>
    %cst_177 = arith.constant dense<0.000000e+00> : vector<32x96xf32>
    %584 = tpu.matmul %582, %6, %cst_177 {dimension_numbers = #tpu.dot_dimension_numbers<[1], [0], [0], [1], [0, 0, 1, 1], [], []>} : vector<32x32xf32>, vector<32x96xf32>, vector<32x96xf32> -> vector<32x96xf32>
    %585 = vector.broadcast %8 : vector<1x96xf32> to vector<32x96xf32>
    %586 = arith.addf %584, %585 : vector<32x96xf32>
    %587 = vector.extract_strided_slice %583 {offsets = [0, 0], sizes = [32, 32], strides = [1, 1]} : vector<32x96xf32> to vector<32x32xf32>
    %588 = vector.extract_strided_slice %586 {offsets = [0, 0], sizes = [32, 32], strides = [1, 1]} : vector<32x96xf32> to vector<32x32xf32>
    %589 = arith.addf %587, %588 : vector<32x32xf32>
    %590 = arith.negf %589 : vector<32x32xf32>
    %591 = math.exp %590 : vector<32x32xf32>
    %cst_178 = arith.constant 1.000000e+00 : f32
    %592 = vector.broadcast %cst_178 : f32 to vector<32x32xf32>
    %593 = arith.addf %592, %591 : vector<32x32xf32>
    %594 = arith.divf %592, %593 : vector<32x32xf32>
    %595 = vector.extract_strided_slice %583 {offsets = [0, 32], sizes = [32, 32], strides = [1, 1]} : vector<32x96xf32> to vector<32x32xf32>
    %596 = vector.extract_strided_slice %586 {offsets = [0, 32], sizes = [32, 32], strides = [1, 1]} : vector<32x96xf32> to vector<32x32xf32>
    %597 = arith.addf %595, %596 : vector<32x32xf32>
    %598 = arith.negf %597 : vector<32x32xf32>
    %599 = math.exp %598 : vector<32x32xf32>
    %cst_179 = arith.constant 1.000000e+00 : f32
    %600 = vector.broadcast %cst_179 : f32 to vector<32x32xf32>
    %601 = arith.addf %600, %599 : vector<32x32xf32>
    %602 = arith.divf %600, %601 : vector<32x32xf32>
    %603 = vector.extract_strided_slice %583 {offsets = [0, 64], sizes = [32, 32], strides = [1, 1]} : vector<32x96xf32> to vector<32x32xf32>
    %604 = vector.extract_strided_slice %586 {offsets = [0, 64], sizes = [32, 32], strides = [1, 1]} : vector<32x96xf32> to vector<32x32xf32>
    %605 = arith.mulf %594, %604 : vector<32x32xf32>
    %606 = arith.addf %603, %605 : vector<32x32xf32>
    %607 = math.tanh %606 : vector<32x32xf32>
    %cst_180 = arith.constant 1.000000e+00 : f32
    %608 = vector.broadcast %cst_180 : f32 to vector<32x32xf32>
    %609 = arith.subf %608, %602 : vector<32x32xf32>
    %610 = arith.mulf %609, %607 : vector<32x32xf32>
    %611 = arith.mulf %602, %582 : vector<32x32xf32>
    %612 = arith.addf %610, %611 : vector<32x32xf32>
    %c0_181 = arith.constant 0 : index
    %c0_182 = arith.constant 0 : index
    %613 = vector.load %arg8[%c0_181, %c0_182] : memref<48x128xf32, #tpu.memory_space<vmem>>, vector<24x128xf32>
    %614 = vector.extract_strided_slice %612 {offsets = [8, 0], sizes = [24, 32], strides = [1, 1]} : vector<32x32xf32> to vector<24x32xf32>
    %cst_183 = arith.constant dense<0.000000e+00> : vector<24x128xf32>
    %615 = tpu.matmul %614, %21, %cst_183 {dimension_numbers = #tpu.dot_dimension_numbers<[1], [0], [0], [1], [0, 0, 1, 1], [], []>} : vector<24x32xf32>, vector<32x128xf32>, vector<24x128xf32> -> vector<24x128xf32>
    %616 = arith.addf %613, %615 : vector<24x128xf32>
    %cst_184 = arith.constant 0.000000e+00 : f32
    %617 = vector.broadcast %cst_184 : f32 to vector<24x128xf32>
    %618 = arith.maximumf %616, %617 : vector<24x128xf32>
    %cst_185 = arith.constant dense<0.000000e+00> : vector<24x1xf32>
    %619 = tpu.matmul %618, %23, %cst_185 {dimension_numbers = #tpu.dot_dimension_numbers<[1], [0], [0], [1], [0, 0, 1, 1], [], []>} : vector<24x128xf32>, vector<128x1xf32>, vector<24x1xf32> -> vector<24x1xf32>
    %620 = vector.broadcast %24 : vector<1x1xf32> to vector<24x1xf32>
    %621 = arith.addf %619, %620 : vector<24x1xf32>
    %622 = vector.extract_strided_slice %572 {offsets = [0, 0], sizes = [24, 1], strides = [1, 1]} : vector<24x32xf32> to vector<24x1xf32>
    %cst_186 = arith.constant 0.000000e+00 : f32
    %623 = vector.broadcast %cst_186 : f32 to vector<24x1xf32>
    %624 = arith.maximumf %621, %623 : vector<24x1xf32>
    %625 = math.absf %621 : vector<24x1xf32>
    %cst_187 = arith.constant 0.000000e+00 : f32
    %626 = vector.broadcast %cst_187 : f32 to vector<24x1xf32>
    %627 = arith.subf %626, %625 : vector<24x1xf32>
    %628 = math.exp %627 : vector<24x1xf32>
    %cst_188 = arith.constant 1.000000e+00 : f32
    %629 = vector.broadcast %cst_188 : f32 to vector<24x1xf32>
    %630 = arith.addf %629, %628 : vector<24x1xf32>
    %631 = math.log %630 : vector<24x1xf32>
    %632 = arith.addf %624, %631 : vector<24x1xf32>
    %633 = vector.extract_strided_slice %25 {offsets = [0, 0], sizes = [24, 1], strides = [1, 1]} : vector<48x1xf32> to vector<24x1xf32>
    %634 = arith.mulf %622, %621 : vector<24x1xf32>
    %635 = arith.subf %634, %632 : vector<24x1xf32>
    %636 = arith.mulf %633, %635 : vector<24x1xf32>
    %637 = vector.shape_cast %636 : vector<24x1xf32> to vector<1x24x1xf32>
    %cst_189 = arith.constant dense<0.000000e+00> : vector<1xf32>
    %638 = vector.multi_reduction <add>, %637, %cst_189 [1, 2] : vector<1x24x1xf32> to vector<1xf32>
    %639 = vector.shape_cast %638 : vector<1xf32> to vector<1x1x1xf32>
    %640 = vector.extract %639[0, 0, 0] : f32 from vector<1x1x1xf32>
    %641 = vector.broadcast %640 : f32 to vector<1x1xf32>
    %642 = arith.addf %550, %641 : vector<1x1xf32>
    %643 = vector.extract_strided_slice %612 {offsets = [0, 0], sizes = [8, 32], strides = [1, 1]} : vector<32x32xf32> to vector<8x32xf32>
    %c24_190 = arith.constant 24 : index
    %c0_191 = arith.constant 0 : index
    %644 = vector.load %arg5[%c24_190, %c0_191] : memref<48x32xf32, #tpu.memory_space<vmem>>, vector<8x32xf32>
    tpu.vector_store %arg5[%c24_190, %c0_191], %643 {strides = array<i32>} : memref<48x32xf32, #tpu.memory_space<vmem>>, vector<8x32xf32>,
    %cst_192 = arith.constant dense<0.000000e+00> : vector<8x64xf32>
    %645 = tpu.matmul %643, %9, %cst_192 {dimension_numbers = #tpu.dot_dimension_numbers<[1], [0], [0], [1], [0, 0, 1, 1], [], []>} : vector<8x32xf32>, vector<32x64xf32>, vector<8x64xf32> -> vector<8x64xf32>
    %646 = vector.extract_strided_slice %10 {offsets = [24, 0], sizes = [8, 64], strides = [1, 1]} : vector<48x64xf32> to vector<8x64xf32>
    %647 = arith.addf %645, %646 : vector<8x64xf32>
    %648 = vector.extract_strided_slice %647 {offsets = [0, 0], sizes = [8, 32], strides = [1, 1]} : vector<8x64xf32> to vector<8x32xf32>
    %649 = vector.broadcast %11 : vector<1x32xf32> to vector<8x32xf32>
    %650 = arith.addf %648, %649 : vector<8x32xf32>
    %651 = arith.negf %650 : vector<8x32xf32>
    %652 = math.exp %651 : vector<8x32xf32>
    %cst_193 = arith.constant 1.000000e+00 : f32
    %653 = vector.broadcast %cst_193 : f32 to vector<8x32xf32>
    %654 = arith.addf %653, %652 : vector<8x32xf32>
    %655 = arith.divf %653, %654 : vector<8x32xf32>
    %656 = vector.extract_strided_slice %647 {offsets = [0, 32], sizes = [8, 32], strides = [1, 1]} : vector<8x64xf32> to vector<8x32xf32>
    %657 = arith.mulf %655, %656 : vector<8x32xf32>
    %c24_194 = arith.constant 24 : index
    %c0_195 = arith.constant 0 : index
    %658 = vector.load %arg7[%c24_194, %c0_195] : memref<48x32xf32, #tpu.memory_space<vmem>>, vector<8x32xf32>
    tpu.vector_store %arg7[%c24_194, %c0_195], %657 {strides = array<i32>} : memref<48x32xf32, #tpu.memory_space<vmem>>, vector<8x32xf32>,
    %cst_196 = arith.constant dense<0.000000e+00> : vector<8x128xf32>
    %659 = tpu.matmul %643, %20, %cst_196 {dimension_numbers = #tpu.dot_dimension_numbers<[1], [0], [0], [1], [0, 0, 1, 1], [], []>} : vector<8x32xf32>, vector<32x128xf32>, vector<8x128xf32> -> vector<8x128xf32>
    %660 = vector.broadcast %22 : vector<1x128xf32> to vector<8x128xf32>
    %661 = arith.addf %659, %660 : vector<8x128xf32>
    %c24_197 = arith.constant 24 : index
    %c0_198 = arith.constant 0 : index
    %662 = vector.load %arg8[%c24_197, %c0_198] : memref<48x128xf32, #tpu.memory_space<vmem>>, vector<8x128xf32>
    tpu.vector_store %arg8[%c24_197, %c0_198], %661 {strides = array<i32>} : memref<48x128xf32, #tpu.memory_space<vmem>>, vector<8x128xf32>,
    %663 = vector.extract_strided_slice %339 {offsets = [32, 0], sizes = [8, 96], strides = [1, 1]} : vector<48x96xf32> to vector<8x96xf32>
    %c192_199 = arith.constant 192 : index
    %c0_200 = arith.constant 0 : index
    %664 = vector.load %arg1[%c192_199, %c0_200] : memref<288x32xf32, #tpu.memory_space<vmem>>, vector<32x32xf32>
    %c0_201 = arith.constant 0 : index
    %c0_202 = arith.constant 0 : index
    %665 = vector.load %arg7[%c0_201, %c0_202] : memref<48x32xf32, #tpu.memory_space<vmem>>, vector<32x32xf32>
    %666 = arith.mulf %664, %665 : vector<32x32xf32>
    %cst_203 = arith.constant 0.000000e+00 : f32
    %667 = vector.broadcast %cst_203 : f32 to vector<8x32xf32>
    %668 = vector.extract_strided_slice %666 {offsets = [24, 0], sizes = [8, 32], strides = [1, 1]} : vector<32x32xf32> to vector<8x32xf32>
    %669 = arith.addf %667, %668 : vector<8x32xf32>
    %670 = vector.extract_strided_slice %666 {offsets = [16, 0], sizes = [8, 32], strides = [1, 1]} : vector<32x32xf32> to vector<8x32xf32>
    %671 = arith.addf %669, %670 : vector<8x32xf32>
    %672 = vector.extract_strided_slice %666 {offsets = [8, 0], sizes = [8, 32], strides = [1, 1]} : vector<32x32xf32> to vector<8x32xf32>
    %673 = arith.addf %671, %672 : vector<8x32xf32>
    %674 = vector.extract_strided_slice %666 {offsets = [0, 0], sizes = [8, 32], strides = [1, 1]} : vector<32x32xf32> to vector<8x32xf32>
    %675 = arith.addf %673, %674 : vector<8x32xf32>
    %676 = tpu.concatenate %675, %673, %671, %669, %667 in 0 : vector<8x32xf32>, vector<8x32xf32>, vector<8x32xf32>, vector<8x32xf32>, vector<8x32xf32> -> vector<40x32xf32>
    %677 = tpu.concatenate %663, %663, %663, %663, %663 in 0 : vector<8x96xf32>, vector<8x96xf32>, vector<8x96xf32>, vector<8x96xf32>, vector<8x96xf32> -> vector<40x96xf32>
    %cst_204 = arith.constant dense<0.000000e+00> : vector<40x96xf32>
    %678 = tpu.matmul %676, %6, %cst_204 {dimension_numbers = #tpu.dot_dimension_numbers<[1], [0], [0], [1], [0, 0, 1, 1], [], []>} : vector<40x32xf32>, vector<32x96xf32>, vector<40x96xf32> -> vector<40x96xf32>
    %679 = vector.broadcast %8 : vector<1x96xf32> to vector<40x96xf32>
    %680 = arith.addf %678, %679 : vector<40x96xf32>
    %681 = vector.extract_strided_slice %677 {offsets = [0, 0], sizes = [40, 32], strides = [1, 1]} : vector<40x96xf32> to vector<40x32xf32>
    %682 = vector.extract_strided_slice %680 {offsets = [0, 0], sizes = [40, 32], strides = [1, 1]} : vector<40x96xf32> to vector<40x32xf32>
    %683 = arith.addf %681, %682 : vector<40x32xf32>
    %684 = arith.negf %683 : vector<40x32xf32>
    %685 = math.exp %684 : vector<40x32xf32>
    %cst_205 = arith.constant 1.000000e+00 : f32
    %686 = vector.broadcast %cst_205 : f32 to vector<40x32xf32>
    %687 = arith.addf %686, %685 : vector<40x32xf32>
    %688 = arith.divf %686, %687 : vector<40x32xf32>
    %689 = vector.extract_strided_slice %677 {offsets = [0, 32], sizes = [40, 32], strides = [1, 1]} : vector<40x96xf32> to vector<40x32xf32>
    %690 = vector.extract_strided_slice %680 {offsets = [0, 32], sizes = [40, 32], strides = [1, 1]} : vector<40x96xf32> to vector<40x32xf32>
    %691 = arith.addf %689, %690 : vector<40x32xf32>
    %692 = arith.negf %691 : vector<40x32xf32>
    %693 = math.exp %692 : vector<40x32xf32>
    %cst_206 = arith.constant 1.000000e+00 : f32
    %694 = vector.broadcast %cst_206 : f32 to vector<40x32xf32>
    %695 = arith.addf %694, %693 : vector<40x32xf32>
    %696 = arith.divf %694, %695 : vector<40x32xf32>
    %697 = vector.extract_strided_slice %677 {offsets = [0, 64], sizes = [40, 32], strides = [1, 1]} : vector<40x96xf32> to vector<40x32xf32>
    %698 = vector.extract_strided_slice %680 {offsets = [0, 64], sizes = [40, 32], strides = [1, 1]} : vector<40x96xf32> to vector<40x32xf32>
    %699 = arith.mulf %688, %698 : vector<40x32xf32>
    %700 = arith.addf %697, %699 : vector<40x32xf32>
    %701 = math.tanh %700 : vector<40x32xf32>
    %cst_207 = arith.constant 1.000000e+00 : f32
    %702 = vector.broadcast %cst_207 : f32 to vector<40x32xf32>
    %703 = arith.subf %702, %696 : vector<40x32xf32>
    %704 = arith.mulf %703, %701 : vector<40x32xf32>
    %705 = arith.mulf %696, %676 : vector<40x32xf32>
    %706 = arith.addf %704, %705 : vector<40x32xf32>
    %c0_208 = arith.constant 0 : index
    %c0_209 = arith.constant 0 : index
    %707 = vector.load %arg8[%c0_208, %c0_209] : memref<48x128xf32, #tpu.memory_space<vmem>>, vector<32x128xf32>
    %708 = vector.extract_strided_slice %706 {offsets = [8, 0], sizes = [32, 32], strides = [1, 1]} : vector<40x32xf32> to vector<32x32xf32>
    %cst_210 = arith.constant dense<0.000000e+00> : vector<32x128xf32>
    %709 = tpu.matmul %708, %21, %cst_210 {dimension_numbers = #tpu.dot_dimension_numbers<[1], [0], [0], [1], [0, 0, 1, 1], [], []>} : vector<32x32xf32>, vector<32x128xf32>, vector<32x128xf32> -> vector<32x128xf32>
    %710 = arith.addf %707, %709 : vector<32x128xf32>
    %cst_211 = arith.constant 0.000000e+00 : f32
    %711 = vector.broadcast %cst_211 : f32 to vector<32x128xf32>
    %712 = arith.maximumf %710, %711 : vector<32x128xf32>
    %cst_212 = arith.constant dense<0.000000e+00> : vector<32x1xf32>
    %713 = tpu.matmul %712, %23, %cst_212 {dimension_numbers = #tpu.dot_dimension_numbers<[1], [0], [0], [1], [0, 0, 1, 1], [], []>} : vector<32x128xf32>, vector<128x1xf32>, vector<32x1xf32> -> vector<32x1xf32>
    %714 = vector.broadcast %24 : vector<1x1xf32> to vector<32x1xf32>
    %715 = arith.addf %713, %714 : vector<32x1xf32>
    %716 = vector.extract_strided_slice %664 {offsets = [0, 0], sizes = [32, 1], strides = [1, 1]} : vector<32x32xf32> to vector<32x1xf32>
    %cst_213 = arith.constant 0.000000e+00 : f32
    %717 = vector.broadcast %cst_213 : f32 to vector<32x1xf32>
    %718 = arith.maximumf %715, %717 : vector<32x1xf32>
    %719 = math.absf %715 : vector<32x1xf32>
    %cst_214 = arith.constant 0.000000e+00 : f32
    %720 = vector.broadcast %cst_214 : f32 to vector<32x1xf32>
    %721 = arith.subf %720, %719 : vector<32x1xf32>
    %722 = math.exp %721 : vector<32x1xf32>
    %cst_215 = arith.constant 1.000000e+00 : f32
    %723 = vector.broadcast %cst_215 : f32 to vector<32x1xf32>
    %724 = arith.addf %723, %722 : vector<32x1xf32>
    %725 = math.log %724 : vector<32x1xf32>
    %726 = arith.addf %718, %725 : vector<32x1xf32>
    %727 = vector.extract_strided_slice %25 {offsets = [0, 0], sizes = [32, 1], strides = [1, 1]} : vector<48x1xf32> to vector<32x1xf32>
    %728 = arith.mulf %716, %715 : vector<32x1xf32>
    %729 = arith.subf %728, %726 : vector<32x1xf32>
    %730 = arith.mulf %727, %729 : vector<32x1xf32>
    %731 = vector.shape_cast %730 : vector<32x1xf32> to vector<1x32x1xf32>
    %cst_216 = arith.constant dense<0.000000e+00> : vector<1xf32>
    %732 = vector.multi_reduction <add>, %731, %cst_216 [1, 2] : vector<1x32x1xf32> to vector<1xf32>
    %733 = vector.shape_cast %732 : vector<1xf32> to vector<1x1x1xf32>
    %734 = vector.extract %733[0, 0, 0] : f32 from vector<1x1x1xf32>
    %735 = vector.broadcast %734 : f32 to vector<1x1xf32>
    %736 = arith.addf %642, %735 : vector<1x1xf32>
    %737 = vector.extract_strided_slice %706 {offsets = [0, 0], sizes = [8, 32], strides = [1, 1]} : vector<40x32xf32> to vector<8x32xf32>
    %c32_217 = arith.constant 32 : index
    %c0_218 = arith.constant 0 : index
    %738 = vector.load %arg5[%c32_217, %c0_218] : memref<48x32xf32, #tpu.memory_space<vmem>>, vector<8x32xf32>
    tpu.vector_store %arg5[%c32_217, %c0_218], %737 {strides = array<i32>} : memref<48x32xf32, #tpu.memory_space<vmem>>, vector<8x32xf32>,
    %cst_219 = arith.constant dense<0.000000e+00> : vector<8x64xf32>
    %739 = tpu.matmul %737, %9, %cst_219 {dimension_numbers = #tpu.dot_dimension_numbers<[1], [0], [0], [1], [0, 0, 1, 1], [], []>} : vector<8x32xf32>, vector<32x64xf32>, vector<8x64xf32> -> vector<8x64xf32>
    %740 = vector.extract_strided_slice %10 {offsets = [32, 0], sizes = [8, 64], strides = [1, 1]} : vector<48x64xf32> to vector<8x64xf32>
    %741 = arith.addf %739, %740 : vector<8x64xf32>
    %742 = vector.extract_strided_slice %741 {offsets = [0, 0], sizes = [8, 32], strides = [1, 1]} : vector<8x64xf32> to vector<8x32xf32>
    %743 = vector.broadcast %11 : vector<1x32xf32> to vector<8x32xf32>
    %744 = arith.addf %742, %743 : vector<8x32xf32>
    %745 = arith.negf %744 : vector<8x32xf32>
    %746 = math.exp %745 : vector<8x32xf32>
    %cst_220 = arith.constant 1.000000e+00 : f32
    %747 = vector.broadcast %cst_220 : f32 to vector<8x32xf32>
    %748 = arith.addf %747, %746 : vector<8x32xf32>
    %749 = arith.divf %747, %748 : vector<8x32xf32>
    %750 = vector.extract_strided_slice %741 {offsets = [0, 32], sizes = [8, 32], strides = [1, 1]} : vector<8x64xf32> to vector<8x32xf32>
    %751 = arith.mulf %749, %750 : vector<8x32xf32>
    %c32_221 = arith.constant 32 : index
    %c0_222 = arith.constant 0 : index
    %752 = vector.load %arg7[%c32_221, %c0_222] : memref<48x32xf32, #tpu.memory_space<vmem>>, vector<8x32xf32>
    tpu.vector_store %arg7[%c32_221, %c0_222], %751 {strides = array<i32>} : memref<48x32xf32, #tpu.memory_space<vmem>>, vector<8x32xf32>,
    %cst_223 = arith.constant dense<0.000000e+00> : vector<8x128xf32>
    %753 = tpu.matmul %737, %20, %cst_223 {dimension_numbers = #tpu.dot_dimension_numbers<[1], [0], [0], [1], [0, 0, 1, 1], [], []>} : vector<8x32xf32>, vector<32x128xf32>, vector<8x128xf32> -> vector<8x128xf32>
    %754 = vector.broadcast %22 : vector<1x128xf32> to vector<8x128xf32>
    %755 = arith.addf %753, %754 : vector<8x128xf32>
    %c32_224 = arith.constant 32 : index
    %c0_225 = arith.constant 0 : index
    %756 = vector.load %arg8[%c32_224, %c0_225] : memref<48x128xf32, #tpu.memory_space<vmem>>, vector<8x128xf32>
    tpu.vector_store %arg8[%c32_224, %c0_225], %755 {strides = array<i32>} : memref<48x128xf32, #tpu.memory_space<vmem>>, vector<8x128xf32>,
    %757 = vector.extract_strided_slice %339 {offsets = [40, 0], sizes = [8, 96], strides = [1, 1]} : vector<48x96xf32> to vector<8x96xf32>
    %c240_226 = arith.constant 240 : index
    %c0_227 = arith.constant 0 : index
    %758 = vector.load %arg1[%c240_226, %c0_227] : memref<288x32xf32, #tpu.memory_space<vmem>>, vector<40x32xf32>
    %c0_228 = arith.constant 0 : index
    %c0_229 = arith.constant 0 : index
    %759 = vector.load %arg7[%c0_228, %c0_229] : memref<48x32xf32, #tpu.memory_space<vmem>>, vector<40x32xf32>
    %760 = arith.mulf %758, %759 : vector<40x32xf32>
    %cst_230 = arith.constant 0.000000e+00 : f32
    %761 = vector.broadcast %cst_230 : f32 to vector<8x32xf32>
    %762 = vector.extract_strided_slice %760 {offsets = [32, 0], sizes = [8, 32], strides = [1, 1]} : vector<40x32xf32> to vector<8x32xf32>
    %763 = arith.addf %761, %762 : vector<8x32xf32>
    %764 = vector.extract_strided_slice %760 {offsets = [24, 0], sizes = [8, 32], strides = [1, 1]} : vector<40x32xf32> to vector<8x32xf32>
    %765 = arith.addf %763, %764 : vector<8x32xf32>
    %766 = vector.extract_strided_slice %760 {offsets = [16, 0], sizes = [8, 32], strides = [1, 1]} : vector<40x32xf32> to vector<8x32xf32>
    %767 = arith.addf %765, %766 : vector<8x32xf32>
    %768 = vector.extract_strided_slice %760 {offsets = [8, 0], sizes = [8, 32], strides = [1, 1]} : vector<40x32xf32> to vector<8x32xf32>
    %769 = arith.addf %767, %768 : vector<8x32xf32>
    %770 = vector.extract_strided_slice %760 {offsets = [0, 0], sizes = [8, 32], strides = [1, 1]} : vector<40x32xf32> to vector<8x32xf32>
    %771 = arith.addf %769, %770 : vector<8x32xf32>
    %772 = tpu.concatenate %771, %769, %767, %765, %763, %761 in 0 : vector<8x32xf32>, vector<8x32xf32>, vector<8x32xf32>, vector<8x32xf32>, vector<8x32xf32>, vector<8x32xf32> -> vector<48x32xf32>
    %773 = tpu.concatenate %757, %757, %757, %757, %757, %757 in 0 : vector<8x96xf32>, vector<8x96xf32>, vector<8x96xf32>, vector<8x96xf32>, vector<8x96xf32>, vector<8x96xf32> -> vector<48x96xf32>
    %cst_231 = arith.constant dense<0.000000e+00> : vector<48x96xf32>
    %774 = tpu.matmul %772, %6, %cst_231 {dimension_numbers = #tpu.dot_dimension_numbers<[1], [0], [0], [1], [0, 0, 1, 1], [], []>} : vector<48x32xf32>, vector<32x96xf32>, vector<48x96xf32> -> vector<48x96xf32>
    %775 = vector.broadcast %8 : vector<1x96xf32> to vector<48x96xf32>
    %776 = arith.addf %774, %775 : vector<48x96xf32>
    %777 = vector.extract_strided_slice %773 {offsets = [0, 0], sizes = [48, 32], strides = [1, 1]} : vector<48x96xf32> to vector<48x32xf32>
    %778 = vector.extract_strided_slice %776 {offsets = [0, 0], sizes = [48, 32], strides = [1, 1]} : vector<48x96xf32> to vector<48x32xf32>
    %779 = arith.addf %777, %778 : vector<48x32xf32>
    %780 = arith.negf %779 : vector<48x32xf32>
    %781 = math.exp %780 : vector<48x32xf32>
    %cst_232 = arith.constant 1.000000e+00 : f32
    %782 = vector.broadcast %cst_232 : f32 to vector<48x32xf32>
    %783 = arith.addf %782, %781 : vector<48x32xf32>
    %784 = arith.divf %782, %783 : vector<48x32xf32>
    %785 = vector.extract_strided_slice %773 {offsets = [0, 32], sizes = [48, 32], strides = [1, 1]} : vector<48x96xf32> to vector<48x32xf32>
    %786 = vector.extract_strided_slice %776 {offsets = [0, 32], sizes = [48, 32], strides = [1, 1]} : vector<48x96xf32> to vector<48x32xf32>
    %787 = arith.addf %785, %786 : vector<48x32xf32>
    %788 = arith.negf %787 : vector<48x32xf32>
    %789 = math.exp %788 : vector<48x32xf32>
    %cst_233 = arith.constant 1.000000e+00 : f32
    %790 = vector.broadcast %cst_233 : f32 to vector<48x32xf32>
    %791 = arith.addf %790, %789 : vector<48x32xf32>
    %792 = arith.divf %790, %791 : vector<48x32xf32>
    %793 = vector.extract_strided_slice %773 {offsets = [0, 64], sizes = [48, 32], strides = [1, 1]} : vector<48x96xf32> to vector<48x32xf32>
    %794 = vector.extract_strided_slice %776 {offsets = [0, 64], sizes = [48, 32], strides = [1, 1]} : vector<48x96xf32> to vector<48x32xf32>
    %795 = arith.mulf %784, %794 : vector<48x32xf32>
    %796 = arith.addf %793, %795 : vector<48x32xf32>
    %797 = math.tanh %796 : vector<48x32xf32>
    %cst_234 = arith.constant 1.000000e+00 : f32
    %798 = vector.broadcast %cst_234 : f32 to vector<48x32xf32>
    %799 = arith.subf %798, %792 : vector<48x32xf32>
    %800 = arith.mulf %799, %797 : vector<48x32xf32>
    %801 = arith.mulf %792, %772 : vector<48x32xf32>
    %802 = arith.addf %800, %801 : vector<48x32xf32>
    %c0_235 = arith.constant 0 : index
    %c0_236 = arith.constant 0 : index
    %803 = vector.load %arg8[%c0_235, %c0_236] : memref<48x128xf32, #tpu.memory_space<vmem>>, vector<40x128xf32>
    %804 = vector.extract_strided_slice %802 {offsets = [8, 0], sizes = [40, 32], strides = [1, 1]} : vector<48x32xf32> to vector<40x32xf32>
    %cst_237 = arith.constant dense<0.000000e+00> : vector<40x128xf32>
    %805 = tpu.matmul %804, %21, %cst_237 {dimension_numbers = #tpu.dot_dimension_numbers<[1], [0], [0], [1], [0, 0, 1, 1], [], []>} : vector<40x32xf32>, vector<32x128xf32>, vector<40x128xf32> -> vector<40x128xf32>
    %806 = arith.addf %803, %805 : vector<40x128xf32>
    %cst_238 = arith.constant 0.000000e+00 : f32
    %807 = vector.broadcast %cst_238 : f32 to vector<40x128xf32>
    %808 = arith.maximumf %806, %807 : vector<40x128xf32>
    %cst_239 = arith.constant dense<0.000000e+00> : vector<40x1xf32>
    %809 = tpu.matmul %808, %23, %cst_239 {dimension_numbers = #tpu.dot_dimension_numbers<[1], [0], [0], [1], [0, 0, 1, 1], [], []>} : vector<40x128xf32>, vector<128x1xf32>, vector<40x1xf32> -> vector<40x1xf32>
    %810 = vector.broadcast %24 : vector<1x1xf32> to vector<40x1xf32>
    %811 = arith.addf %809, %810 : vector<40x1xf32>
    %812 = vector.extract_strided_slice %758 {offsets = [0, 0], sizes = [40, 1], strides = [1, 1]} : vector<40x32xf32> to vector<40x1xf32>
    %cst_240 = arith.constant 0.000000e+00 : f32
    %813 = vector.broadcast %cst_240 : f32 to vector<40x1xf32>
    %814 = arith.maximumf %811, %813 : vector<40x1xf32>
    %815 = math.absf %811 : vector<40x1xf32>
    %cst_241 = arith.constant 0.000000e+00 : f32
    %816 = vector.broadcast %cst_241 : f32 to vector<40x1xf32>
    %817 = arith.subf %816, %815 : vector<40x1xf32>
    %818 = math.exp %817 : vector<40x1xf32>
    %cst_242 = arith.constant 1.000000e+00 : f32
    %819 = vector.broadcast %cst_242 : f32 to vector<40x1xf32>
    %820 = arith.addf %819, %818 : vector<40x1xf32>
    %821 = math.log %820 : vector<40x1xf32>
    %822 = arith.addf %814, %821 : vector<40x1xf32>
    %823 = vector.extract_strided_slice %25 {offsets = [0, 0], sizes = [40, 1], strides = [1, 1]} : vector<48x1xf32> to vector<40x1xf32>
    %824 = arith.mulf %812, %811 : vector<40x1xf32>
    %825 = arith.subf %824, %822 : vector<40x1xf32>
    %826 = arith.mulf %823, %825 : vector<40x1xf32>
    %827 = vector.shape_cast %826 : vector<40x1xf32> to vector<1x40x1xf32>
    %cst_243 = arith.constant dense<0.000000e+00> : vector<1xf32>
    %828 = vector.multi_reduction <add>, %827, %cst_243 [1, 2] : vector<1x40x1xf32> to vector<1xf32>
    %829 = vector.shape_cast %828 : vector<1xf32> to vector<1x1x1xf32>
    %830 = vector.extract %829[0, 0, 0] : f32 from vector<1x1x1xf32>
    %831 = vector.broadcast %830 : f32 to vector<1x1xf32>
    %832 = arith.addf %736, %831 : vector<1x1xf32>
    %833 = vector.extract_strided_slice %802 {offsets = [0, 0], sizes = [8, 32], strides = [1, 1]} : vector<48x32xf32> to vector<8x32xf32>
    %c40_244 = arith.constant 40 : index
    %c0_245 = arith.constant 0 : index
    %834 = vector.load %arg5[%c40_244, %c0_245] : memref<48x32xf32, #tpu.memory_space<vmem>>, vector<8x32xf32>
    tpu.vector_store %arg5[%c40_244, %c0_245], %833 {strides = array<i32>} : memref<48x32xf32, #tpu.memory_space<vmem>>, vector<8x32xf32>,
    %c0_246 = arith.constant 0 : index
    %c0_247 = arith.constant 0 : index
    %835 = vector.load %arg5[%c0_246, %c0_247] : memref<48x32xf32, #tpu.memory_space<vmem>>, vector<40x32xf32>
    %cst_248 = arith.constant dense<0.000000e+00> : vector<40x128xf32>
    %836 = tpu.matmul %835, %16, %cst_248 {dimension_numbers = #tpu.dot_dimension_numbers<[1], [0], [0], [1], [0, 0, 1, 1], [], []>} : vector<40x32xf32>, vector<32x128xf32>, vector<40x128xf32> -> vector<40x128xf32>
    %837 = vector.broadcast %17 : vector<1x128xf32> to vector<40x128xf32>
    %838 = arith.addf %836, %837 : vector<40x128xf32>
    %cst_249 = arith.constant 0.000000e+00 : f32
    %839 = vector.broadcast %cst_249 : f32 to vector<40x128xf32>
    %840 = arith.maximumf %838, %839 : vector<40x128xf32>
    %cst_250 = arith.constant dense<0.000000e+00> : vector<40x6xf32>
    %841 = tpu.matmul %840, %18, %cst_250 {dimension_numbers = #tpu.dot_dimension_numbers<[1], [0], [0], [1], [0, 0, 1, 1], [], []>} : vector<40x128xf32>, vector<128x6xf32>, vector<40x6xf32> -> vector<40x6xf32>
    %842 = vector.broadcast %19 : vector<1x6xf32> to vector<40x6xf32>
    %843 = arith.addf %841, %842 : vector<40x6xf32>
    %844 = vector.extract_strided_slice %843 {offsets = [0, 0], sizes = [40, 5], strides = [1, 1]} : vector<40x6xf32> to vector<40x5xf32>
    %cst_251 = arith.constant dense<0xFF800000> : vector<40xf32>
    %845 = vector.multi_reduction <maximumf>, %844, %cst_251 [1] : vector<40x5xf32> to vector<40xf32>
    %846 = vector.shape_cast %845 : vector<40xf32> to vector<40x1xf32>
    %847 = vector.broadcast %846 : vector<40x1xf32> to vector<40x5xf32>
    %848 = arith.subf %844, %847 : vector<40x5xf32>
    %849 = math.exp %848 : vector<40x5xf32>
    %cst_252 = arith.constant dense<0.000000e+00> : vector<40xf32>
    %850 = vector.multi_reduction <add>, %849, %cst_252 [1] : vector<40x5xf32> to vector<40xf32>
    %851 = vector.shape_cast %850 : vector<40xf32> to vector<40x1xf32>
    %852 = math.log %851 : vector<40x1xf32>
    %853 = arith.addf %846, %852 : vector<40x1xf32>
    %854 = vector.broadcast %853 : vector<40x1xf32> to vector<40x5xf32>
    %855 = arith.subf %844, %854 : vector<40x5xf32>
    %856 = vector.extract_strided_slice %0 {offsets = [8, 0], sizes = [40, 5], strides = [1, 1]} : vector<48x6xf32> to vector<40x5xf32>
    %857 = arith.mulf %856, %855 : vector<40x5xf32>
    %858 = vector.shape_cast %857 : vector<40x5xf32> to vector<1x40x5xf32>
    %cst_253 = arith.constant dense<0.000000e+00> : vector<1xf32>
    %859 = vector.multi_reduction <add>, %858, %cst_253 [1, 2] : vector<1x40x5xf32> to vector<1xf32>
    %860 = vector.shape_cast %859 : vector<1xf32> to vector<1x1x1xf32>
    %861 = vector.extract %860[0, 0, 0] : f32 from vector<1x1x1xf32>
    %862 = vector.broadcast %861 : f32 to vector<1x1xf32>
    %863 = vector.extract_strided_slice %843 {offsets = [0, 5], sizes = [40, 1], strides = [1, 1]} : vector<40x6xf32> to vector<40x1xf32>
    %864 = vector.extract_strided_slice %0 {offsets = [8, 5], sizes = [40, 1], strides = [1, 1]} : vector<48x6xf32> to vector<40x1xf32>
    %865 = vector.extract_strided_slice %25 {offsets = [8, 0], sizes = [40, 1], strides = [1, 1]} : vector<48x1xf32> to vector<40x1xf32>
    %866 = arith.subf %863, %864 : vector<40x1xf32>
    %867 = arith.mulf %866, %866 : vector<40x1xf32>
    %868 = arith.mulf %865, %867 : vector<40x1xf32>
    %869 = vector.shape_cast %868 : vector<40x1xf32> to vector<1x40x1xf32>
    %cst_254 = arith.constant dense<0.000000e+00> : vector<1xf32>
    %870 = vector.multi_reduction <add>, %869, %cst_254 [1, 2] : vector<1x40x1xf32> to vector<1xf32>
    %871 = vector.shape_cast %870 : vector<1xf32> to vector<1x1x1xf32>
    %872 = vector.extract %871[0, 0, 0] : f32 from vector<1x1x1xf32>
    %873 = vector.broadcast %872 : f32 to vector<1x1xf32>
    %cst_255 = arith.constant 0.00999999977 : f32
    %874 = vector.broadcast %cst_255 : f32 to vector<1x1xf32>
    %875 = arith.mulf %874, %873 : vector<1x1xf32>
    %cst_256 = arith.constant 1.000000e+02 : f32
    %876 = vector.broadcast %cst_256 : f32 to vector<1x1xf32>
    %877 = arith.divf %875, %876 : vector<1x1xf32>
    %878 = arith.subf %862, %877 : vector<1x1xf32>
    %879 = arith.addf %878, %832 : vector<1x1xf32>
    %cst_257 = arith.constant 0.000000e+00 : f32
    %880 = vector.broadcast %cst_257 : f32 to vector<1x1xf32>
    %881 = arith.subf %880, %879 : vector<1x1xf32>
    %cst_258 = arith.constant 1.000000e+00 : f32
    %882 = vector.broadcast %cst_258 : f32 to vector<8x8xf32>
    %883 = arith.addf %882, %332 : vector<8x8xf32>
    %884 = arith.mulf %329, %329 : vector<8x8xf32>
    %885 = arith.subf %883, %884 : vector<8x8xf32>
    %886 = math.exp %332 : vector<8x8xf32>
    %887 = arith.subf %885, %886 : vector<8x8xf32>
    %888 = vector.broadcast %26 : vector<8x1xf32> to vector<8x8xf32>
    %889 = arith.mulf %888, %887 : vector<8x8xf32>
    %890 = vector.shape_cast %889 : vector<8x8xf32> to vector<1x8x8xf32>
    %cst_259 = arith.constant dense<0.000000e+00> : vector<1xf32>
    %891 = vector.multi_reduction <add>, %890, %cst_259 [1, 2] : vector<1x8x8xf32> to vector<1xf32>
    %892 = vector.shape_cast %891 : vector<1xf32> to vector<1x1x1xf32>
    %893 = vector.extract %892[0, 0, 0] : f32 from vector<1x1x1xf32>
    %894 = vector.broadcast %893 : f32 to vector<1x1xf32>
    %cst_260 = arith.constant -5.000000e-01 : f32
    %895 = vector.broadcast %cst_260 : f32 to vector<1x1xf32>
    %896 = arith.mulf %895, %894 : vector<1x1xf32>
    %cst_261 = arith.constant 5.000000e-03 : f32
    %897 = vector.broadcast %cst_261 : f32 to vector<1x1xf32>
    %898 = arith.mulf %897, %896 : vector<1x1xf32>
    %899 = arith.addf %881, %898 : vector<1x1xf32>
    %cst_262 = arith.constant 0.000000e+00 : f32
    %900 = vector.broadcast %cst_262 : f32 to vector<8x128xf32>
    %c0_263 = arith.constant 0 : index
    %c0_264 = arith.constant 0 : index
    %901 = vector.load %arg3[%c0_263, %c0_264] : memref<8x128xf32, #tpu.memory_space<vmem>>, vector<8x128xf32>
    tpu.vector_store %arg3[%c0_263, %c0_264], %900 {strides = array<i32>} : memref<8x128xf32, #tpu.memory_space<vmem>>, vector<8x128xf32>,
    %c0_265 = arith.constant 0 : index
    %c0_266 = arith.constant 0 : index
    %902 = vector.load %arg3[%c0_265, %c0_266] : memref<8x128xf32, #tpu.memory_space<vmem>>, vector<8x8xf32>
    tpu.vector_store %arg3[%c0_265, %c0_266], %329 {strides = array<i32>} : memref<8x128xf32, #tpu.memory_space<vmem>>, vector<8x8xf32>,
    %c0_267 = arith.constant 0 : index
    %c8_268 = arith.constant 8 : index
    %903 = vector.load %arg3[%c0_267, %c8_268] : memref<8x128xf32, #tpu.memory_space<vmem>>, vector<8x8xf32>
    tpu.vector_store %arg3[%c0_267, %c8_268], %332 {strides = array<i32>} : memref<8x128xf32, #tpu.memory_space<vmem>>, vector<8x8xf32>,
    %904 = vector.shape_cast %899 : vector<1x1xf32> to vector<1x1xf32>
    %905 = vector.broadcast %904 : vector<1x1xf32> to vector<8x1xf32>
    %c0_269 = arith.constant 0 : index
    %c16_270 = arith.constant 16 : index
    %906 = vector.load %arg3[%c0_269, %c16_270] : memref<8x128xf32, #tpu.memory_space<vmem>>, vector<8x1xf32>
    tpu.vector_store %arg3[%c0_269, %c16_270], %905 {strides = array<i32>} : memref<8x128xf32, #tpu.memory_space<vmem>>, vector<8x1xf32>,
    return
  }
}

</mosaic_0001>

<bundles_post_ra>
// kernel: forward.1
= control target key start
LH: loop header
LB: loop body
LE: loop exit
PB: predicated region body
PF: predicated region fallthrough
CT: control target
= control target key end

     0   :  { %8 = vsyncpa [#allocation8], 0  ;;  %s3929_s15 = smov [#allocation7]   ;;  %s3930_s17 = smov 128   ;;  %s5406_s0 = inlined_call_operand.vmem [shape: f32[48,6], index: 0, kind: input, shape index: {}]   ;;  %s5407_s1 = inlined_call_operand.vmem [shape: f32[288,32], index: 1, kind: input, shape index: {}]   ;;  %s5408_s2 = inlined_call_operand.hbm [shape: f32[688,128], index: 2, kind: input, shape index: {}]   ;;  %s5409_s3 = inlined_call_operand.vmem [shape: f32[8,128], index: 3, kind: output, shape index: {}]  }
   0x1   :  { %s17_s14 = sshll.u32 %s5408_s2, 4  ;;  %s19_s16 = sshll.u32 %s3929_s15, 4  ;;  %s18_s14 = int_to_ptr.hbm [resolvable:$true] %s17_s14  ;;  %s20_s16 = int_to_ptr.vmem [resolvable:$true] %s19_s16 }
   0x2   :  { %s3931_s18 = smov 8  }
   0x3   :  { %25 = dma.hbm_to_vmem [thread:$0]  %s18_s14, 11008, %s20_s16, [#allocation8], %s3930_s17, %s3930_s17, %s3931_s18  }
   0x4   :  { %3927 = dma.done.wait [#allocation8], 11008  }
   0x5   :  { %3928 = vsyncadd [#allocation8], 4294956288  ;;  %vm141_vm0 = vcmask 1045504   ;;  %vm122_vm1 = vcmask 48128   ;;  %v36_v0 = vld [vmem:[#allocation7] sm:$0x3f] }
   0x6   :  { %v30_v1 = vld [vmem:[%s5406_s0] sm:$0xff]  ;;  %3419 = vmatpush.msk.msra.mxu0 %vm141_vm0, %v36_v0  ;;  %v3968_v2 = vld [vmem:[#allocation7 + $0x30] ss:$0 sm:$0xff]  ;;  %s3932_s2 = smov 64   ;;  %v3973_v3 = vld [vmem:[#allocation7 + $0x28] ss:$0 sm:$0xff] }
   0x7   :  { %3420 = vmatmul.msk.f32.vlgmr.msra.gmra.mxu0 %vm122_vm1, %v30_v1  ;;  %202 = vrot.lane.b32.xlu0 %v3968_v2, %s3932_s2  ;;  %s3933_s21 = smov 96   ;;  %v3979_v25 = vld [vmem:[#allocation7 + $0x88] sm:$0xff]  ;;  %v3984_v27 = vld [vmem:[#allocation7 + $0x80] sm:$0xff]  ;;  %v3989_v28 = vld [vmem:[#allocation7 + $0x78] sm:$0xff]  ;;  %vm222_vm6 = vcmask 261120   ;;  %s3934_s7 = smov 32  }
   0x8   :  { %v31_v26 = vld [vmem:[%s5406_s0 + $0x8] sm:$0xff]  ;;  %238 = vmatpush.msrb.mxu0 %v3979_v25  ;;  %360 = vmatpush.msra.mxu1 %v3979_v25  ;;  %v3993_v29 = vld [vmem:[#allocation7 + $0x70] sm:$0xff]  ;;  %v4009_v31 = vld [vmem:[%s5406_s0 + $0x18] sm:$0xff]  ;;  %s3937_s5 = smov 123  }
   0x9   :  { %v4000_v30 = vld [vmem:[%s5406_s0 + $0x10] sm:$0xff]  ;;  %v4016_v32 = vld [vmem:[%s5406_s0 + $0x20] sm:$0xff]  ;;  %v4023_v36 = vld [vmem:[%s5406_s0 + $0x28] sm:$0xff] }
   0xa   :  { %239 = vmatpush.msrb.mxu0 %v3984_v27  ;;  %361 = vmatpush.msra.mxu1 %v3984_v27  ;;  %v54_v43 = vld [vmem:[#allocation7 + $0x90] sm:$0xff]  ;;  %v4040_v46 = vld [vmem:[#allocation7 + $0xc0] ss:$0 sm:$0xff]  ;;  %v4045_v52 = vld [vmem:[#allocation7 + $0x18] sm:$0xff] }
   0xb   :  { %v4043_v51 = vld [vmem:[#allocation7 + $0x20] sm:$0xff]  ;;  %v4049_v53 = vld [vmem:[#allocation7 + $0x10] sm:$0xff]  ;;  %v4054_v54 = vld [vmem:[#allocation7 + $0x8] sm:$0xff] }
   0xc   :  { %240 = vmatpush.msrb.mxu0 %v3989_v28  ;;  %362 = vmatpush.msra.mxu1 %v3989_v28 }
   0xd   :  { %291 = vmatpush.msra.mxu2 %v4043_v51  ;;  %545 = vmatpush.msra.mxu3 %v4043_v51 }
   0xe   :  { %241 = vmatpush.msrb.mxu0 %v3993_v29  ;;  %363 = vmatpush.msra.mxu1 %v3993_v29 }
   0xf   :  { %3421 = vmatmul.msk.f32.gmra.mxu0 %vm122_vm1, %v31_v26  ;;  %292 = vmatpush.msra.mxu2 %v4045_v52 }
  0x10   :  { %416 = vmatpush.msrb.mxu1 %v4043_v51  ;;  %546 = vmatpush.msra.mxu3 %v4045_v52 }
  0x11   :  { %293 = vmatpush.msra.mxu2 %v4049_v53 }
  0x12   :  { %417 = vmatpush.msrb.mxu1 %v4045_v52  ;;  %547 = vmatpush.msra.mxu3 %v4049_v53 }
  0x13   :  { %294 = vmatpush.msra.mxu2 %v4054_v54 }
  0x14   :  { %418 = vmatpush.msrb.mxu1 %v4049_v53  ;;  %548 = vmatpush.msra.mxu3 %v4054_v54 }
  0x15   :  { %485 = vmatpush.msrb.mxu2 %v3979_v25 }
  0x16   :  { %419 = vmatpush.msrb.mxu1 %v4054_v54  ;;  %747 = vmatpush.msrb.mxu3 %v3979_v25 }
  0x17   :  { %3422 = vmatmul.msk.f32.gmra.mxu0 %vm122_vm1, %v4000_v30  ;;  %486 = vmatpush.msrb.mxu2 %v3984_v27 }
  0x18   :  { %748 = vmatpush.msrb.mxu3 %v3984_v27 }
  0x19   :  { %487 = vmatpush.msrb.mxu2 %v3989_v28 }
  0x1a   :  { %749 = vmatpush.msrb.mxu3 %v3989_v28 }
  0x1b   :  { %488 = vmatpush.msrb.mxu2 %v3993_v29 }
  0x1c   :  { %750 = vmatpush.msrb.mxu3 %v3993_v29 }
  0x1f   :  { %3423 = vmatmul.msk.f32.gmra.mxu0 %vm122_vm1, %v4009_v31 }
  0x27   :  { %3424 = vmatmul.msk.f32.gmra.mxu0 %vm122_vm1, %v4016_v32 }
  0x2f   :  { %3425 = vmatmul.msk.f32.gmra.mxu0 %vm122_vm1, %v4023_v36 }
  0x79   :  { %v203_v17 = vpop.permute.xlu0 %202 }
  0x84   :  { %v162_v4 = vpop.f32.mrf.mxu0 }
  0x85   :  { %v163_v5 = vadd.f32 %v3973_v3, %v162_v4 }
  0x87   :  { %v181_v6 = vadd.f32 %v3968_v2, %v163_v5 }
  0x89   :  { %v3426_v7 = vmul.f32 -1.442695, %v181_v6 }
  0x8b   :  { %3568 = vpow2.f32 %v3426_v7 }
  0x8c   :  { %v4029_v38 = vpop.f32.mrf.mxu0 }
  0x91   :  { %v3569_v8 = vpop.eup %3568 }
  0x92   :  { %v185_v9 = vadd.f32 1.0, %v3569_v8 }
  0x94   :  { %3570 = vrcp.f32 %v185_v9  ;;  %v197_v13 = vand.u32 2147483648, %v185_v9  ;;  %v195_v15 = vand.u32 2147483647, %v185_v9  ;;  %vm191_vm3 = vweird.f32 %v185_v9  ;;  %v4031_v39 = vpop.f32.mrf.mxu0 }
  0x96   :  { %v198_v18 = vor.u32 1.1754944e-38, %v197_v13  ;;  %vm196_vm5 = vcmp.eq.f32.partialorder %v195_v15, 8.507059e+37 }
  0x9a   :  { %v3571_v10 = vpop.eup %3570 }
  0x9b   :  { %v187_v11 = vmul.f32 %v3571_v10, %v185_v9  ;;  %vm192_vm2 = vweird.f32 %v3571_v10 }
  0x9c   :  { %vm193_vm4 = vmor %vm191_vm3, %vm192_vm2  ;;  %v4033_v40 = vpop.f32.mrf.mxu0 }
  0x9d   :  { %v188_v12 = vsub.f32 1.0, %v187_v11 }
  0x9f   :  { %v189_v14 = vmul.f32 %v3571_v10, %v188_v12 }
  0xa1   :  { %v190_v16 = vadd.f32 %v3571_v10, %v189_v14 }
  0xa3   :  { %v194_v19 = vsel %vm193_vm4, %v3571_v10, %v190_v16  ;;  %v166_v10 = vadd.f32 %v3973_v3, %v4029_v38 }
  0xa4   :  { %v199_v20 = vsel %vm196_vm5, %v198_v18, %v194_v19  ;;  %v4035_v41 = vpop.f32.mrf.mxu0 }
  0xa5   :  { %v205_v21 = vmul.f32 %v203_v17, %v199_v20  ;;  %v212_v33 = vsub.f32 1.0, %v199_v20 }
  0xa7   :  { %207 = vrot.lane.b32.xlu0 %v205_v21, %s3932_s2 }
  0xac   :  { %v4037_v42 = vpop.f32.mrf.mxu0 }
 0x119   :  { %v208_v22 = vpop.permute.xlu0 %207 }
 0x11a   :  { %v210_v23 = vadd.f32 %v208_v22, %v163_v5  ;;  %v273_v5 = vld [vmem:[%s5407_s1 + $0x30] sm:$0xff] }
 0x11c   :  { %3572 = vtanh.f32 %v210_v23 }
 0x122   :  { %v3573_v24 = vpop.eup %3572 }
 0x123   :  { %214 = vrot.lane.b32.xlu1 %v3573_v24, %s3933_s21 }
 0x195   :  { %v215_v34 = vpop.permute.xlu1 %214 }
 0x196   :  { %v217_v35 = vmul.f32 %v215_v34, %v212_v33 }
 0x198   :  { %219 = vrot.lane.b32.xlu1 %v217_v35, %s3933_s21 }
 0x20a   :  { %v220_v37 = vpop.permute.xlu1 %219 }
 0x20b   :  { %3427 = vmatmul.msk.f32.vlgmr.msrb.gmra.mxu0 %vm222_vm6, %v220_v37 }
 0x288   :  { %v243_v44 = vpop.f32.mrf.mxu0 }
 0x289   :  { %v244_v45 = vadd.f32 %v243_v44, %v54_v43 }
 0x28b   :  { %268 = vrot.lane.b32.xlu2 %v244_v45, %s3933_s21  ;;  %v247_v47 = vadd.f32 %v4040_v46, %v244_v45 }
 0x28d   :  { %v3428_v48 = vmul.f32 -1.442695, %v247_v47 }
 0x28f   :  { %3574 = vpow2.f32 %v3428_v48 }
 0x295   :  { %v3575_v49 = vpop.eup %3574 }
 0x296   :  { %v251_v50 = vadd.f32 1.0, %v3575_v49 }
 0x298   :  { %3576 = vrcp.f32 %v251_v50  ;;  %v263_v60 = vand.u32 2147483648, %v251_v50  ;;  %vm257_vm8 = vweird.f32 %v251_v50  ;;  %v261_v61 = vand.u32 2147483647, %v251_v50 }
 0x29a   :  { %v264_v63 = vor.u32 1.1754944e-38, %v263_v60  ;;  %vm262_vm10 = vcmp.eq.f32.partialorder %v261_v61, 8.507059e+37 }
 0x29e   :  { %v3577_v55 = vpop.eup %3576 }
 0x29f   :  { %v253_v56 = vmul.f32 %v3577_v55, %v251_v50  ;;  %vm258_vm7 = vweird.f32 %v3577_v55  ;;  %v55_v50 = vld [vmem:[#allocation7 + $0x98] sm:$0xff] }
 0x2a0   :  { %vm259_vm9 = vmor %vm257_vm8, %vm258_vm7 }
 0x2a1   :  { %v254_v57 = vsub.f32 1.0, %v253_v56 }
 0x2a3   :  { %v255_v58 = vmul.f32 %v3577_v55, %v254_v57 }
 0x2a5   :  { %v256_v59 = vadd.f32 %v3577_v55, %v255_v58 }
 0x2a7   :  { %v260_v62 = vsel %vm259_vm9, %v3577_v55, %v256_v59 }
 0x2a8   :  { %v265_v1 = vsel %vm262_vm10, %v264_v63, %v260_v62 }
 0x2e5   :  { %v269_v0 = vpop.permute.xlu2 %268 }
 0x2e6   :  { %v271_v4 = vmul.f32 %v269_v0, %v265_v1 }
 0x2e8   :  { %272 = vst.msk [vmem:[#allocation4] sm:$0xff] %vm222_vm6, %v271_v4 }
 0x2ef   :  { %v4075_v6 = vld [vmem:[#allocation4] sm:$0xff] }
 0x2f0   :  { %v275_v7 = vmul.f32 %v4075_v6, %v273_v5 }
 0x2f2   :  { %3429 = vmatmul.msk.f32.vlgmr.msra.gmra.mxu2 %vm222_vm6, %v275_v7 }
 0x2f3   :  { %678 = vmatpush.msra.mxu2 %v4043_v51 }
 0x2f5   :  { %679 = vmatpush.msra.mxu2 %v4045_v52 }
 0x2f7   :  { %680 = vmatpush.msra.mxu2 %v4049_v53 }
 0x2f9   :  { %681 = vmatpush.msra.mxu2 %v4054_v54 }
 0x375   :  { %v296_v8 = vpop.f32.mrf.mxu2 }
 0x376   :  { %v297_v9 = vadd.f32 %v3968_v2, %v296_v8 }
 0x378   :  { %320 = vrot.lane.b32.xlu2 %v297_v9, %s3932_s2  ;;  %v299_v11 = vadd.f32 %v297_v9, %v166_v10 }
 0x37a   :  { %v3430_v12 = vmul.f32 -1.442695, %v299_v11 }
 0x37c   :  { %3578 = vpow2.f32 %v3430_v12  ;;  %v394_v12 = vld [vmem:[%s5407_s1 + $0x60] sm:$0xff] }
 0x380   :  { %336 = vrot.lane.b32.xlu2 %v275_v7, %s3934_s7 }
 0x382   :  { %v3579_v13 = vpop.eup %3578 }
 0x383   :  { %v303_v14 = vadd.f32 1.0, %v3579_v13  ;;  %v519_v13 = vld [vmem:[%s5407_s1 + $0x90] sm:$0xff] }
 0x385   :  { %3580 = vrcp.f32 %v303_v14  ;;  %v315_v20 = vand.u32 2147483648, %v303_v14  ;;  %vm309_vm12 = vweird.f32 %v303_v14  ;;  %v313_v21 = vand.u32 2147483647, %v303_v14 }
 0x387   :  { %v316_v23 = vor.u32 1.1754944e-38, %v315_v20  ;;  %vm314_vm14 = vcmp.eq.f32.partialorder %v313_v21, 8.507059e+37  ;;  %v398_v21 = vmul.f32 %v394_v12, %v4075_v6  ;;  %v56_v12 = vld [vmem:[#allocation7 + $0xa0] sm:$0xff] }
 0x38b   :  { %v3581_v15 = vpop.eup %3580 }
 0x38c   :  { %v305_v16 = vmul.f32 %v3581_v15, %v303_v14  ;;  %vm310_vm11 = vweird.f32 %v3581_v15  ;;  %v395_v14 = vld [vmem:[%s5407_s1 + $0x68] sm:$0xff] }
 0x38d   :  { %vm311_vm13 = vmor %vm309_vm12, %vm310_vm11 }
 0x38e   :  { %v306_v17 = vsub.f32 1.0, %v305_v16  ;;  %v781_v16 = vld [vmem:[%s5407_s1 + $0xf0] sm:$0xff] }
 0x390   :  { %v307_v18 = vmul.f32 %v3581_v15, %v306_v17  ;;  %v520_v17 = vld [vmem:[%s5407_s1 + $0x98] sm:$0xff] }
 0x392   :  { %v308_v19 = vadd.f32 %v3581_v15, %v307_v18  ;;  %v649_v18 = vld [vmem:[%s5407_s1 + $0xc8] sm:$0xff] }
 0x394   :  { %v312_v22 = vsel %vm311_vm13, %v3581_v15, %v308_v19  ;;  %v648_v15 = vld [vmem:[%s5407_s1 + $0xc0] sm:$0xff]  ;;  %v782_v19 = vld [vmem:[%s5407_s1 + $0xf8] sm:$0xff] }
 0x395   :  { %v317_v26 = vsel %vm314_vm14, %v316_v23, %v312_v22  ;;  %v525_v22 = vmul.f32 %v519_v13, %v4075_v6  ;;  %v656_v23 = vmul.f32 %v648_v15, %v4075_v6 }
 0x396   :  { %v330_v43 = vsub.f32 1.0, %v317_v26 }
 0x3d2   :  { %v321_v24 = vpop.permute.xlu2 %320 }
 0x3d3   :  { %v323_v33 = vmul.f32 %v321_v24, %v317_v26  ;;  %v791_v24 = vmul.f32 %v781_v16, %v4075_v6 }
 0x3d5   :  { %325 = vrot.lane.b32.xlu0 %v323_v33, %s3932_s2 }
 0x3da   :  { %v337_v38 = vpop.permute.xlu2 %336 }
 0x3db   :  { %v339_v45 = vmul.f32 %v337_v38, %v317_v26 }
 0x447   :  { %v326_v34 = vpop.permute.xlu0 %325 }
 0x448   :  { %v328_v35 = vadd.f32 %v326_v34, %v166_v10 }
 0x44a   :  { %3582 = vtanh.f32 %v328_v35 }
 0x450   :  { %v3583_v37 = vpop.eup %3582 }
 0x451   :  { %332 = vrot.lane.b32.xlu1 %v3583_v37, %s3933_s21 }
 0x4c3   :  { %v333_v44 = vpop.permute.xlu1 %332 }
 0x4c4   :  { %v335_v47 = vmul.f32 %v333_v44, %v330_v43 }
 0x4c6   :  { %v340_v48 = vadd.f32 %v339_v45, %v335_v47  ;;  %v169_v47 = vadd.f32 %v3973_v3, %v4031_v39 }
 0x4c8   :  { %342 = vrot.lane.b32.xlu0 %v340_v48, %s3933_s21 }
 0x53a   :  { %v343_v49 = vpop.permute.xlu0 %342 }
 0x53b   :  { %3431 = vmatmul.msk.f32.vlgmr.msra.gmra.mxu1 %vm222_vm6, %v343_v49 }
 0x53c   :  { %614 = vmatpush.msra.mxu1 %v3979_v25 }
 0x53e   :  { %615 = vmatpush.msra.mxu1 %v3984_v27 }
 0x540   :  { %616 = vmatpush.msra.mxu1 %v3989_v28 }
 0x542   :  { %617 = vmatpush.msra.mxu1 %v3993_v29 }
 0x5b8   :  { %v365_v55 = vpop.f32.mrf.mxu1 }
 0x5b9   :  { %v366_v56 = vadd.f32 %v365_v55, %v55_v50 }
 0x5bb   :  { %389 = vrot.lane.b32.xlu1 %v366_v56, %s3933_s21  ;;  %v368_v57 = vadd.f32 %v4040_v46, %v366_v56 }
 0x5bd   :  { %v3432_v58 = vmul.f32 -1.442695, %v368_v57 }
 0x5bf   :  { %3584 = vpow2.f32 %v3432_v58 }
 0x5c5   :  { %v3585_v59 = vpop.eup %3584 }
 0x5c6   :  { %v372_v60 = vadd.f32 1.0, %v3585_v59 }
 0x5c8   :  { %3586 = vrcp.f32 %v372_v60  ;;  %v384_v4 = vand.u32 2147483648, %v372_v60  ;;  %vm378_vm2 = vweird.f32 %v372_v60  ;;  %v382_v5 = vand.u32 2147483647, %v372_v60 }
 0x5ca   :  { %v385_v8 = vor.u32 1.1754944e-38, %v384_v4  ;;  %vm383_vm4 = vcmp.eq.f32.partialorder %v382_v5, 8.507059e+37 }
 0x5ce   :  { %v3587_v61 = vpop.eup %3586 }
 0x5cf   :  { %v374_v62 = vmul.f32 %v3587_v61, %v372_v60  ;;  %vm379_vm15 = vweird.f32 %v3587_v61 }
 0x5d0   :  { %vm380_vm3 = vmor %vm378_vm2, %vm379_vm15 }
 0x5d1   :  { %v375_v63 = vsub.f32 1.0, %v374_v62 }
 0x5d3   :  { %v376_v0 = vmul.f32 %v3587_v61, %v375_v63 }
 0x5d5   :  { %v377_v1 = vadd.f32 %v3587_v61, %v376_v0 }
 0x5d7   :  { %v381_v7 = vsel %vm380_vm3, %v3587_v61, %v377_v1 }
 0x5d8   :  { %v386_v10 = vsel %vm383_vm4, %v385_v8, %v381_v7 }
 0x62d   :  { %v390_v9 = vpop.permute.xlu1 %389 }
 0x62e   :  { %v392_v11 = vmul.f32 %v390_v9, %v386_v10 }
 0x630   :  { %393 = vst.msk [vmem:[#allocation4 + $0x8] sm:$0xff] %vm222_vm6, %v392_v11 }
 0x637   :  { %v397_v20 = vld [vmem:[#allocation4 + $0x8] sm:$0xff] }
 0x638   :  { %v399_v26 = vmul.f32 %v397_v20, %v395_v14  ;;  %v526_v33 = vmul.f32 %v520_v17, %v397_v20  ;;  %v657_v34 = vmul.f32 %v649_v18, %v397_v20  ;;  %v792_v35 = vmul.f32 %v782_v19, %v397_v20 }
 0x63a   :  { %v400_v37 = vadd.f32 %v399_v26, %v398_v21  ;;  %v4127_v38 = vadd.f32 %v526_v33, %v525_v22  ;;  %v4129_v43 = vadd.f32 %v657_v34, %v656_v23  ;;  %v4131_v44 = vadd.f32 %v792_v35, %v791_v24 }
 0x63c   :  { %3433 = vmatmul.msk.f32.vlgmr.msrb.gmra.mxu1 %vm222_vm6, %v400_v37 }
 0x63d   :  { %815 = vmatpush.msrb.mxu1 %v4043_v51 }
 0x63f   :  { %816 = vmatpush.msrb.mxu1 %v4045_v52 }
 0x641   :  { %817 = vmatpush.msrb.mxu1 %v4049_v53 }
 0x643   :  { %818 = vmatpush.msrb.mxu1 %v4054_v54 }
 0x6b9   :  { %v421_v6 = vpop.f32.mrf.mxu1 }
 0x6ba   :  { %v422_v45 = vadd.f32 %v3968_v2, %v421_v6 }
 0x6bc   :  { %445 = vrot.lane.b32.xlu2 %v422_v45, %s3932_s2  ;;  %v424_v48 = vadd.f32 %v422_v45, %v169_v47  ;;  %v521_v45 = vld [vmem:[%s5407_s1 + $0xa0] sm:$0xff] }
 0x6be   :  { %v3434_v49 = vmul.f32 -1.442695, %v424_v48  ;;  %v783_v48 = vld [vmem:[%s5407_s1 + $0x100] sm:$0xff] }
 0x6c0   :  { %3588 = vpow2.f32 %v3434_v49 }
 0x6c4   :  { %461 = vrot.lane.b32.xlu2 %v400_v37, %s3934_s7 }
 0x6c6   :  { %v3589_v51 = vpop.eup %3588 }
 0x6c7   :  { %v428_v50 = vadd.f32 1.0, %v3589_v51 }
 0x6c9   :  { %3590 = vrcp.f32 %v428_v50  ;;  %v440_v57 = vand.u32 2147483648, %v428_v50  ;;  %vm434_vm7 = vweird.f32 %v428_v50  ;;  %v438_v58 = vand.u32 2147483647, %v428_v50 }
 0x6cb   :  { %v441_v60 = vor.u32 1.1754944e-38, %v440_v57  ;;  %vm439_vm9 = vcmp.eq.f32.partialorder %v438_v58, 8.507059e+37  ;;  %v172_v58 = vadd.f32 %v3973_v3, %v4033_v40 }
 0x6cf   :  { %v3591_v52 = vpop.eup %3590 }
 0x6d0   :  { %v430_v53 = vmul.f32 %v3591_v52, %v428_v50  ;;  %vm435_vm5 = vweird.f32 %v3591_v52 }
 0x6d1   :  { %vm436_vm8 = vmor %vm434_vm7, %vm435_vm5 }
 0x6d2   :  { %v431_v55 = vsub.f32 1.0, %v430_v53 }
 0x6d4   :  { %v432_v54 = vmul.f32 %v3591_v52, %v431_v55 }
 0x6d6   :  { %v433_v56 = vadd.f32 %v3591_v52, %v432_v54 }
 0x6d8   :  { %v437_v59 = vsel %vm436_vm8, %v3591_v52, %v433_v56 }
 0x6d9   :  { %v442_v61 = vsel %vm439_vm9, %v441_v60, %v437_v59 }
 0x6da   :  { %v455_v5 = vsub.f32 1.0, %v442_v61 }
 0x716   :  { %v446_v39 = vpop.permute.xlu2 %445 }
 0x717   :  { %v448_v62 = vmul.f32 %v446_v39, %v442_v61 }
 0x719   :  { %450 = vrot.lane.b32.xlu0 %v448_v62, %s3932_s2 }
 0x71e   :  { %v462_v4 = vpop.permute.xlu2 %461 }
 0x71f   :  { %v464_v8 = vmul.f32 %v462_v4, %v442_v61 }
 0x78b   :  { %v451_v63 = vpop.permute.xlu0 %450 }
 0x78c   :  { %v453_v0 = vadd.f32 %v451_v63, %v169_v47  ;;  %v650_v47 = vld [vmem:[%s5407_s1 + $0xd0] sm:$0xff] }
 0x78e   :  { %3592 = vtanh.f32 %v453_v0 }
 0x794   :  { %v3593_v1 = vpop.eup %3592 }
 0x795   :  { %457 = vrot.lane.b32.xlu1 %v3593_v1, %s3933_s21 }
 0x807   :  { %v458_v7 = vpop.permute.xlu1 %457 }
 0x808   :  { %v460_v9 = vmul.f32 %v458_v7, %v455_v5 }
 0x80a   :  { %v465_v10 = vadd.f32 %v464_v8, %v460_v9 }
 0x80c   :  { %467 = vrot.lane.b32.xlu0 %v465_v10, %s3933_s21 }
 0x87e   :  { %v468_v11 = vpop.permute.xlu0 %467 }
 0x87f   :  { %3435 = vmatmul.msk.f32.vlgmr.msrb.gmra.mxu2 %vm222_vm6, %v468_v11 }
 0x902   :  { %v490_v13 = vpop.f32.mrf.mxu2 }
 0x903   :  { %v491_v14 = vadd.f32 %v490_v13, %v56_v12 }
 0x905   :  { %514 = vrot.lane.b32.xlu1 %v491_v14, %s3933_s21  ;;  %v493_v15 = vadd.f32 %v4040_v46, %v491_v14 }
 0x907   :  { %v3436_v16 = vmul.f32 -1.442695, %v493_v15 }
 0x909   :  { %3594 = vpow2.f32 %v3436_v16 }
 0x90f   :  { %v3595_v17 = vpop.eup %3594 }
 0x910   :  { %v497_v18 = vadd.f32 1.0, %v3595_v17 }
 0x912   :  { %3596 = vrcp.f32 %v497_v18  ;;  %v509_v24 = vand.u32 2147483648, %v497_v18  ;;  %vm503_vm11 = vweird.f32 %v497_v18  ;;  %v507_v26 = vand.u32 2147483647, %v497_v18 }
 0x914   :  { %v510_v34 = vor.u32 1.1754944e-38, %v509_v24  ;;  %vm508_vm13 = vcmp.eq.f32.partialorder %v507_v26, 8.507059e+37 }
 0x918   :  { %v3597_v19 = vpop.eup %3596 }
 0x919   :  { %v499_v20 = vmul.f32 %v3597_v19, %v497_v18  ;;  %vm504_vm10 = vweird.f32 %v3597_v19 }
 0x91a   :  { %vm505_vm12 = vmor %vm503_vm11, %vm504_vm10 }
 0x91b   :  { %v500_v21 = vsub.f32 1.0, %v499_v20 }
 0x91d   :  { %v501_v22 = vmul.f32 %v3597_v19, %v500_v21 }
 0x91f   :  { %v502_v23 = vadd.f32 %v3597_v19, %v501_v22 }
 0x921   :  { %v506_v33 = vsel %vm505_vm12, %v3597_v19, %v502_v23  ;;  %v57_v19 = vld [vmem:[#allocation7 + $0xa8] sm:$0xff] }
 0x922   :  { %v511_v37 = vsel %vm508_vm13, %v510_v34, %v506_v33 }
 0x977   :  { %v515_v35 = vpop.permute.xlu1 %514 }
 0x978   :  { %v517_v6 = vmul.f32 %v515_v35, %v511_v37 }
 0x97a   :  { %518 = vst.msk [vmem:[#allocation4 + $0x10] sm:$0xff] %vm222_vm6, %v517_v6 }
 0x981   :  { %v524_v49 = vld [vmem:[#allocation4 + $0x10] sm:$0xff] }
 0x982   :  { %v527_v51 = vmul.f32 %v524_v49, %v521_v45  ;;  %v658_v50 = vmul.f32 %v650_v47, %v524_v49  ;;  %v793_v52 = vmul.f32 %v783_v48, %v524_v49 }
 0x984   :  { %v529_v53 = vadd.f32 %v4127_v38, %v527_v51  ;;  %v4161_v55 = vadd.f32 %v4129_v43, %v658_v50  ;;  %v4164_v54 = vadd.f32 %v4131_v44, %v793_v52 }
 0x986   :  { %3437 = vmatmul.msk.f32.vlgmr.msra.gmra.mxu3 %vm222_vm6, %v529_v53 }
 0xa09   :  { %v550_v56 = vpop.f32.mrf.mxu3 }
 0xa0a   :  { %v551_v57 = vadd.f32 %v3968_v2, %v550_v56  ;;  %v784_v56 = vld [vmem:[%s5407_s1 + $0x108] sm:$0xff] }
 0xa0c   :  { %574 = vrot.lane.b32.xlu2 %v551_v57, %s3932_s2  ;;  %v553_v59 = vadd.f32 %v551_v57, %v172_v58 }
 0xa0e   :  { %v3438_v38 = vmul.f32 -1.442695, %v553_v59 }
 0xa10   :  { %3598 = vpow2.f32 %v3438_v38 }
 0xa14   :  { %590 = vrot.lane.b32.xlu2 %v529_v53, %s3934_s7  ;;  %v651_v53 = vld [vmem:[%s5407_s1 + $0xd8] sm:$0xff] }
 0xa16   :  { %v3599_v43 = vpop.eup %3598 }
 0xa17   :  { %v557_v60 = vadd.f32 1.0, %v3599_v43 }
 0xa19   :  { %3600 = vrcp.f32 %v557_v60  ;;  %v569_v0 = vand.u32 2147483648, %v557_v60  ;;  %vm563_vm15 = vweird.f32 %v557_v60  ;;  %v567_v1 = vand.u32 2147483647, %v557_v60 }
 0xa1b   :  { %v570_v5 = vor.u32 1.1754944e-38, %v569_v0  ;;  %vm568_vm3 = vcmp.eq.f32.partialorder %v567_v1, 8.507059e+37 }
 0xa1f   :  { %v3601_v44 = vpop.eup %3600 }
 0xa20   :  { %v559_v39 = vmul.f32 %v3601_v44, %v557_v60  ;;  %vm564_vm14 = vweird.f32 %v3601_v44 }
 0xa21   :  { %vm565_vm2 = vmor %vm563_vm15, %vm564_vm14 }
 0xa22   :  { %v560_v61 = vsub.f32 1.0, %v559_v39  ;;  %v175_v39 = vadd.f32 %v3973_v3, %v4035_v41 }
 0xa24   :  { %v561_v62 = vmul.f32 %v3601_v44, %v560_v61 }
 0xa26   :  { %v562_v63 = vadd.f32 %v3601_v44, %v561_v62 }
 0xa28   :  { %v566_v4 = vsel %vm565_vm2, %v3601_v44, %v562_v63 }
 0xa29   :  { %v571_v7 = vsel %vm568_vm3, %v570_v5, %v566_v4 }
 0xa2a   :  { %v584_v13 = vsub.f32 1.0, %v571_v7 }
 0xa66   :  { %v575_v40 = vpop.permute.xlu2 %574 }
 0xa67   :  { %v577_v8 = vmul.f32 %v575_v40, %v571_v7 }
 0xa69   :  { %579 = vrot.lane.b32.xlu0 %v577_v8, %s3932_s2 }
 0xa6e   :  { %v591_v12 = vpop.permute.xlu2 %590 }
 0xa6f   :  { %v593_v15 = vmul.f32 %v591_v12, %v571_v7 }
 0xadb   :  { %v580_v9 = vpop.permute.xlu0 %579 }
 0xadc   :  { %v582_v10 = vadd.f32 %v580_v9, %v172_v58 }
 0xade   :  { %3602 = vtanh.f32 %v582_v10 }
 0xae4   :  { %v3603_v11 = vpop.eup %3602 }
 0xae5   :  { %586 = vrot.lane.b32.xlu1 %v3603_v11, %s3933_s21 }
 0xb57   :  { %v587_v14 = vpop.permute.xlu1 %586 }
 0xb58   :  { %v589_v16 = vmul.f32 %v587_v14, %v584_v13 }
 0xb5a   :  { %v594_v17 = vadd.f32 %v593_v15, %v589_v16 }
 0xb5c   :  { %596 = vrot.lane.b32.xlu0 %v594_v17, %s3933_s21 }
 0xbce   :  { %v597_v18 = vpop.permute.xlu0 %596 }
 0xbcf   :  { %3439 = vmatmul.msk.f32.vlgmr.msra.gmra.mxu1 %vm222_vm6, %v597_v18 }
 0xc4c   :  { %v619_v20 = vpop.f32.mrf.mxu1 }
 0xc4d   :  { %v620_v21 = vadd.f32 %v619_v20, %v57_v19 }
 0xc4f   :  { %643 = vrot.lane.b32.xlu1 %v620_v21, %s3933_s21  ;;  %v622_v22 = vadd.f32 %v4040_v46, %v620_v21 }
 0xc51   :  { %v3440_v23 = vmul.f32 -1.442695, %v622_v22  ;;  %v58_v22 = vld [vmem:[#allocation7 + $0xb0] sm:$0xff] }
 0xc53   :  { %3604 = vpow2.f32 %v3440_v23 }
 0xc59   :  { %v3605_v24 = vpop.eup %3604 }
 0xc5a   :  { %v626_v26 = vadd.f32 1.0, %v3605_v24 }
 0xc5c   :  { %3606 = vrcp.f32 %v626_v26  ;;  %v638_v45 = vand.u32 2147483648, %v626_v26  ;;  %vm632_vm5 = vweird.f32 %v626_v26  ;;  %v636_v47 = vand.u32 2147483647, %v626_v26 }
 0xc5e   :  { %v639_v49 = vor.u32 1.1754944e-38, %v638_v45  ;;  %vm637_vm8 = vcmp.eq.f32.partialorder %v636_v47, 8.507059e+37 }
 0xc62   :  { %v3607_v33 = vpop.eup %3606 }
 0xc63   :  { %v628_v34 = vmul.f32 %v3607_v33, %v626_v26  ;;  %vm633_vm4 = vweird.f32 %v3607_v33 }
 0xc64   :  { %vm634_vm7 = vmor %vm632_vm5, %vm633_vm4 }
 0xc65   :  { %v629_v35 = vsub.f32 1.0, %v628_v34 }
 0xc67   :  { %v630_v37 = vmul.f32 %v3607_v33, %v629_v35 }
 0xc69   :  { %v631_v6 = vadd.f32 %v3607_v33, %v630_v37 }
 0xc6b   :  { %v635_v48 = vsel %vm634_vm7, %v3607_v33, %v631_v6 }
 0xc6c   :  { %v640_v50 = vsel %vm637_vm8, %v639_v49, %v635_v48  ;;  %vm902_vm8 = vcmask 64512  }
 0xcc1   :  { %v644_v51 = vpop.permute.xlu1 %643 }
 0xcc2   :  { %v646_v52 = vmul.f32 %v644_v51, %v640_v50 }
 0xcc4   :  { %647 = vst.msk [vmem:[#allocation4 + $0x18] sm:$0xff] %vm222_vm6, %v646_v52 }
 0xccb   :  { %v655_v57 = vld [vmem:[#allocation4 + $0x18] sm:$0xff] }
 0xccc   :  { %v659_v58 = vmul.f32 %v655_v57, %v651_v53  ;;  %v794_v59 = vmul.f32 %v784_v56, %v655_v57  ;;  %v785_v57 = vld [vmem:[%s5407_s1 + $0x110] sm:$0xff] }
 0xcce   :  { %v662_v38 = vadd.f32 %v4161_v55, %v659_v58  ;;  %v4187_v43 = vadd.f32 %v4164_v54, %v794_v59 }
 0xcd0   :  { %3441 = vmatmul.msk.f32.vlgmr.msra.gmra.mxu2 %vm222_vm6, %v662_v38 }
 0xd53   :  { %v683_v60 = vpop.f32.mrf.mxu2 }
 0xd54   :  { %v684_v44 = vadd.f32 %v3968_v2, %v683_v60 }
 0xd56   :  { %707 = vrot.lane.b32.xlu2 %v684_v44, %s3932_s2  ;;  %v686_v61 = vadd.f32 %v684_v44, %v175_v39 }
 0xd58   :  { %v3442_v62 = vmul.f32 -1.442695, %v686_v61 }
 0xd5a   :  { %3608 = vpow2.f32 %v3442_v62 }
 0xd5e   :  { %723 = vrot.lane.b32.xlu2 %v662_v38, %s3934_s7 }
 0xd60   :  { %v3609_v63 = vpop.eup %3608 }
 0xd61   :  { %v690_v55 = vadd.f32 1.0, %v3609_v63 }
 0xd63   :  { %3610 = vrcp.f32 %v690_v55  ;;  %v702_v40 = vand.u32 2147483648, %v690_v55  ;;  %vm696_vm10 = vweird.f32 %v690_v55  ;;  %v700_v7 = vand.u32 2147483647, %v690_v55 }
 0xd65   :  { %v703_v9 = vor.u32 1.1754944e-38, %v702_v40  ;;  %vm701_vm12 = vcmp.eq.f32.partialorder %v700_v7, 8.507059e+37 }
 0xd69   :  { %v3611_v54 = vpop.eup %3610 }
 0xd6a   :  { %v692_v0 = vmul.f32 %v3611_v54, %v690_v55  ;;  %vm697_vm9 = vweird.f32 %v3611_v54 }
 0xd6b   :  { %vm698_vm11 = vmor %vm696_vm10, %vm697_vm9  ;;  %vm3410_vm9 = vcmask 130112  }
 0xd6c   :  { %v693_v1 = vsub.f32 1.0, %v692_v0 }
 0xd6e   :  { %v694_v4 = vmul.f32 %v3611_v54, %v693_v1 }
 0xd70   :  { %v695_v5 = vadd.f32 %v3611_v54, %v694_v4 }
 0xd72   :  { %v699_v8 = vsel %vm698_vm11, %v3611_v54, %v695_v5 }
 0xd73   :  { %v704_v10 = vsel %vm701_vm12, %v703_v9, %v699_v8 }
 0xd74   :  { %v717_v16 = vsub.f32 1.0, %v704_v10 }
 0xdb0   :  { %v708_v41 = vpop.permute.xlu2 %707 }
 0xdb1   :  { %v710_v11 = vmul.f32 %v708_v41, %v704_v10 }
 0xdb3   :  { %712 = vrot.lane.b32.xlu0 %v710_v11, %s3932_s2 }
 0xdb8   :  { %v724_v15 = vpop.permute.xlu2 %723 }
 0xdb9   :  { %v726_v18 = vmul.f32 %v724_v15, %v704_v10 }
 0xe25   :  { %v713_v12 = vpop.permute.xlu0 %712 }
 0xe26   :  { %v715_v13 = vadd.f32 %v713_v12, %v175_v39  ;;  %v178_v39 = vadd.f32 %v3973_v3, %v4037_v42 }
 0xe28   :  { %3612 = vtanh.f32 %v715_v13 }
 0xe2e   :  { %v3613_v14 = vpop.eup %3612 }
 0xe2f   :  { %719 = vrot.lane.b32.xlu1 %v3613_v14, %s3933_s21 }
 0xea1   :  { %v720_v17 = vpop.permute.xlu1 %719 }
 0xea2   :  { %v722_v19 = vmul.f32 %v720_v17, %v717_v16  ;;  %v63_v17 = vld [vmem:[#allocation7 + $0xe0] sm:$0xff] }
 0xea3   :  { %887 = vmatpush.msrb.mxu2 %v63_v17  ;;  %v3858_v17 = vld [vmem:[#allocation7 + $0x90] sm:$0xff] }
 0xea4   :  { %v727_v20 = vadd.f32 %v726_v18, %v722_v19  ;;  %v62_v18 = vld [vmem:[#allocation7 + $0xd8] sm:$0xff]  ;;  %v61_v19 = vld [vmem:[#allocation7 + $0xd0] sm:$0xff] }
 0xea5   :  { %888 = vmatpush.msrb.mxu2 %v62_v18 }
 0xea6   :  { %729 = vrot.lane.b32.xlu0 %v727_v20, %s3933_s21  ;;  %v60_v20 = vld [vmem:[#allocation7 + $0xc8] sm:$0xff] }
 0xea7   :  { %889 = vmatpush.msrb.mxu2 %v61_v19  ;;  %v4303_v19 = vld [vmem:[#allocation7 + $0xc0] ss:$0 sm:$0xff] }
 0xea9   :  { %890 = vmatpush.msrb.mxu2 %v60_v20 }
 0xf18   :  { %v730_v21 = vpop.permute.xlu0 %729 }
 0xf19   :  { %3443 = vmatmul.msk.f32.vlgmr.msrb.gmra.mxu3 %vm222_vm6, %v730_v21  ;;  %v115_v21 = vld [vmem:[#allocation7 + $0x280] sm:$0xff] }
 0xf9c   :  { %v752_v23 = vpop.f32.mrf.mxu3 }
 0xf9d   :  { %v753_v24 = vadd.f32 %v752_v23, %v58_v22  ;;  %v65_v22 = vld [vmem:[#allocation7 + $0xf0] sm:$0xff]  ;;  %v3935_v23 = vmov 0  }
 0xf9e   :  { %3555 = vset.pattern.permute.xlu1 %v3935_v23  ;;  %921 = vmatpush.msra.mxu3 %v65_v22 }
 0xf9f   :  { %776 = vrot.lane.b32.xlu1 %v753_v24, %s3933_s21  ;;  %v755_v26 = vadd.f32 %v4040_v46, %v753_v24  ;;  %3556 = vset.pattern.permute.xlu0 %v3935_v23 }
 0xfa0   :  { %1052 = vmatpush.msrb.mxu3 %v3979_v25  ;;  %v3560_v25 = vld [vmem:[#allocation7 + $0xe8] ss:$0 sm:$0xff] }
 0xfa1   :  { %v3444_v33 = vmul.f32 -1.442695, %v755_v26 }
 0xfa2   :  { %1053 = vmatpush.msrb.mxu3 %v3984_v27 }
 0xfa3   :  { %3614 = vpow2.f32 %v3444_v33  ;;  %v3936_v33 = vmov 0.0  }
 0xfa4   :  { %1054 = vmatpush.msrb.mxu3 %v3989_v28  ;;  %3408 = vst [vmem:[%s5409_s3] sm:$0xff] %v3936_v33 }
 0xfa6   :  { %1055 = vmatpush.msrb.mxu3 %v3993_v29  ;;  %v4241_v29 = vld [vmem:[#allocation7 + $0x58] sm:$0xff] }
 0xfa7   :  { %982 = vmatpush.msra.mxu2 %v4241_v29 }
 0xfa9   :  { %v3615_v34 = vpop.eup %3614 }
 0xfaa   :  { %v759_v35 = vadd.f32 1.0, %v3615_v34 }
 0xfac   :  { %3616 = vrcp.f32 %v759_v35  ;;  %v771_v49 = vand.u32 2147483648, %v759_v35  ;;  %vm765_vm14 = vweird.f32 %v759_v35  ;;  %v769_v51 = vand.u32 2147483647, %v759_v35 }
 0xfae   :  { %v772_v52 = vor.u32 1.1754944e-38, %v771_v49  ;;  %vm770_vm2 = vcmp.eq.f32.partialorder %v769_v51, 8.507059e+37  ;;  %v3857_v49 = vld [vmem:[%s5406_s0 + $0x8] sm:$0xff]  ;;  %v3561_v51 = vld [vmem:[#allocation7 + $0xf8] ss:$0 sm:$0xff] }
 0xfb2   :  { %v3617_v37 = vpop.eup %3616 }
 0xfb3   :  { %v761_v6 = vmul.f32 %v3617_v37, %v759_v35  ;;  %vm766_vm13 = vweird.f32 %v3617_v37 }
 0xfb4   :  { %vm767_vm15 = vmor %vm765_vm14, %vm766_vm13 }
 0xfb5   :  { %v762_v45 = vsub.f32 1.0, %v761_v6  ;;  %v4246_v6 = vld [vmem:[#allocation7 + $0x48] sm:$0xff] }
 0xfb7   :  { %v763_v47 = vmul.f32 %v3617_v37, %v762_v45  ;;  %v4249_v45 = vld [vmem:[#allocation7 + $0x40] sm:$0xff] }
 0xfb9   :  { %v764_v48 = vadd.f32 %v3617_v37, %v763_v47  ;;  %v43_v47 = vld [vmem:[#allocation7 + $0x38] sm:$0x3f] }
 0xfba   :  { %3449 = vmatpush.msk.msra.mxu1 %vm141_vm0, %v43_v47 }
 0xfbb   :  { %v768_v50 = vsel %vm767_vm15, %v3617_v37, %v764_v48  ;;  %v4243_v37 = vld [vmem:[#allocation7 + $0x50] sm:$0xff]  ;;  %v3856_v48 = vld [vmem:[%s5406_s0] sm:$0xff] }
 0xfbc   :  { %v773_v46 = vsel %vm770_vm2, %v772_v52, %v768_v50  ;;  %983 = vmatpush.msra.mxu2 %v4243_v37 }
 0xfbe   :  { %984 = vmatpush.msra.mxu2 %v4246_v6 }
 0xfc0   :  { %985 = vmatpush.msra.mxu2 %v4249_v45 }
0x1011   :  { %v777_v53 = vpop.permute.xlu1 %776 }
0x1012   :  { %v779_v56 = vmul.f32 %v777_v53, %v773_v46 }
0x1014   :  { %780 = vst.msk [vmem:[#allocation4 + $0x20] sm:$0xff] %vm222_vm6, %v779_v56  ;;  %v4271_v56 = vld [vmem:[#allocation7 + $0x68] ss:$0 sm:$0xff] }
0x101b   :  { %v790_v58 = vld [vmem:[#allocation4 + $0x20] sm:$0xff] }
0x101c   :  { %v795_v59 = vmul.f32 %v790_v58, %v785_v57 }
0x101e   :  { %v799_v38 = vadd.f32 %v4187_v43, %v795_v59 }
0x1020   :  { %3445 = vmatmul.msk.f32.vlgmr.msrb.gmra.mxu1 %vm222_vm6, %v799_v38 }
0x1028   :  { %3450 = vmatmul.msk.f32.vlgmr.msra.gmra.mxu1 %vm122_vm1, %v3856_v48 }
0x1030   :  { %3451 = vmatmul.msk.f32.gmra.mxu1 %vm122_vm1, %v3857_v49 }
0x1038   :  { %3452 = vmatmul.msk.f32.gmra.mxu1 %vm122_vm1, %v4000_v30 }
0x1040   :  { %3453 = vmatmul.msk.f32.gmra.mxu1 %vm122_vm1, %v4009_v31  ;;  %v48_v31 = vld [vmem:[#allocation7 + $0x60] sm:$0x1] }
0x1041   :  { %v965_v58 = vadd.f32 %v48_v31, %v43_v47 }
0x1043   :  { %v990_v59 = vperm.slane %v965_v58, 0 }
0x1048   :  { %3454 = vmatmul.msk.f32.gmra.mxu1 %vm122_vm1, %v4016_v32 }
0x1050   :  { %3455 = vmatmul.msk.f32.gmra.mxu1 %vm122_vm1, %v4023_v36 }
0x109d   :  { %v820_v60 = vpop.f32.mrf.mxu1 }
0x109e   :  { %v821_v44 = vadd.f32 %v3968_v2, %v820_v60 }
0x10a0   :  { %844 = vrot.lane.b32.xlu2 %v821_v44, %s3932_s2  ;;  %v823_v61 = vadd.f32 %v821_v44, %v178_v39 }
0x10a2   :  { %v3446_v62 = vmul.f32 -1.442695, %v823_v61 }
0x10a4   :  { %3618 = vpow2.f32 %v3446_v62 }
0x10a5   :  { %v948_v46 = vpop.f32.mrf.mxu1 }
0x10a6   :  { %v1108_v46 = vld [vmem:[%s5407_s1 + $0x30] sm:$0xff] }
0x10a8   :  { %860 = vrot.lane.b32.xlu2 %v799_v38, %s3934_s7 }
0x10aa   :  { %v3619_v63 = vpop.eup %3618 }
0x10ab   :  { %v827_v55 = vadd.f32 1.0, %v3619_v63 }
0x10ad   :  { %3620 = vrcp.f32 %v827_v55  ;;  %v839_v2 = vand.u32 2147483648, %v827_v55  ;;  %vm833_vm4 = vweird.f32 %v827_v55  ;;  %v837_v5 = vand.u32 2147483647, %v827_v55 }
0x10af   :  { %v840_v7 = vor.u32 1.1754944e-38, %v839_v2  ;;  %vm838_vm7 = vcmp.eq.f32.partialorder %v837_v5, 8.507059e+37 }
0x10b3   :  { %v3621_v54 = vpop.eup %3620 }
0x10b4   :  { %v829_v43 = vmul.f32 %v3621_v54, %v827_v55  ;;  %vm834_vm3 = vweird.f32 %v3621_v54 }
0x10b5   :  { %vm835_vm5 = vmor %vm833_vm4, %vm834_vm3 }
0x10b6   :  { %v830_v0 = vsub.f32 1.0, %v829_v43 }
0x10b8   :  { %v831_v1 = vmul.f32 %v3621_v54, %v830_v0 }
0x10ba   :  { %v832_v4 = vadd.f32 %v3621_v54, %v831_v1 }
0x10bc   :  { %v836_v40 = vsel %vm835_vm5, %v3621_v54, %v832_v4 }
0x10bd   :  { %v841_v42 = vsel %vm838_vm7, %v840_v7, %v836_v40 }
0x10be   :  { %v854_v12 = vsub.f32 1.0, %v841_v42 }
0x10fa   :  { %v845_v3 = vpop.permute.xlu2 %844 }
0x10fb   :  { %v847_v8 = vmul.f32 %v845_v3, %v841_v42  ;;  %v4278_v3 = vld [vmem:[#allocation7 + $0x1c8] sm:$0xff] }
0x10fd   :  { %849 = vrot.lane.b32.xlu0 %v847_v8, %s3932_s2  ;;  %v4284_v8 = vld [vmem:[#allocation7 + $0x1b8] sm:$0xff] }
0x1102   :  { %v861_v11 = vpop.permute.xlu2 %860 }
0x1103   :  { %v863_v14 = vmul.f32 %v861_v11, %v841_v42  ;;  %v4280_v42 = vld [vmem:[#allocation7 + $0x1c0] sm:$0xff] }
0x116f   :  { %v850_v9 = vpop.permute.xlu0 %849 }
0x1170   :  { %v852_v41 = vadd.f32 %v850_v9, %v178_v39  ;;  %v4288_v9 = vld [vmem:[#allocation7 + $0x1b0] sm:$0xff] }
0x1172   :  { %3622 = vtanh.f32 %v852_v41 }
0x1178   :  { %v3623_v10 = vpop.eup %3622 }
0x1179   :  { %856 = vrot.lane.b32.xlu1 %v3623_v10, %s3933_s21 }
0x1181   :  { %897 = vperm.xlu1 %3555, %v115_v21  }
0x11eb   :  { %v857_v13 = vpop.permute.xlu1 %856 }
0x11ec   :  { %v859_v15 = vmul.f32 %v857_v13, %v854_v12 }
0x11ee   :  { %v864_v16 = vadd.f32 %v863_v14, %v859_v15 }
0x11f0   :  { %866 = vrot.lane.b32.xlu0 %v864_v16, %s3933_s21 }
0x11f3   :  { %v4225_v35 = vpop.permute.xlu1 %897 }
0x1262   :  { %v867_v24 = vpop.permute.xlu0 %866 }
0x1263   :  { %869 = vst.msk [vmem:[#allocation2 + $0x28] sm:$0xff] %vm222_vm6, %v867_v24 }
0x126a   :  { %v870_v26 = vld [vmem:[#allocation2 + $0x28] sm:$0xff] }
0x126b   :  { %3447 = vmatmul.msk.f32.vlgmr.msrb.gmra.mxu2 %vm222_vm6, %v870_v26 }
0x126c   :  { %1099 = vmatpush.msrb.mxu2 %v4278_v3 }
0x126e   :  { %1100 = vmatpush.msrb.mxu2 %v4280_v42 }
0x1270   :  { %1101 = vmatpush.msrb.mxu2 %v4284_v8 }
0x1272   :  { %1102 = vmatpush.msrb.mxu2 %v4288_v9 }
0x12ee   :  { %v892_v34 = vpop.f32.mrf.mxu2 }
0x12ef   :  { %v893_v27 = vadd.f32 %v3560_v25, %v892_v34 }
0x12f1   :  { %v4228_v28 = vmul.f32 %v4225_v35, %v893_v27 }
0x12f3   :  { %3448 = vmatmul.msk.f32.vlgmr.msra.gmra.mxu3 %vm902_vm8, %v4228_v28  ;;  %3409 = vst.msk [vmem:[%s5409_s3] sm:$0xff] %vm902_vm8, %v4228_v28 }
0x12f4   :  { %3411 = vst.msk [vmem:[%s5409_s3] sm:$0xff] %vm3410_vm9, %v4228_v28  ;;  %1364 = vmatpush.msra.mxu3 %v4278_v3 }
0x12f6   :  { %1365 = vmatpush.msra.mxu3 %v4280_v42 }
0x12f8   :  { %1366 = vmatpush.msra.mxu3 %v4284_v8 }
0x12fa   :  { %1367 = vmatpush.msra.mxu3 %v4288_v9 }
0x1376   :  { %v923_v50 = vpop.f32.mrf.mxu3 }
0x1377   :  { %v924_v52 = vadd.f32 %v3561_v51, %v923_v50 }
0x1379   :  { %3624 = vtanh.f32 %v924_v52 }
0x137f   :  { %v3625_v53 = vpop.eup %3624 }
0x1380   :  { %3456 = vmatmul.msk.f32.vlgmr.msra.gmra.mxu2 %vm222_vm6, %v3625_v53 }
0x1381   :  { %1130 = vmatpush.msra.mxu2 %v4241_v29 }
0x1383   :  { %1131 = vmatpush.msra.mxu2 %v4243_v37 }
0x1385   :  { %1132 = vmatpush.msra.mxu2 %v4246_v6 }
0x1387   :  { %1133 = vmatpush.msra.mxu2 %v4249_v45 }
0x1403   :  { %v987_v30 = vpop.f32.mrf.mxu2 }
0x1404   :  { %v988_v57 = vadd.f32 %v4271_v56, %v987_v30 }
0x1406   :  { %1012 = vrot.lane.b32.xlu2 %v988_v57, %s3932_s2  ;;  %v991_v38 = vadd.f32 %v990_v59, %v988_v57 }
0x1408   :  { %v3457_v60 = vmul.f32 -1.442695, %v991_v38 }
0x140a   :  { %3626 = vpow2.f32 %v3457_v60 }
0x140e   :  { %1028 = vrot.lane.b32.xlu2 %v3625_v53, %s3934_s7 }
0x1410   :  { %v3627_v32 = vpop.eup %3626 }
0x1411   :  { %v995_v44 = vadd.f32 1.0, %v3627_v32  ;;  %v4324_v32 = vld [vmem:[#allocation7 + $0x60] ss:$0 sm:$0xff] }
0x1413   :  { %3628 = vrcp.f32 %v995_v44  ;;  %v1007_v55 = vand.u32 2147483648, %v995_v44  ;;  %vm1001_vm1 = vweird.f32 %v995_v44  ;;  %v1005_v54 = vand.u32 2147483647, %v995_v44 }
0x1415   :  { %v1008_v0 = vor.u32 1.1754944e-38, %v1007_v55  ;;  %vm1006_vm11 = vcmp.eq.f32.partialorder %v1005_v54, 8.507059e+37 }
0x1419   :  { %v3629_v36 = vpop.eup %3628 }
0x141a   :  { %v997_v39 = vmul.f32 %v3629_v36, %v995_v44  ;;  %vm1002_vm0 = vweird.f32 %v3629_v36  ;;  %v950_v44 = vpop.f32.mrf.mxu1 }
0x141b   :  { %vm1003_vm10 = vmor %vm1001_vm1, %vm1002_vm0 }
0x141c   :  { %v998_v61 = vsub.f32 1.0, %v997_v39 }
0x141e   :  { %v999_v62 = vmul.f32 %v3629_v36, %v998_v61 }
0x1420   :  { %v1000_v63 = vadd.f32 %v3629_v36, %v999_v62 }
0x1422   :  { %v1004_v43 = vsel %vm1003_vm10, %v3629_v36, %v1000_v63  ;;  %v951_v36 = vadd.f32 %v4324_v32, %v950_v44 }
0x1423   :  { %v1009_v4 = vsel %vm1006_vm11, %v1008_v0, %v1004_v43 }
0x1424   :  { %v1022_v10 = vsub.f32 1.0, %v1009_v4 }
0x1460   :  { %v1013_v1 = vpop.permute.xlu2 %1012 }
0x1461   :  { %v1015_v2 = vmul.f32 %v1013_v1, %v1009_v4 }
0x1463   :  { %1017 = vrot.lane.b32.xlu0 %v1015_v2, %s3932_s2 }
0x1468   :  { %v1029_v41 = vpop.permute.xlu2 %1028 }
0x1469   :  { %v1031_v12 = vmul.f32 %v1029_v41, %v1009_v4 }
0x14d5   :  { %v1018_v5 = vpop.permute.xlu0 %1017 }
0x14d6   :  { %v1020_v40 = vadd.f32 %v1018_v5, %v990_v59 }
0x14d8   :  { %3630 = vtanh.f32 %v1020_v40 }
0x14de   :  { %v3631_v7 = vpop.eup %3630 }
0x14df   :  { %1024 = vrot.lane.b32.xlu1 %v3631_v7, %s3933_s21 }
0x1551   :  { %v1025_v11 = vpop.permute.xlu1 %1024 }
0x1552   :  { %v1027_v13 = vmul.f32 %v1025_v11, %v1022_v10 }
0x1554   :  { %v1032_v14 = vadd.f32 %v1031_v12, %v1027_v13 }
0x1556   :  { %1034 = vrot.lane.b32.xlu0 %v1032_v14, %s3933_s21 }
0x15c8   :  { %v1035_v15 = vpop.permute.xlu0 %1034 }
0x15c9   :  { %1037 = vst.msk [vmem:[#allocation3] sm:$0xff] %vm222_vm6, %v1035_v15  ;;  %3458 = vmatmul.msk.f32.vlgmr.msrb.gmra.mxu3 %vm222_vm6, %v1035_v15  ;;  %3460 = vmatmul.msk.f32.vlgmr.msrb.gmra.mxu2 %vm222_vm6, %v1035_v15 }
0x164c   :  { %v1057_v16 = vpop.f32.mrf.mxu3  ;;  %v4318_v31 = vpop.f32.mrf.mxu2 }
0x164d   :  { %v1058_v18 = vadd.f32 %v3858_v17, %v1057_v16 }
0x164f   :  { %1081 = vrot.lane.b32.xlu1 %v1058_v18, %s3933_s21  ;;  %v1060_v20 = vadd.f32 %v4303_v19, %v1058_v18 }
0x1651   :  { %v3459_v21 = vmul.f32 -1.442695, %v1060_v20 }
0x1653   :  { %3632 = vpow2.f32 %v3459_v21 }
0x1659   :  { %v3633_v22 = vpop.eup %3632 }
0x165a   :  { %v1064_v23 = vadd.f32 1.0, %v3633_v22 }
0x165c   :  { %3634 = vrcp.f32 %v1064_v23  ;;  %v1076_v47 = vand.u32 2147483648, %v1064_v23  ;;  %vm1070_vm13 = vweird.f32 %v1064_v23  ;;  %v1074_v48 = vand.u32 2147483647, %v1064_v23 }
0x165e   :  { %v1077_v51 = vor.u32 1.1754944e-38, %v1076_v47  ;;  %vm1075_vm15 = vcmp.eq.f32.partialorder %v1074_v48, 8.507059e+37 }
0x1662   :  { %v3635_v24 = vpop.eup %3634 }
0x1663   :  { %v1066_v26 = vmul.f32 %v3635_v24, %v1064_v23  ;;  %vm1071_vm12 = vweird.f32 %v3635_v24 }
0x1664   :  { %vm1072_vm14 = vmor %vm1070_vm13, %vm1071_vm12 }
0x1665   :  { %v1067_v25 = vsub.f32 1.0, %v1066_v26 }
0x1667   :  { %v1068_v34 = vmul.f32 %v3635_v24, %v1067_v25 }
0x1669   :  { %v1069_v27 = vadd.f32 %v3635_v24, %v1068_v34 }
0x166b   :  { %v1073_v49 = vsel %vm1072_vm14, %v3635_v24, %v1069_v27 }
0x166c   :  { %v1078_v52 = vsel %vm1075_vm15, %v1077_v51, %v1073_v49 }
0x16c1   :  { %v1082_v50 = vpop.permute.xlu1 %1081 }
0x16c2   :  { %v1084_v53 = vmul.f32 %v1082_v50, %v1078_v52 }
0x16c4   :  { %1085 = vst.msk [vmem:[#allocation5] sm:$0xff] %vm222_vm6, %v1084_v53 }
0x16cb   :  { %v4310_v30 = vld [vmem:[#allocation5] sm:$0xff] }
0x16cc   :  { %v4313_v57 = vmul.f32 %v4310_v30, %v1108_v46 }
0x16ce   :  { %3461 = vmatmul.msk.f32.vlgmr.msra.gmra.mxu2 %vm222_vm6, %v4313_v57 }
0x16d6   :  { %1137 = vmatmul.f32.gmra.mxu2 %v3936_v33 }
0x1751   :  { %v1135_v58 = vpop.f32.mrf.mxu2 }
0x1752   :  { %v1136_v59 = vadd.f32 %v4271_v56, %v1135_v58 }
0x1754   :  { %1183 = vrot.lane.b32.xlu0 %v1136_v59, %s3932_s2  ;;  %v1141_v63 = vadd.f32 %v1136_v59, %v951_v36 }
0x1756   :  { %v3462_v54 = vmul.f32 -1.442695, %v1141_v63  ;;  %v4340_v63 = vld [vmem:[#allocation7 + $0x1e8] sm:$0xff] }
0x1757   :  { %1243 = vmatpush.msra.mxu0 %v4340_v63  ;;  %1560 = vmatpush.msrb.mxu3 %v4340_v63 }
0x1759   :  { %v1138_v38 = vpop.f32.mrf.mxu2 }
0x175a   :  { %v1139_v60 = vadd.f32 %v4271_v56, %v1138_v38 }
0x175c   :  { %1185 = vrot.lane.b32.xlu2 %v1139_v60, %s3932_s2  ;;  %v1142_v39 = vadd.f32 %v1139_v60, %v951_v36 }
0x175e   :  { %v3463_v61 = vmul.f32 -1.442695, %v1142_v39 }
0x1760   :  { %3636 = vpow2.f32 %v3463_v61 }
0x1766   :  { %v3637_v62 = vpop.eup %3636 }
0x1767   :  { %v1150_v55 = vadd.f32 1.0, %v3637_v62 }
0x1769   :  { %3638 = vrcp.f32 %v1150_v55  ;;  %v1177_v41 = vand.u32 2147483648, %v1150_v55  ;;  %vm1171_vm3 = vweird.f32 %v1150_v55  ;;  %v1175_v10 = vand.u32 2147483647, %v1150_v55 }
0x176a   :  { %3640 = vpow2.f32 %v3462_v54  ;;  %v4350_v54 = vld [vmem:[#allocation7 + $0x1d0] sm:$0xff] }
0x176b   :  { %v1178_v13 = vor.u32 1.1754944e-38, %v1177_v41  ;;  %vm1176_vm5 = vcmp.eq.f32.partialorder %v1175_v10, 8.507059e+37  ;;  %v4382_v41 = vld [vmem:[#allocation7 + $0x250] sm:$0xff] }
0x176f   :  { %v3639_v43 = vpop.eup %3638 }
0x1770   :  { %v3641_v0 = vpop.eup %3640  ;;  %v1167_v1 = vmul.f32 %v3639_v43, %v1150_v55  ;;  %vm1172_vm2 = vweird.f32 %v3639_v43  ;;  %v4346_v55 = vld [vmem:[#allocation7 + $0x1d8] sm:$0xff] }
0x1771   :  { %v1149_v4 = vadd.f32 1.0, %v3641_v0  ;;  %vm1173_vm4 = vmor %vm1171_vm3, %vm1172_vm2  ;;  %v4359_v0 = vld [vmem:[#allocation7 + $0x80] sm:$0xff] }
0x1772   :  { %v1168_v2 = vsub.f32 1.0, %v1167_v1  ;;  %v4362_v1 = vld [vmem:[#allocation7 + $0x78] sm:$0xff] }
0x1773   :  { %3642 = vrcp.f32 %v1149_v4  ;;  %v1162_v21 = vand.u32 2147483648, %v1149_v4  ;;  %vm1156_vm9 = vweird.f32 %v1149_v4  ;;  %v1160_v22 = vand.u32 2147483647, %v1149_v4 }
0x1774   :  { %v1169_v5 = vmul.f32 %v3639_v43, %v1168_v2  ;;  %v4368_v2 = vld [vmem:[#allocation7 + $0x270] sm:$0xff] }
0x1775   :  { %v1163_v24 = vor.u32 1.1754944e-38, %v1162_v21  ;;  %vm1161_vm1 = vcmp.eq.f32.partialorder %v1160_v22, 8.507059e+37  ;;  %1254 = vmatpush.msrb.mxu2 %v4368_v2  ;;  %1575 = vmatpush.msrb.mxu1 %v4368_v2  ;;  %v3864_v22 = vld [vmem:[#allocation7 + $0x98] sm:$0xff] }
0x1776   :  { %v1170_v40 = vadd.f32 %v3639_v43, %v1169_v5  ;;  %v4370_v5 = vld [vmem:[#allocation7 + $0x268] sm:$0xff] }
0x1777   :  { %1255 = vmatpush.msrb.mxu2 %v4370_v5  ;;  %1576 = vmatpush.msrb.mxu1 %v4370_v5 }
0x1778   :  { %v1174_v11 = vsel %vm1173_vm4, %v3639_v43, %v1170_v40  ;;  %v4356_v43 = vld [vmem:[#allocation7 + $0x88] sm:$0xff]  ;;  %v4374_v40 = vld [vmem:[#allocation7 + $0x260] sm:$0xff] }
0x1779   :  { %v3643_v7 = vpop.eup %3642  ;;  %v1179_v15 = vsel %vm1176_vm5, %v1178_v13, %v1174_v11  ;;  %1256 = vmatpush.msrb.mxu2 %v4374_v40  ;;  %1577 = vmatpush.msrb.mxu1 %v4374_v40  ;;  %v4388_v11 = vld [vmem:[#allocation7 + $0x248] sm:$0xff]  ;;  %v4397_v13 = vld [vmem:[#allocation7 + $0x238] sm:$0xff] }
0x177a   :  { %v1152_v12 = vmul.f32 %v3643_v7, %v1149_v4  ;;  %vm1157_vm7 = vweird.f32 %v3643_v7  ;;  %v1204_v53 = vsub.f32 1.0, %v1179_v15  ;;  %v4365_v4 = vld [vmem:[#allocation7 + $0x70] sm:$0xff] }
0x177b   :  { %vm1158_vm0 = vmor %vm1156_vm9, %vm1157_vm7 }
0x177c   :  { %v1153_v17 = vsub.f32 1.0, %v1152_v12  ;;  %v4392_v12 = vld [vmem:[#allocation7 + $0x240] sm:$0xff] }
0x177e   :  { %v1154_v18 = vmul.f32 %v3643_v7, %v1153_v17 }
0x1780   :  { %v1155_v20 = vadd.f32 %v3643_v7, %v1154_v18 }
0x1782   :  { %v1159_v23 = vsel %vm1158_vm0, %v3643_v7, %v1155_v20  ;;  %v4378_v7 = vld [vmem:[#allocation7 + $0x258] sm:$0xff] }
0x1783   :  { %v1164_v25 = vsel %vm1161_vm1, %v1163_v24, %v1159_v23  ;;  %1257 = vmatpush.msrb.mxu2 %v4378_v7  ;;  %1578 = vmatpush.msrb.mxu1 %v4378_v7 }
0x1784   :  { %v1203_v44 = vsub.f32 1.0, %v1164_v25 }
0x1785   :  { %1258 = vmatpush.msrb.mxu2 %v4382_v41  ;;  %1579 = vmatpush.msrb.mxu1 %v4382_v41 }
0x1787   :  { %1259 = vmatpush.msrb.mxu2 %v4388_v11  ;;  %1580 = vmatpush.msrb.mxu1 %v4388_v11 }
0x1789   :  { %1260 = vmatpush.msrb.mxu2 %v4392_v12  ;;  %1581 = vmatpush.msrb.mxu1 %v4392_v12 }
0x178b   :  { %1261 = vmatpush.msrb.mxu2 %v4397_v13  ;;  %1582 = vmatpush.msrb.mxu1 %v4397_v13 }
0x17b6   :  { %v1186_v14 = vpop.permute.xlu2 %1185 }
0x17b7   :  { %v1190_v16 = vmul.f32 %v1186_v14, %v1179_v15  ;;  %v4402_v14 = vld [vmem:[#allocation7 + $0x230] sm:$0xff] }
0x17b8   :  { %1262 = vmatpush.msrb.mxu2 %v4402_v14  ;;  %1583 = vmatpush.msrb.mxu1 %v4402_v14 }
0x17b9   :  { %1195 = vrot.lane.b32.xlu1 %v1190_v16, %s3932_s2 }
0x17c1   :  { %1217 = vrot.lane.b32.xlu1 %v3936_v33, %s3934_s7 }
0x17c6   :  { %v1184_v26 = vpop.permute.xlu0 %1183 }
0x17c7   :  { %v1189_v34 = vmul.f32 %v1184_v26, %v1164_v25 }
0x17c9   :  { %1193 = vrot.lane.b32.xlu2 %v1189_v34, %s3932_s2 }
0x1823   :  { %v1194_v27 = vpop.permute.xlu2 %1193 }
0x1824   :  { %v1199_v47 = vadd.f32 %v1194_v27, %v951_v36 }
0x1826   :  { %3644 = vtanh.f32 %v1199_v47 }
0x182b   :  { %v1196_v48 = vpop.permute.xlu1 %1195 }
0x182c   :  { %v3645_v49 = vpop.eup %3644  ;;  %v1200_v51 = vadd.f32 %v1196_v48, %v951_v36 }
0x182d   :  { %1207 = vrot.lane.b32.xlu2 %v3645_v49, %s3933_s21 }
0x182e   :  { %3646 = vtanh.f32 %v1200_v51 }
0x1833   :  { %v4335_v52 = vpop.permute.xlu1 %1217 }
0x1834   :  { %v3647_v50 = vpop.eup %3646  ;;  %v1222_v58 = vmul.f32 %v4335_v52, %v1179_v15  ;;  %v4463_v15 = vld [vmem:[#allocation7 + $0x1f0] ss:$0 sm:$0xff] }
0x1835   :  { %1209 = vrot.lane.b32.xlu0 %v3647_v50, %s3933_s21  ;;  %v4469_v16 = vadd.f32 %v4463_v15, %v4318_v31 }
0x183d   :  { %1215 = vrot.lane.b32.xlu0 %v4313_v57, %s3934_s7  ;;  %v4342_v57 = vld [vmem:[#allocation7 + $0x1e0] sm:$0xff] }
0x183e   :  { %1244 = vmatpush.msra.mxu0 %v4342_v57  ;;  %1561 = vmatpush.msrb.mxu3 %v4342_v57 }
0x1840   :  { %1245 = vmatpush.msra.mxu0 %v4346_v55  ;;  %1562 = vmatpush.msrb.mxu3 %v4346_v55 }
0x1842   :  { %1246 = vmatpush.msra.mxu0 %v4350_v54  ;;  %1563 = vmatpush.msrb.mxu3 %v4350_v54 }
0x1844   :  { %1318 = vmatpush.msrb.mxu0 %v4356_v43 }
0x1846   :  { %1319 = vmatpush.msrb.mxu0 %v4359_v0 }
0x1848   :  { %1320 = vmatpush.msrb.mxu0 %v4362_v1 }
0x184a   :  { %1321 = vmatpush.msrb.mxu0 %v4365_v4 }
0x1887   :  { %v1208_v60 = vpop.permute.xlu2 %1207 }
0x1888   :  { %v1213_v39 = vmul.f32 %v1208_v60, %v1203_v44  ;;  %v1373_v60 = vld [vmem:[%s5407_s1 + $0x60] sm:$0xff]  ;;  %v1374_v44 = vld [vmem:[%s5407_s1 + $0x68] sm:$0xff] }
0x18a7   :  { %v1210_v46 = vpop.permute.xlu0 %1209 }
0x18a8   :  { %v1214_v59 = vmul.f32 %v1210_v46, %v1204_v53 }
0x18aa   :  { %v1224_v38 = vadd.f32 %v1222_v58, %v1214_v59 }
0x18ac   :  { %1227 = vrot.lane.b32.xlu1 %v1224_v38, %s3933_s21 }
0x18af   :  { %v1216_v36 = vpop.permute.xlu0 %1215 }
0x18b0   :  { %v1221_v61 = vmul.f32 %v1216_v36, %v1164_v25 }
0x18b2   :  { %v1223_v62 = vadd.f32 %v1221_v61, %v1213_v39  ;;  %v1377_v39 = vmul.f32 %v1373_v60, %v4310_v30 }
0x18b4   :  { %1300 = vrot.lane.b32.xlu2 %v1223_v62, %s3933_s21 }
0x190e   :  { %v1301_v10 = vpop.permute.xlu2 %1300 }
0x190f   :  { %1303 = vst.msk [vmem:[#allocation3 + $0x8] sm:$0xff] %vm222_vm6, %v1301_v10  ;;  %3467 = vmatmul.msk.f32.vlgmr.msra.gmra.mxu3 %vm222_vm6, %v1301_v10 }
0x1910   :  { %1701 = vmatpush.msra.mxu3 %v4278_v3 }
0x1912   :  { %1702 = vmatpush.msra.mxu3 %v4280_v42  ;;  %v4420_v42 = vld [vmem:[#allocation7 + $0x228] sm:$0xff] }
0x1913   :  { %1263 = vmatpush.msrb.mxu2 %v4420_v42  ;;  %1584 = vmatpush.msrb.mxu1 %v4420_v42 }
0x1914   :  { %1703 = vmatpush.msra.mxu3 %v4284_v8  ;;  %v4422_v8 = vld [vmem:[#allocation7 + $0x220] sm:$0xff] }
0x1915   :  { %1264 = vmatpush.msrb.mxu2 %v4422_v8  ;;  %1585 = vmatpush.msrb.mxu1 %v4422_v8 }
0x1916   :  { %1704 = vmatpush.msra.mxu3 %v4288_v9  ;;  %v4426_v9 = vld [vmem:[#allocation7 + $0x218] sm:$0xff] }
0x1917   :  { %1265 = vmatpush.msrb.mxu2 %v4426_v9  ;;  %1586 = vmatpush.msrb.mxu1 %v4426_v9 }
0x191e   :  { %v1228_v3 = vpop.permute.xlu1 %1227 }
0x191f   :  { %3464 = vmatmul.msk.f32.vlgmr.msra.gmra.mxu0 %vm222_vm6, %v1228_v3 }
0x1920   :  { %1399 = vmatpush.msra.mxu0 %v4241_v29 }
0x1922   :  { %1400 = vmatpush.msra.mxu0 %v4243_v37 }
0x1924   :  { %1401 = vmatpush.msra.mxu0 %v4246_v6 }
0x1926   :  { %1402 = vmatpush.msra.mxu0 %v4249_v45 }
0x1927   :  { %3465 = vmatmul.msk.f32.vlgmr.msrb.gmra.mxu0 %vm222_vm6, %v1301_v10 }
0x1928   :  { %1743 = vmatpush.msrb.mxu0 %v4241_v29  ;;  %v4430_v29 = vld [vmem:[#allocation7 + $0x210] sm:$0xff] }
0x1929   :  { %1266 = vmatpush.msrb.mxu2 %v4430_v29  ;;  %1587 = vmatpush.msrb.mxu1 %v4430_v29 }
0x192a   :  { %1744 = vmatpush.msrb.mxu0 %v4243_v37  ;;  %v4436_v37 = vld [vmem:[#allocation7 + $0x208] sm:$0xff] }
0x192b   :  { %1267 = vmatpush.msrb.mxu2 %v4436_v37  ;;  %1588 = vmatpush.msrb.mxu1 %v4436_v37 }
0x192c   :  { %1745 = vmatpush.msrb.mxu0 %v4246_v6  ;;  %v4440_v6 = vld [vmem:[#allocation7 + $0x200] sm:$0xff] }
0x192d   :  { %1268 = vmatpush.msrb.mxu2 %v4440_v6  ;;  %1589 = vmatpush.msrb.mxu1 %v4440_v6 }
0x192e   :  { %1746 = vmatpush.msrb.mxu0 %v4249_v45  ;;  %v4443_v45 = vld [vmem:[#allocation7 + $0x1f8] sm:$0xff] }
0x192f   :  { %1269 = vmatpush.msrb.mxu2 %v4443_v45  ;;  %1590 = vmatpush.msrb.mxu1 %v4443_v45 }
0x1931   :  { %1655 = vmatpush.msra.mxu2 %v4356_v43  ;;  %1975 = vmatpush.msra.mxu1 %v4368_v2 }
0x1933   :  { %1656 = vmatpush.msra.mxu2 %v4359_v0  ;;  %1976 = vmatpush.msra.mxu1 %v4370_v5 }
0x1935   :  { %1657 = vmatpush.msra.mxu2 %v4362_v1  ;;  %1977 = vmatpush.msra.mxu1 %v4374_v40 }
0x1937   :  { %1658 = vmatpush.msra.mxu2 %v4365_v4  ;;  %1978 = vmatpush.msra.mxu1 %v4378_v7 }
0x1939   :  { %1979 = vmatpush.msra.mxu1 %v4382_v41 }
0x193b   :  { %1980 = vmatpush.msra.mxu1 %v4388_v11 }
0x193d   :  { %1981 = vmatpush.msra.mxu1 %v4392_v12 }
0x193f   :  { %1982 = vmatpush.msra.mxu1 %v4397_v13 }
0x1941   :  { %1983 = vmatpush.msra.mxu1 %v4402_v14 }
0x1943   :  { %1984 = vmatpush.msra.mxu1 %v4420_v42 }
0x1945   :  { %1985 = vmatpush.msra.mxu1 %v4422_v8 }
0x1947   :  { %1986 = vmatpush.msra.mxu1 %v4426_v9 }
0x1949   :  { %1987 = vmatpush.msra.mxu1 %v4430_v29 }
0x194b   :  { %1988 = vmatpush.msra.mxu1 %v4436_v37 }
0x194d   :  { %1989 = vmatpush.msra.mxu1 %v4440_v6 }
0x194f   :  { %1990 = vmatpush.msra.mxu1 %v4443_v45 }
0x199c   :  { %v1248_v17 = vpop.f32.mrf.mxu0 }
0x199d   :  { %v1251_v18 = vadd.f32 %v1248_v17, %v4469_v16 }
0x199f   :  { %v1252_v20 = vmax.f32 %v1251_v18, 0.0 }
0x19a1   :  { %1270 = vmatmul.f32.vlgmr.msrb.gmra.mxu2 %v1252_v20  ;;  %v953_v20 = vpop.f32.mrf.mxu1 }
0x19a2   :  { %1955 = vmatpush.msrb.mxu2 %v4340_v63 }
0x19a4   :  { %v1323_v21 = vpop.f32.mrf.mxu0  ;;  %1956 = vmatpush.msrb.mxu2 %v4342_v57 }
0x19a5   :  { %v1324_v23 = vadd.f32 %v3864_v22, %v1323_v21  ;;  %v4521_v21 = vadd.f32 %v4324_v32, %v953_v20 }
0x19a6   :  { %1957 = vmatpush.msrb.mxu2 %v4346_v55 }
0x19a7   :  { %1347 = vrot.lane.b32.xlu0 %v1324_v23, %s3933_s21  ;;  %v1326_v31 = vadd.f32 %v4303_v19, %v1324_v23 }
0x19a8   :  { %1958 = vmatpush.msrb.mxu2 %v4350_v54 }
0x19a9   :  { %v3466_v24 = vmul.f32 -1.442695, %v1326_v31 }
0x19ab   :  { %3648 = vpow2.f32 %v3466_v24 }
0x19b1   :  { %v3649_v26 = vpop.eup %3648 }
0x19b2   :  { %v1330_v25 = vadd.f32 1.0, %v3649_v26 }
0x19b4   :  { %3650 = vrcp.f32 %v1330_v25  ;;  %v1342_v51 = vand.u32 2147483648, %v1330_v25  ;;  %vm1336_vm11 = vweird.f32 %v1330_v25  ;;  %v1340_v50 = vand.u32 2147483647, %v1330_v25 }
0x19b6   :  { %v1343_v46 = vor.u32 1.1754944e-38, %v1342_v51  ;;  %vm1341_vm13 = vcmp.eq.f32.partialorder %v1340_v50, 8.507059e+37 }
0x19ba   :  { %v3651_v34 = vpop.eup %3650 }
0x19bb   :  { %v1332_v27 = vmul.f32 %v3651_v34, %v1330_v25  ;;  %vm1337_vm10 = vweird.f32 %v3651_v34 }
0x19bc   :  { %vm1338_vm12 = vmor %vm1336_vm11, %vm1337_vm10 }
0x19bd   :  { %v1333_v47 = vsub.f32 1.0, %v1332_v27 }
0x19bf   :  { %v1334_v48 = vmul.f32 %v3651_v34, %v1333_v47 }
0x19c1   :  { %v1335_v49 = vadd.f32 %v3651_v34, %v1334_v48 }
0x19c3   :  { %v1339_v53 = vsel %vm1338_vm12, %v3651_v34, %v1335_v49 }
0x19c4   :  { %v1344_v59 = vsel %vm1341_vm13, %v1343_v46, %v1339_v53 }
0x1a19   :  { %v1348_v58 = vpop.permute.xlu0 %1347 }
0x1a1a   :  { %v1350_v38 = vmul.f32 %v1348_v58, %v1344_v59 }
0x1a1c   :  { %1351 = vst.msk [vmem:[#allocation5 + $0x8] sm:$0xff] %vm222_vm6, %v1350_v38 }
0x1a23   :  { %v4488_v36 = vld [vmem:[#allocation5 + $0x8] sm:$0xff] }
0x1a24   :  { %v4492_v61 = vmul.f32 %v4488_v36, %v1374_v44 }
0x1a26   :  { %v1380_v62 = vadd.f32 %v4492_v61, %v1377_v39 }
0x1a28   :  { %3468 = vmatmul.msk.f32.vlgmr.msra.gmra.mxu0 %vm222_vm6, %v1380_v62 }
0x1a29   :  { %2455 = vmatpush.msra.mxu0 %v4368_v2 }
0x1a2b   :  { %2456 = vmatpush.msra.mxu0 %v4370_v5 }
0x1a2d   :  { %2457 = vmatpush.msra.mxu0 %v4374_v40 }
0x1a2f   :  { %2458 = vmatpush.msra.mxu0 %v4378_v7 }
0x1a30   :  { %3469 = vmatmul.msk.f32.gmra.mxu0 %vm222_vm6, %v4492_v61 }
0x1a31   :  { %2459 = vmatpush.msra.mxu0 %v4382_v41 }
0x1a33   :  { %2460 = vmatpush.msra.mxu0 %v4388_v11 }
0x1a35   :  { %2461 = vmatpush.msra.mxu0 %v4392_v12 }
0x1a37   :  { %2462 = vmatpush.msra.mxu0 %v4397_v13 }
0x1a38   :  { %1409 = vmatmul.f32.gmra.mxu0 %v3936_v33 }
0x1a39   :  { %2463 = vmatpush.msra.mxu0 %v4402_v14 }
0x1a3b   :  { %2464 = vmatpush.msra.mxu0 %v4420_v42 }
0x1a3d   :  { %2465 = vmatpush.msra.mxu0 %v4422_v8 }
0x1a3f   :  { %2466 = vmatpush.msra.mxu0 %v4426_v9 }
0x1a41   :  { %2467 = vmatpush.msra.mxu0 %v4430_v29 }
0x1a43   :  { %2468 = vmatpush.msra.mxu0 %v4436_v37 }
0x1a45   :  { %2469 = vmatpush.msra.mxu0 %v4440_v6 }
0x1a47   :  { %2470 = vmatpush.msra.mxu0 %v4443_v45 }
0x1aa5   :  { %v1404_v10 = vpop.f32.mrf.mxu0 }
0x1aa6   :  { %v1405_v3 = vadd.f32 %v4271_v56, %v1404_v10 }
0x1aa8   :  { %1476 = vrot.lane.b32.xlu1 %v1405_v3, %s3932_s2  ;;  %v1413_v22 = vadd.f32 %v1405_v3, %v4521_v21 }
0x1aaa   :  { %v3470_v23 = vmul.f32 -1.442695, %v1413_v22 }
0x1aac   :  { %3652 = vpow2.f32 %v3470_v23 }
0x1aad   :  { %v1407_v17 = vpop.f32.mrf.mxu0 }
0x1aae   :  { %v1408_v18 = vadd.f32 %v4271_v56, %v1407_v17 }
0x1ab0   :  { %1524 = vrot.lane.b32.xlu1 %v1380_v62, %s3934_s7  ;;  %v1414_v24 = vadd.f32 %v1408_v18, %v4521_v21 }
0x1ab2   :  { %v3653_v31 = vpop.eup %3652  ;;  %v3471_v25 = vmul.f32 -1.442695, %v1414_v24 }
0x1ab3   :  { %v1425_v26 = vadd.f32 1.0, %v3653_v31 }
0x1ab5   :  { %3654 = vrcp.f32 %v1425_v26  ;;  %v1439_v46 = vand.u32 2147483648, %v1425_v26  ;;  %vm1433_vm15 = vweird.f32 %v1425_v26  ;;  %v1437_v58 = vand.u32 2147483647, %v1425_v26 }
0x1ab6   :  { %3656 = vpow2.f32 %v3471_v25 }
0x1ab7   :  { %v1440_v60 = vor.u32 1.1754944e-38, %v1439_v46  ;;  %vm1438_vm3 = vcmp.eq.f32.partialorder %v1437_v58, 8.507059e+37 }
0x1ab8   :  { %1478 = vrot.lane.b32.xlu1 %v1408_v18, %s3932_s2 }
0x1abb   :  { %v3655_v34 = vpop.eup %3654 }
0x1abc   :  { %v3657_v27 = vpop.eup %3656  ;;  %v1429_v47 = vmul.f32 %v3655_v34, %v1425_v26  ;;  %vm1434_vm14 = vweird.f32 %v3655_v34 }
0x1abd   :  { %v1426_v48 = vadd.f32 1.0, %v3657_v27  ;;  %vm1435_vm2 = vmor %vm1433_vm15, %vm1434_vm14 }
0x1abe   :  { %v1430_v49 = vsub.f32 1.0, %v1429_v47 }
0x1abf   :  { %3658 = vrcp.f32 %v1426_v48  ;;  %v1454_v20 = vand.u32 2147483648, %v1426_v48  ;;  %vm1448_vm5 = vweird.f32 %v1426_v48  ;;  %v1452_v22 = vand.u32 2147483647, %v1426_v48 }
0x1ac0   :  { %v1431_v51 = vmul.f32 %v3655_v34, %v1430_v49 }
0x1ac1   :  { %v1455_v31 = vor.u32 1.1754944e-38, %v1454_v20  ;;  %vm1453_vm9 = vcmp.eq.f32.partialorder %v1452_v22, 8.507059e+37 }
0x1ac2   :  { %v1432_v50 = vadd.f32 %v3655_v34, %v1431_v51 }
0x1ac4   :  { %v1436_v59 = vsel %vm1435_vm2, %v3655_v34, %v1432_v50 }
0x1ac5   :  { %v3659_v53 = vpop.eup %3658  ;;  %v1441_v39 = vsel %vm1438_vm3, %v1440_v60, %v1436_v59 }
0x1ac6   :  { %v1444_v38 = vmul.f32 %v3659_v53, %v1426_v48  ;;  %vm1449_vm4 = vweird.f32 %v3659_v53  ;;  %v1506_v50 = vsub.f32 1.0, %v1441_v39 }
0x1ac7   :  { %vm1450_vm7 = vmor %vm1448_vm5, %vm1449_vm4 }
0x1ac8   :  { %v1445_v10 = vsub.f32 1.0, %v1444_v38  ;;  %v1410_v38 = vpop.f32.mrf.mxu0 }
0x1ac9   :  { %v1411_v60 = vadd.f32 %v4271_v56, %v1410_v38 }
0x1aca   :  { %v1446_v3 = vmul.f32 %v3659_v53, %v1445_v10 }
0x1acc   :  { %v1447_v18 = vadd.f32 %v3659_v53, %v1446_v3 }
0x1ace   :  { %v1451_v23 = vsel %vm1450_vm7, %v3659_v53, %v1447_v18 }
0x1acf   :  { %v4526_v24 = vsel %vm1453_vm9, %v1455_v31, %v1451_v23 }
0x1b1a   :  { %v1477_v44 = vpop.permute.xlu1 %1476 }
0x1b1b   :  { %v1485_v62 = vmul.f32 %v1477_v44, %v1441_v39  ;;  %v1415_v44 = vadd.f32 %v1411_v60, %v4521_v21 }
0x1b1d   :  { %1491 = vrot.lane.b32.xlu2 %v1485_v62, %s3932_s2  ;;  %v3472_v62 = vmul.f32 -1.442695, %v1415_v44 }
0x1b22   :  { %v1525_v17 = vpop.permute.xlu1 %1524 }
0x1b23   :  { %v1530_v46 = vmul.f32 %v1525_v17, %v1441_v39 }
0x1b2a   :  { %v1479_v26 = vpop.permute.xlu1 %1478 }
0x1b2b   :  { %v1486_v25 = vmul.f32 %v1479_v26, %v4526_v24 }
0x1b2d   :  { %1493 = vrot.lane.b32.xlu1 %v1486_v25, %s3932_s2 }
0x1b77   :  { %v1492_v34 = vpop.permute.xlu2 %1491 }
0x1b78   :  { %v1500_v27 = vadd.f32 %v1492_v34, %v4521_v21 }
0x1b7a   :  { %3660 = vtanh.f32 %v1500_v27 }
0x1b80   :  { %v3661_v47 = vpop.eup %3660 }
0x1b81   :  { %1512 = vrot.lane.b32.xlu0 %v3661_v47, %s3933_s21 }
0x1b9f   :  { %v1494_v49 = vpop.permute.xlu1 %1493 }
0x1ba0   :  { %v1501_v48 = vadd.f32 %v1494_v49, %v4521_v21 }
0x1ba2   :  { %3662 = vtanh.f32 %v1501_v48  ;;  %v4554_v48 = vpop.f32.mrf.mxu2 }
0x1ba3   :  { %3664 = vpow2.f32 %v3472_v62 }
0x1ba8   :  { %v3663_v51 = vpop.eup %3662 }
0x1ba9   :  { %1514 = vrot.lane.b32.xlu1 %v3663_v51, %s3933_s21  ;;  %v3665_v10 = vpop.eup %3664 }
0x1baa   :  { %v1427_v3 = vadd.f32 1.0, %v3665_v10 }
0x1bac   :  { %3666 = vrcp.f32 %v1427_v3  ;;  %vm1463_vm0 = vweird.f32 %v1427_v3  ;;  %v1469_v23 = vand.u32 2147483648, %v1427_v3  ;;  %v1467_v26 = vand.u32 2147483647, %v1427_v3 }
0x1bae   :  { %v1470_v25 = vor.u32 1.1754944e-38, %v1469_v23  ;;  %vm1468_vm11 = vcmp.eq.f32.partialorder %v1467_v26, 8.507059e+37  ;;  %v1712_v26 = vld [vmem:[%s5407_s1 + $0xa0] sm:$0xff] }
0x1bb2   :  { %v3667_v18 = vpop.eup %3666 }
0x1bb3   :  { %v1459_v20 = vmul.f32 %v3667_v18, %v1427_v3  ;;  %vm1464_vm1 = vweird.f32 %v3667_v18 }
0x1bb4   :  { %vm1465_vm10 = vmor %vm1463_vm0, %vm1464_vm1 }
0x1bb5   :  { %v1460_v22 = vsub.f32 1.0, %v1459_v20 }
0x1bb7   :  { %v1461_v39 = vmul.f32 %v3667_v18, %v1460_v22 }
0x1bb9   :  { %v1462_v31 = vadd.f32 %v3667_v18, %v1461_v39 }
0x1bbb   :  { %v1466_v34 = vsel %vm1465_vm10, %v3667_v18, %v1462_v31  ;;  %v1711_v31 = vld [vmem:[%s5407_s1 + $0x98] sm:$0xff] }
0x1bbc   :  { %v4547_v27 = vsel %vm1468_vm11, %v1470_v25, %v1466_v34  ;;  %v1710_v25 = vld [vmem:[%s5407_s1 + $0x90] sm:$0xff] }
0x1bf3   :  { %v1513_v53 = vpop.permute.xlu0 %1512 }
0x1bf4   :  { %v1521_v58 = vmul.f32 %v1513_v53, %v1506_v50  ;;  %v3865_v50 = vld [vmem:[#allocation7 + $0xa0] sm:$0xff] }
0x1bf6   :  { %v1533_v59 = vadd.f32 %v1530_v46, %v1521_v58 }
0x1bf8   :  { %1637 = vrot.lane.b32.xlu2 %v1533_v59, %s3933_s21 }
0x1c00   :  { %1480 = vrot.lane.b32.xlu2 %v1411_v60, %s3932_s2 }
0x1c52   :  { %v4538_v17 = vpop.permute.xlu2 %1637 }
0x1c53   :  { %1640 = vst.msk [vmem:[#allocation3 + $0x10] sm:$0xff] %vm222_vm6, %v4538_v17  ;;  %3475 = vmatmul.msk.f32.vlgmr.msra.gmra.mxu2 %vm222_vm6, %v4538_v17 }
0x1c54   :  { %2430 = vmatpush.msra.mxu2 %v4340_v63 }
0x1c56   :  { %2431 = vmatpush.msra.mxu2 %v4342_v57 }
0x1c58   :  { %2432 = vmatpush.msra.mxu2 %v4346_v55 }
0x1c5a   :  { %v1481_v47 = vpop.permute.xlu2 %1480  ;;  %2433 = vmatpush.msra.mxu2 %v4350_v54 }
0x1c5b   :  { %v1487_v49 = vmul.f32 %v1481_v47, %v4547_v27  ;;  %v1717_v47 = vmul.f32 %v1711_v31, %v4488_v36 }
0x1c5d   :  { %1495 = vrot.lane.b32.xlu2 %v1487_v49, %s3932_s2 }
0x1c65   :  { %1526 = vrot.lane.b32.xlu2 %v4492_v61, %s3934_s7 }
0x1cd6   :  { %v1660_v51 = vpop.f32.mrf.mxu2 }
0x1cd7   :  { %v1661_v53 = vadd.f32 %v3865_v50, %v1660_v51  ;;  %v1716_v51 = vmul.f32 %v1710_v25, %v4310_v30  ;;  %v4624_v25 = vld [vmem:[#allocation7 + $0x68] ss:$0 sm:$0xff] }
0x1cd9   :  { %1684 = vrot.lane.b32.xlu0 %v1661_v53, %s3933_s21  ;;  %v1663_v46 = vadd.f32 %v4303_v19, %v1661_v53 }
0x1cdb   :  { %v3476_v58 = vmul.f32 -1.442695, %v1663_v46 }
0x1cdd   :  { %3668 = vpow2.f32 %v3476_v58 }
0x1ce3   :  { %v3669_v59 = vpop.eup %3668 }
0x1ce4   :  { %v1667_v38 = vadd.f32 1.0, %v3669_v59 }
0x1ce6   :  { %3670 = vrcp.f32 %v1667_v38  ;;  %v1679_v61 = vand.u32 2147483648, %v1667_v38  ;;  %vm1673_vm13 = vweird.f32 %v1667_v38  ;;  %v1677_v18 = vand.u32 2147483647, %v1667_v38 }
0x1ce8   :  { %v1680_v22 = vor.u32 1.1754944e-38, %v1679_v61  ;;  %vm1678_vm15 = vcmp.eq.f32.partialorder %v1677_v18, 8.507059e+37 }
0x1cec   :  { %v3671_v60 = vpop.eup %3670 }
0x1ced   :  { %v1669_v44 = vmul.f32 %v3671_v60, %v1667_v38  ;;  %vm1674_vm12 = vweird.f32 %v3671_v60 }
0x1cee   :  { %vm1675_vm14 = vmor %vm1673_vm13, %vm1674_vm12 }
0x1cef   :  { %v1670_v62 = vsub.f32 1.0, %v1669_v44  ;;  %v1515_v44 = vpop.permute.xlu1 %1514 }
0x1cf1   :  { %v1671_v10 = vmul.f32 %v3671_v60, %v1670_v62  ;;  %v1507_v62 = vsub.f32 1.0, %v4526_v24 }
0x1cf3   :  { %v1672_v3 = vadd.f32 %v3671_v60, %v1671_v10 }
0x1cf5   :  { %v1676_v20 = vsel %vm1675_vm14, %v3671_v60, %v1672_v3  ;;  %v1522_v3 = vmul.f32 %v1515_v44, %v1507_v62  ;;  %v4641_v44 = vld [vmem:[#allocation7 + $0x1c8] sm:$0xff]  ;;  %v4645_v62 = vld [vmem:[#allocation7 + $0x1c0] sm:$0xff] }
0x1cf6   :  { %v1681_v19 = vsel %vm1678_vm15, %v1680_v22, %v1676_v20 }
0x1d4b   :  { %v1685_v39 = vpop.permute.xlu0 %1684 }
0x1d4c   :  { %v1687_v23 = vmul.f32 %v1685_v39, %v1681_v19  ;;  %v1508_v39 = vsub.f32 1.0, %v4547_v27 }
0x1d4e   :  { %1688 = vst.msk [vmem:[#allocation5 + $0x10] sm:$0xff] %vm222_vm6, %v1687_v23  ;;  %v1532_v23 = vmul.f32 %v4547_v27, %v4335_v52 }
0x1d55   :  { %v4568_v34 = vld [vmem:[#allocation5 + $0x10] sm:$0xff] }
0x1d56   :  { %v4572_v49 = vmul.f32 %v4568_v34, %v1712_v26 }
0x1d58   :  { %v4576_v50 = vadd.f32 %v4572_v49, %v1717_v47 }
0x1d5a   :  { %v1721_v53 = vadd.f32 %v4576_v50, %v1716_v51 }
0x1d5c   :  { %3478 = vmatmul.msk.f32.vlgmr.msrb.gmra.mxu0 %vm222_vm6, %v1721_v53  ;;  %1908 = vrot.lane.b32.xlu2 %v1721_v53, %s3934_s7 }
0x1d5d   :  { %3015 = vmatpush.msrb.mxu0 %v4368_v2 }
0x1d5f   :  { %3016 = vmatpush.msrb.mxu0 %v4370_v5  ;;  %v956_v5 = vpop.f32.mrf.mxu1 }
0x1d61   :  { %3017 = vmatpush.msrb.mxu0 %v4374_v40  ;;  %v4605_v40 = vadd.f32 %v4324_v32, %v956_v5 }
0x1d63   :  { %3018 = vmatpush.msrb.mxu0 %v4378_v7 }
0x1d64   :  { %3479 = vmatmul.msk.f32.gmra.mxu0 %vm222_vm6, %v4576_v50 }
0x1d65   :  { %3019 = vmatpush.msrb.mxu0 %v4382_v41 }
0x1d67   :  { %3020 = vmatpush.msrb.mxu0 %v4388_v11 }
0x1d69   :  { %3021 = vmatpush.msrb.mxu0 %v4392_v12 }
0x1d6b   :  { %3022 = vmatpush.msrb.mxu0 %v4397_v13 }
0x1d6c   :  { %3480 = vmatmul.msk.f32.gmra.mxu0 %vm222_vm6, %v4572_v49 }
0x1d6d   :  { %3023 = vmatpush.msrb.mxu0 %v4402_v14 }
0x1d6f   :  { %3024 = vmatpush.msrb.mxu0 %v4420_v42 }
0x1d71   :  { %3025 = vmatpush.msrb.mxu0 %v4422_v8 }
0x1d73   :  { %3026 = vmatpush.msrb.mxu0 %v4426_v9 }
0x1d74   :  { %1756 = vmatmul.f32.gmra.mxu0 %v3936_v33 }
0x1d75   :  { %3027 = vmatpush.msrb.mxu0 %v4430_v29 }
0x1d77   :  { %3028 = vmatpush.msrb.mxu0 %v4436_v37  ;;  %v1496_v37 = vpop.permute.xlu2 %1495 }
0x1d79   :  { %3029 = vmatpush.msrb.mxu0 %v4440_v6 }
0x1d7b   :  { %3030 = vmatpush.msrb.mxu0 %v4443_v45  ;;  %v1502_v45 = vadd.f32 %v1496_v37, %v4521_v21 }
0x1d7f   :  { %v1527_v60 = vpop.permute.xlu2 %1526 }
0x1d80   :  { %v1531_v10 = vmul.f32 %v1527_v60, %v4526_v24 }
0x1d82   :  { %v1534_v61 = vadd.f32 %v1531_v10, %v1522_v3  ;;  %v4648_v10 = vld [vmem:[#allocation7 + $0x1b8] sm:$0xff] }
0x1dd9   :  { %v1748_v30 = vpop.f32.mrf.mxu0 }
0x1dda   :  { %v1749_v2 = vadd.f32 %v4271_v56, %v1748_v30 }
0x1ddc   :  { %1844 = vrot.lane.b32.xlu0 %v1749_v2, %s3932_s2  ;;  %v1760_v7 = vadd.f32 %v1749_v2, %v4605_v40 }
0x1dde   :  { %v3481_v41 = vmul.f32 -1.442695, %v1760_v7 }
0x1de0   :  { %3672 = vpow2.f32 %v3481_v41  ;;  %v1909_v41 = vpop.permute.xlu2 %1908 }
0x1de1   :  { %v1751_v26 = vpop.f32.mrf.mxu0 }
0x1de2   :  { %v1752_v47 = vadd.f32 %v4624_v25, %v1751_v26 }
0x1de4   :  { %v1761_v27 = vadd.f32 %v1752_v47, %v4605_v40 }
0x1de6   :  { %v3673_v11 = vpop.eup %3672  ;;  %v3482_v51 = vmul.f32 -1.442695, %v1761_v27 }
0x1de7   :  { %v1776_v12 = vadd.f32 1.0, %v3673_v11 }
0x1de9   :  { %3674 = vrcp.f32 %v1776_v12  ;;  %v1791_v56 = vand.u32 2147483648, %v1776_v12  ;;  %vm1785_vm3 = vweird.f32 %v1776_v12  ;;  %v1789_v29 = vand.u32 2147483647, %v1776_v12 }
0x1dea   :  { %3676 = vtanh.f32 %v1502_v45 }
0x1deb   :  { %v1792_v6 = vor.u32 1.1754944e-38, %v1791_v56  ;;  %vm1790_vm5 = vcmp.eq.f32.partialorder %v1789_v29, 8.507059e+37 }
0x1def   :  { %v3675_v13 = vpop.eup %3674 }
0x1df0   :  { %v1781_v14 = vmul.f32 %v3675_v13, %v1776_v12  ;;  %vm1786_vm2 = vweird.f32 %v3675_v13  ;;  %v3677_v38 = vpop.eup %3676 }
0x1df1   :  { %vm1787_vm4 = vmor %vm1785_vm3, %vm1786_vm2 }
0x1df2   :  { %v1782_v42 = vsub.f32 1.0, %v1781_v14 }
0x1df4   :  { %v1783_v8 = vmul.f32 %v3675_v13, %v1782_v42 }
0x1df6   :  { %v1784_v9 = vadd.f32 %v3675_v13, %v1783_v8 }
0x1df8   :  { %v1788_v32 = vsel %vm1787_vm4, %v3675_v13, %v1784_v9  ;;  %v1754_v9 = vpop.f32.mrf.mxu0 }
0x1df9   :  { %v1793_v58 = vsel %vm1790_vm5, %v1792_v6, %v1788_v32  ;;  %v1755_v32 = vadd.f32 %v4624_v25, %v1754_v9  ;;  %v4699_v9 = vld [vmem:[#allocation7 + $0xc0] ss:$0 sm:$0xff] }
0x1dfa   :  { %v1884_v7 = vsub.f32 1.0, %v1793_v58  ;;  %v1917_v13 = vmul.f32 %v1909_v41, %v1793_v58 }
0x1e4e   :  { %v1845_v46 = vpop.permute.xlu0 %1844 }
0x1e4f   :  { %v1856_v59 = vmul.f32 %v1845_v46, %v1793_v58  ;;  %v4634_v58 = vpop.f32.mrf.mxu3 }
0x1e51   :  { %1864 = vrot.lane.b32.xlu0 %v1856_v59, %s3932_s2 }
0x1e59   :  { %1516 = vrot.lane.b32.xlu0 %v3677_v38, %s3933_s21 }
0x1e61   :  { %1540 = vrot.lane.b32.xlu0 %v1534_v61, %s3933_s21  ;;  %v4651_v61 = vld [vmem:[#allocation7 + $0x1b0] sm:$0xff] }
0x1ec3   :  { %v1865_v21 = vpop.permute.xlu0 %1864 }
0x1ec4   :  { %v1876_v18 = vadd.f32 %v1865_v21, %v4605_v40 }
0x1ec6   :  { %3678 = vtanh.f32 %v1876_v18  ;;  %v1762_v18 = vadd.f32 %v1755_v32, %v4605_v40 }
0x1ec7   :  { %3680 = vpow2.f32 %v3482_v51 }
0x1ecb   :  { %v1517_v20 = vpop.permute.xlu0 %1516 }
0x1ecc   :  { %v3679_v22 = vpop.eup %3678  ;;  %v1523_v19 = vmul.f32 %v1517_v20, %v1508_v39  ;;  %v3483_v20 = vmul.f32 -1.442695, %v1762_v18 }
0x1ecd   :  { %1892 = vrot.lane.b32.xlu1 %v3679_v22, %s3933_s21  ;;  %v3681_v53 = vpop.eup %3680 }
0x1ece   :  { %v1535_v31 = vadd.f32 %v1532_v23, %v1523_v19  ;;  %v1777_v30 = vadd.f32 1.0, %v3681_v53  ;;  %v4668_v53 = vld [vmem:[#allocation7 + $0x48] sm:$0xff] }
0x1ed0   :  { %3682 = vrcp.f32 %v1777_v30  ;;  %v1806_v37 = vand.u32 2147483648, %v1777_v30  ;;  %vm1800_vm9 = vweird.f32 %v1777_v30  ;;  %v1804_v6 = vand.u32 2147483647, %v1777_v30 }
0x1ed1   :  { %3684 = vpow2.f32 %v3483_v20 }
0x1ed2   :  { %v1807_v46 = vor.u32 1.1754944e-38, %v1806_v37  ;;  %vm1805_vm1 = vcmp.eq.f32.partialorder %v1804_v6, 8.507059e+37 }
0x1ed3   :  { %v1541_v24 = vpop.permute.xlu0 %1540 }
0x1ed4   :  { %3473 = vmatmul.msk.f32.vlgmr.msrb.gmra.mxu3 %vm222_vm6, %v1541_v24 }
0x1ed5   :  { %1542 = vrot.lane.b32.xlu1 %v1535_v31, %s3933_s21  ;;  %2072 = vmatpush.msrb.mxu3 %v4356_v43 }
0x1ed6   :  { %v3683_v2 = vpop.eup %3682 }
0x1ed7   :  { %2073 = vmatpush.msrb.mxu3 %v4359_v0  ;;  %v1796_v5 = vmul.f32 %v3683_v2, %v1777_v30  ;;  %vm1801_vm7 = vweird.f32 %v3683_v2  ;;  %v3685_v22 = vpop.eup %3684 }
0x1ed8   :  { %vm1802_vm0 = vmor %vm1800_vm9, %vm1801_vm7  ;;  %v1778_v39 = vadd.f32 1.0, %v3685_v22 }
0x1ed9   :  { %2074 = vmatpush.msrb.mxu3 %v4362_v1  ;;  %v1797_v14 = vsub.f32 1.0, %v1796_v5  ;;  %v4673_v5 = vld [vmem:[#allocation7 + $0x40] sm:$0xff] }
0x1eda   :  { %3686 = vrcp.f32 %v1778_v39  ;;  %vm1815_vm11 = vweird.f32 %v1778_v39 }
0x1edb   :  { %2075 = vmatpush.msrb.mxu3 %v4365_v4  ;;  %v1798_v8 = vmul.f32 %v3683_v2, %v1797_v14 }
0x1edd   :  { %1846 = vrot.lane.b32.xlu1 %v1752_v47, %s3932_s2  ;;  %v1799_v29 = vadd.f32 %v3683_v2, %v1798_v8  ;;  %v4665_v47 = vld [vmem:[#allocation7 + $0x50] sm:$0xff] }
0x1edf   :  { %v1803_v45 = vsel %vm1802_vm0, %v3683_v2, %v1799_v29 }
0x1ee0   :  { %v4636_v59 = vsel %vm1805_vm1, %v1807_v46, %v1803_v45  ;;  %v3687_v19 = vpop.eup %3686 }
0x1ee1   :  { %v1811_v23 = vmul.f32 %v3687_v19, %v1778_v39  ;;  %vm1816_vm10 = vweird.f32 %v3687_v19 }
0x1ee2   :  { %vm1817_vm12 = vmor %vm1815_vm11, %vm1816_vm10 }
0x1ee3   :  { %v1812_v31 = vsub.f32 1.0, %v1811_v23 }
0x1ee5   :  { %v1813_v24 = vmul.f32 %v3687_v19, %v1812_v31 }
0x1f3f   :  { %v1893_v11 = vpop.permute.xlu1 %1892 }
0x1f40   :  { %v1904_v12 = vmul.f32 %v1893_v11, %v1884_v7 }
0x1f42   :  { %v1921_v42 = vadd.f32 %v1917_v13, %v1904_v12  ;;  %v4688_v12 = vadd.f32 %v4463_v15, %v4634_v58  ;;  %v1757_v15 = vpop.f32.mrf.mxu0 }
0x1f43   :  { %v1758_v8 = vadd.f32 %v4624_v25, %v1757_v15 }
0x1f44   :  { %2054 = vrot.lane.b32.xlu2 %v1921_v42, %s3933_s21 }
0x1f45   :  { %v1763_v37 = vadd.f32 %v1758_v8, %v4605_v40 }
0x1f47   :  { %v1543_v56 = vpop.permute.xlu1 %1542 }
0x1f48   :  { %3474 = vmatmul.msk.f32.gmra.mxu3 %vm222_vm6, %v1543_v56 }
0x1f4c   :  { %1848 = vrot.lane.b32.xlu2 %v1755_v32, %s3932_s2 }
0x1f4f   :  { %v1847_v38 = vpop.permute.xlu1 %1846 }
0x1f50   :  { %v1857_v60 = vmul.f32 %v1847_v38, %v4636_v59  ;;  %3477 = vmatmul.msk.f32.vlgmr.msra.gmra.mxu3 %vm222_vm6, %v4538_v17 }
0x1f51   :  { %2118 = vmatpush.msra.mxu3 %v4641_v44 }
0x1f52   :  { %1866 = vrot.lane.b32.xlu1 %v1857_v60, %s3932_s2 }
0x1f53   :  { %2119 = vmatpush.msra.mxu3 %v4645_v62 }
0x1f55   :  { %2120 = vmatpush.msra.mxu3 %v4648_v10 }
0x1f57   :  { %v1565_v3 = vpop.f32.mrf.mxu3  ;;  %2121 = vmatpush.msra.mxu3 %v4651_v61 }
0x1f58   :  { %v1571_v17 = vadd.f32 %v1565_v3, %v4469_v16 }
0x1f5a   :  { %v1573_v21 = vmax.f32 %v1571_v17, 0.0 }
0x1f5c   :  { %1591 = vmatmul.f32.vlgmr.msrb.gmra.mxu1 %v1573_v21 }
0x1f5d   :  { %2569 = vmatpush.msrb.mxu1 %v4356_v43  ;;  %v1814_v43 = vadd.f32 %v3687_v19, %v1813_v24 }
0x1f5f   :  { %2570 = vmatpush.msrb.mxu1 %v4359_v0  ;;  %v1821_v0 = vand.u32 2147483648, %v1778_v39  ;;  %v1818_v27 = vsel %vm1817_vm12, %v3687_v19, %v1814_v43 }
0x1f61   :  { %2571 = vmatpush.msrb.mxu1 %v4362_v1  ;;  %v4662_v1 = vld [vmem:[#allocation7 + $0x58] sm:$0xff]  ;;  %v1822_v51 = vor.u32 1.1754944e-38, %v1821_v0 }
0x1f63   :  { %2572 = vmatpush.msrb.mxu1 %v4365_v4  ;;  %v1819_v4 = vand.u32 2147483647, %v1778_v39 }
0x1f65   :  { %vm1820_vm13 = vcmp.eq.f32.partialorder %v1819_v4, 8.507059e+37 }
0x1f66   :  { %v4671_v30 = vsel %vm1820_vm13, %v1822_v51, %v1818_v27 }
0x1f9e   :  { %v2055_v26 = vpop.permute.xlu2 %2054 }
0x1f9f   :  { %2057 = vst.msk [vmem:[#allocation3 + $0x18] sm:$0xff] %vm222_vm6, %v2055_v26  ;;  %3488 = vmatmul.msk.f32.vlgmr.msrb.gmra.mxu3 %vm222_vm6, %v2055_v26 }
0x1fa0   :  { %2167 = vmatpush.msrb.mxu3 %v4662_v1 }
0x1fa2   :  { %2168 = vmatpush.msrb.mxu3 %v4665_v47 }
0x1fa4   :  { %2169 = vmatpush.msrb.mxu3 %v4668_v53 }
0x1fa6   :  { %v1849_v2 = vpop.permute.xlu2 %1848  ;;  %2170 = vmatpush.msrb.mxu3 %v4673_v5 }
0x1fa7   :  { %v1858_v7 = vmul.f32 %v1849_v2, %v4671_v30  ;;  %3490 = vmatmul.msk.f32.vlgmr.msra.gmra.mxu3 %vm222_vm6, %v2055_v26 }
0x1fa8   :  { %2985 = vmatpush.msra.mxu3 %v4340_v63 }
0x1fa9   :  { %1868 = vrot.lane.b32.xlu2 %v1858_v7, %s3932_s2 }
0x1faa   :  { %2986 = vmatpush.msra.mxu3 %v4342_v57 }
0x1fac   :  { %2987 = vmatpush.msra.mxu3 %v4346_v55 }
0x1fae   :  { %2988 = vmatpush.msra.mxu3 %v4350_v54 }
0x1fb1   :  { %1910 = vrot.lane.b32.xlu2 %v4576_v50, %s3934_s7  ;;  %v3875_v50 = vld [vmem:[#allocation7 + $0xa8] sm:$0xff] }
0x1fc4   :  { %v1867_v41 = vpop.permute.xlu1 %1866 }
0x1fc5   :  { %v1877_v11 = vadd.f32 %v1867_v41, %v4605_v40 }
0x1fc7   :  { %3688 = vtanh.f32 %v1877_v11 }
0x1fcb   :  { %v1568_v63 = vpop.f32.mrf.mxu3 }
0x1fcc   :  { %v1572_v13 = vadd.f32 %v1568_v63, %v4688_v12 }
0x1fcd   :  { %v3689_v14 = vpop.eup %3688 }
0x1fce   :  { %v1574_v57 = vmax.f32 %v1572_v13, 0.0  ;;  %1894 = vrot.lane.b32.xlu1 %v3689_v14, %s3933_s21  ;;  %v2129_v13 = vld [vmem:[%s5407_s1 + $0xd0] sm:$0xff]  ;;  %v2130_v14 = vld [vmem:[%s5407_s1 + $0xd8] sm:$0xff] }
0x1fd0   :  { %1594 = vmatmul.f32.gmra.mxu1 %v1574_v57 }
0x1fd3   :  { %v4694_v55 = vpop.f32.mrf.mxu3 }
0x1fd6   :  { %1912 = vrot.lane.b32.xlu1 %v4572_v49, %s3934_s7  ;;  %v3484_v49 = vmul.f32 -1.442695, %v1763_v37 }
0x2003   :  { %v1869_v2 = vpop.permute.xlu2 %1868 }
0x2004   :  { %v1878_v41 = vadd.f32 %v1869_v2, %v4605_v40 }
0x2022   :  { %v2077_v54 = vpop.f32.mrf.mxu3 }
0x2023   :  { %v2078_v42 = vadd.f32 %v3875_v50, %v2077_v54  ;;  %v2128_v54 = vld [vmem:[%s5407_s1 + $0xc8] sm:$0xff] }
0x2025   :  { %2101 = vrot.lane.b32.xlu0 %v2078_v42, %s3933_s21  ;;  %v2080_v56 = vadd.f32 %v4699_v9, %v2078_v42  ;;  %v2137_v42 = vmul.f32 %v2129_v13, %v4568_v34 }
0x2027   :  { %v3489_v29 = vmul.f32 -1.442695, %v2080_v56  ;;  %v4727_v56 = vld [vmem:[#allocation5] sm:$0xff] }
0x2029   :  { %3690 = vpow2.f32 %v3489_v29  ;;  %v2136_v29 = vmul.f32 %v2128_v54, %v4488_v36 }
0x202a   :  { %3692 = vpow2.f32 %v3484_v49 }
0x202d   :  { %1850 = vrot.lane.b32.xlu0 %v1758_v8, %s3932_s2  ;;  %v2127_v8 = vld [vmem:[%s5407_s1 + $0xc0] sm:$0xff] }
0x202e   :  { %v2135_v49 = vmul.f32 %v4727_v56, %v2127_v8 }
0x202f   :  { %v3691_v32 = vpop.eup %3690 }
0x2030   :  { %v2084_v6 = vadd.f32 1.0, %v3691_v32  ;;  %v3693_v45 = vpop.eup %3692 }
0x2031   :  { %v1779_v46 = vadd.f32 1.0, %v3693_v45 }
0x2032   :  { %3694 = vrcp.f32 %v2084_v6  ;;  %v2096_v22 = vand.u32 2147483648, %v2084_v6  ;;  %vm2090_vm15 = vweird.f32 %v2084_v6  ;;  %v2094_v39 = vand.u32 2147483647, %v2084_v6 }
0x2033   :  { %3696 = vrcp.f32 %v1779_v46  ;;  %vm1830_vm4 = vweird.f32 %v1779_v46  ;;  %v1836_v43 = vand.u32 2147483648, %v1779_v46  ;;  %v1834_v27 = vand.u32 2147483647, %v1779_v46 }
0x2034   :  { %v2097_v31 = vor.u32 1.1754944e-38, %v2096_v22  ;;  %vm2095_vm3 = vcmp.eq.f32.partialorder %v2094_v39, 8.507059e+37  ;;  %3698 = vtanh.f32 %v1878_v41 }
0x2035   :  { %v1837_v51 = vor.u32 1.1754944e-38, %v1836_v43  ;;  %vm1835_vm9 = vcmp.eq.f32.partialorder %v1834_v27, 8.507059e+37 }
0x2038   :  { %v3695_v58 = vpop.eup %3694 }
0x2039   :  { %v2086_v38 = vmul.f32 %v3695_v58, %v2084_v6  ;;  %v3697_v3 = vpop.eup %3696  ;;  %vm2091_vm14 = vweird.f32 %v3695_v58 }
0x203a   :  { %v1826_v21 = vmul.f32 %v3697_v3, %v1779_v46  ;;  %vm2092_vm2 = vmor %vm2090_vm15, %vm2091_vm14  ;;  %vm1831_vm5 = vweird.f32 %v3697_v3  ;;  %v3699_v6 = vpop.eup %3698  ;;  %v1885_v46 = vsub.f32 1.0, %v4636_v59 }
0x203b   :  { %v2087_v60 = vsub.f32 1.0, %v2086_v38  ;;  %vm1832_vm7 = vmor %vm1830_vm4, %vm1831_vm5 }
0x203c   :  { %v1827_v20 = vsub.f32 1.0, %v1826_v21 }
0x203d   :  { %v2088_v17 = vmul.f32 %v3695_v58, %v2087_v60 }
0x203e   :  { %v1828_v23 = vmul.f32 %v3697_v3, %v1827_v20 }
0x203f   :  { %v2089_v18 = vadd.f32 %v3695_v58, %v2088_v17 }
0x2040   :  { %v1829_v4 = vadd.f32 %v3697_v3, %v1828_v23  ;;  %v1895_v45 = vpop.permute.xlu1 %1894 }
0x2041   :  { %v2093_v19 = vsel %vm2092_vm2, %v3695_v58, %v2089_v18  ;;  %v1911_v58 = vpop.permute.xlu2 %1910  ;;  %v1905_v36 = vmul.f32 %v1895_v45, %v1885_v46 }
0x2042   :  { %v2098_v26 = vsel %vm2095_vm3, %v2097_v31, %v2093_v19  ;;  %v1833_v7 = vsel %vm1832_vm7, %v3697_v3, %v1829_v4  ;;  %v1918_v38 = vmul.f32 %v1911_v58, %v4636_v59  ;;  %v1886_v59 = vsub.f32 1.0, %v4671_v30  ;;  %v4755_v31 = vpop.f32.mrf.mxu3 }
0x2043   :  { %v4705_v11 = vsel %vm1835_vm9, %v1837_v51, %v1833_v7 }
0x2044   :  { %v1922_v60 = vadd.f32 %v1918_v38, %v1905_v36  ;;  %v1887_v4 = vsub.f32 1.0, %v4705_v11  ;;  %v1920_v51 = vmul.f32 %v4705_v11, %v4335_v52 }
0x2048   :  { %v1913_v21 = vpop.permute.xlu1 %1912 }
0x2049   :  { %v1919_v22 = vmul.f32 %v1913_v21, %v4671_v30 }
0x2097   :  { %v2102_v24 = vpop.permute.xlu0 %2101 }
0x2098   :  { %v2104_v0 = vmul.f32 %v2102_v24, %v2098_v26 }
0x209a   :  { %2105 = vst.msk [vmem:[#allocation5 + $0x18] sm:$0xff] %vm222_vm6, %v2104_v0 }
0x209f   :  { %v1851_v63 = vpop.permute.xlu0 %1850 }
0x20a0   :  { %v1859_v57 = vmul.f32 %v1851_v63, %v4705_v11 }
0x20a1   :  { %v4717_v50 = vld [vmem:[#allocation5 + $0x18] sm:$0xff] }
0x20a2   :  { %1870 = vrot.lane.b32.xlu0 %v1859_v57, %s3932_s2  ;;  %v4722_v15 = vmul.f32 %v4717_v50, %v2130_v14 }
0x20a4   :  { %v4731_v37 = vadd.f32 %v4722_v15, %v2137_v42 }
0x20a6   :  { %v4735_v32 = vadd.f32 %v4731_v37, %v2136_v29 }
0x20a8   :  { %v2142_v34 = vadd.f32 %v4735_v32, %v2135_v49 }
0x20aa   :  { %3491 = vmatmul.msk.f32.vlgmr.msrb.gmra.mxu3 %vm222_vm6, %v2142_v34  ;;  %1896 = vrot.lane.b32.xlu0 %v3699_v6, %s3933_s21 }
0x20b2   :  { %3492 = vmatmul.msk.f32.gmra.mxu3 %vm222_vm6, %v4735_v32  ;;  %1931 = vrot.lane.b32.xlu0 %v1922_v60, %s3933_s21 }
0x20ba   :  { %3493 = vmatmul.msk.f32.gmra.mxu3 %vm222_vm6, %v4731_v37 }
0x20c2   :  { %3494 = vmatmul.msk.f32.gmra.mxu3 %vm222_vm6, %v4722_v15 }
0x20ca   :  { %2183 = vmatmul.f32.gmra.mxu3 %v3936_v33 }
0x2114   :  { %v1871_v3 = vpop.permute.xlu0 %1870 }
0x2115   :  { %v1879_v17 = vadd.f32 %v1871_v3, %v4605_v40 }
0x2117   :  { %3700 = vtanh.f32 %v1879_v17 }
0x211c   :  { %v1897_v18 = vpop.permute.xlu0 %1896 }
0x211d   :  { %v3701_v20 = vpop.eup %3700  ;;  %v1906_v39 = vmul.f32 %v1897_v18, %v1886_v59 }
0x211e   :  { %1898 = vrot.lane.b32.xlu2 %v3701_v20, %s3933_s21 }
0x211f   :  { %v1923_v19 = vadd.f32 %v1919_v22, %v1906_v39 }
0x2121   :  { %1933 = vrot.lane.b32.xlu1 %v1923_v19, %s3933_s21  ;;  %v4801_v19 = vld [vmem:[#allocation7 + $0x1f0] ss:$0 sm:$0xff] }
0x2124   :  { %v1932_v23 = vpop.permute.xlu0 %1931 }
0x2125   :  { %3485 = vmatmul.msk.f32.vlgmr.msrb.gmra.mxu2 %vm222_vm6, %v1932_v23  ;;  %v4805_v23 = vadd.f32 %v4801_v19, %v4694_v55 }
0x2126   :  { %2671 = vmatpush.msrb.mxu2 %v4662_v1  ;;  %v959_v1 = vpop.f32.mrf.mxu1 }
0x2128   :  { %2672 = vmatpush.msrb.mxu2 %v4665_v47  ;;  %v4770_v47 = vld [vmem:[#allocation7 + $0x60] ss:$0 sm:$0xff] }
0x212a   :  { %2673 = vmatpush.msrb.mxu2 %v4668_v53  ;;  %v4773_v53 = vadd.f32 %v4770_v47, %v959_v1 }
0x212c   :  { %2674 = vmatpush.msrb.mxu2 %v4673_v5 }
0x212d   :  { %v2172_v40 = vpop.f32.mrf.mxu3 }
0x212e   :  { %v2173_v30 = vadd.f32 %v4624_v25, %v2172_v40 }
0x2130   :  { %2292 = vrot.lane.b32.xlu0 %v2173_v30, %s3932_s2  ;;  %v2187_v5 = vadd.f32 %v2173_v30, %v4773_v53 }
0x2132   :  { %v3495_v0 = vmul.f32 -1.442695, %v2187_v5 }
0x2134   :  { %3702 = vpow2.f32 %v3495_v0 }
0x2135   :  { %v2175_v24 = vpop.f32.mrf.mxu3 }
0x2138   :  { %2372 = vrot.lane.b32.xlu0 %v2142_v34, %s3934_s7 }
0x213a   :  { %v3703_v41 = vpop.eup %3702 }
0x213b   :  { %v2207_v63 = vadd.f32 1.0, %v3703_v41 }
0x213d   :  { %v2178_v26 = vpop.f32.mrf.mxu3  ;;  %3704 = vrcp.f32 %v2207_v63  ;;  %v2223_v29 = vand.u32 2147483648, %v2207_v63  ;;  %vm2217_vm1 = vweird.f32 %v2207_v63  ;;  %v2221_v49 = vand.u32 2147483647, %v2207_v63 }
0x213e   :  { %v4766_v43 = vadd.f32 %v4624_v25, %v2178_v26 }
0x213f   :  { %v2224_v34 = vor.u32 1.1754944e-38, %v2223_v29  ;;  %vm2222_vm11 = vcmp.eq.f32.partialorder %v2221_v49, 8.507059e+37 }
0x2140   :  { %2296 = vrot.lane.b32.xlu0 %v4766_v43, %s3932_s2 }
0x2143   :  { %v3705_v13 = vpop.eup %3704 }
0x2144   :  { %v2213_v14 = vmul.f32 %v3705_v13, %v2207_v63  ;;  %vm2218_vm0 = vweird.f32 %v3705_v13 }
0x2145   :  { %vm2219_vm10 = vmor %vm2217_vm1, %vm2218_vm0 }
0x2146   :  { %v2214_v54 = vsub.f32 1.0, %v2213_v14 }
0x2148   :  { %v2215_v42 = vmul.f32 %v3705_v13, %v2214_v54 }
0x214a   :  { %v2216_v8 = vadd.f32 %v3705_v13, %v2215_v42 }
0x214c   :  { %v2220_v11 = vsel %vm2219_vm10, %v3705_v13, %v2216_v8 }
0x214d   :  { %v4781_v6 = vsel %vm2222_vm11, %v2224_v34, %v2220_v11 }
0x214e   :  { %v2342_v29 = vsub.f32 1.0, %v4781_v6 }
0x2178   :  { %v1899_v27 = vpop.permute.xlu2 %1898 }
0x2179   :  { %v1907_v2 = vmul.f32 %v1899_v27, %v1887_v4 }
0x217b   :  { %v1924_v7 = vadd.f32 %v1920_v51, %v1907_v2 }
0x217d   :  { %1935 = vrot.lane.b32.xlu2 %v1924_v7, %s3933_s21 }
0x2193   :  { %v1934_v57 = vpop.permute.xlu1 %1933 }
0x2194   :  { %3486 = vmatmul.msk.f32.gmra.mxu2 %vm222_vm6, %v1934_v57 }
0x21a2   :  { %v2293_v45 = vpop.permute.xlu0 %2292 }
0x21a3   :  { %v2307_v46 = vmul.f32 %v2293_v45, %v4781_v6 }
0x21a5   :  { %2317 = vrot.lane.b32.xlu1 %v2307_v46, %s3932_s2 }
0x21a8   :  { %v1960_v58 = vpop.f32.mrf.mxu2 }
0x21a9   :  { %v1969_v36 = vadd.f32 %v1960_v58, %v4469_v16 }
0x21aa   :  { %v2373_v42 = vpop.permute.xlu0 %2372 }
0x21ab   :  { %v1972_v38 = vmax.f32 %v1969_v36, 0.0  ;;  %v2384_v11 = vmul.f32 %v2373_v42, %v4781_v6 }
0x21ad   :  { %1991 = vmatmul.f32.vlgmr.msra.gmra.mxu1 %v1972_v38 }
0x21ae   :  { %2615 = vmatpush.msra.mxu1 %v4641_v44  ;;  %v4794_v44 = vpop.f32.mrf.mxu3 }
0x21b0   :  { %2616 = vmatpush.msra.mxu1 %v4645_v62  ;;  %v2176_v62 = vadd.f32 %v4624_v25, %v2175_v24  ;;  %v2189_v24 = vadd.f32 %v4766_v43, %v4773_v53 }
0x21b2   :  { %2617 = vmatpush.msra.mxu1 %v4648_v10  ;;  %v2188_v22 = vadd.f32 %v2176_v62, %v4773_v53  ;;  %v3497_v4 = vmul.f32 -1.442695, %v2189_v24 }
0x21b4   :  { %2618 = vmatpush.msra.mxu1 %v4651_v61  ;;  %v3496_v39 = vmul.f32 -1.442695, %v2188_v22 }
0x21b6   :  { %v2184_v10 = vpop.f32.mrf.mxu3 }
0x21b7   :  { %v2185_v61 = vadd.f32 %v4624_v25, %v2184_v10 }
0x21b9   :  { %v2191_v40 = vadd.f32 %v2185_v61, %v4773_v53 }
0x21bb   :  { %v3499_v1 = vmul.f32 -1.442695, %v2191_v40 }
0x21d7   :  { %v1936_v60 = vpop.permute.xlu2 %1935 }
0x21d8   :  { %3487 = vmatmul.msk.f32.gmra.mxu2 %vm222_vm6, %v1936_v60 }
0x2217   :  { %v1963_v3 = vpop.f32.mrf.mxu2  ;;  %v2318_v17 = vpop.permute.xlu1 %2317 }
0x2218   :  { %v1970_v21 = vadd.f32 %v1963_v3, %v4688_v12  ;;  %v2332_v59 = vadd.f32 %v2318_v17, %v4773_v53 }
0x221a   :  { %v1973_v18 = vmax.f32 %v1970_v21, 0.0  ;;  %3706 = vtanh.f32 %v2332_v59 }
0x221b   :  { %3708 = vpow2.f32 %v3496_v39  ;;  %v2182_v39 = vadd.f32 %v4624_v25, %v4794_v44 }
0x221c   :  { %1994 = vmatmul.f32.gmra.mxu1 %v1973_v18  ;;  %3710 = vpow2.f32 %v3499_v1 }
0x221d   :  { %3712 = vpow2.f32 %v3497_v4  ;;  %v2297_v4 = vpop.permute.xlu0 %2296 }
0x2220   :  { %v3707_v20 = vpop.eup %3706 }
0x2221   :  { %2352 = vrot.lane.b32.xlu2 %v3707_v20, %s3933_s21  ;;  %v3709_v0 = vpop.eup %3708 }
0x2222   :  { %v2208_v27 = vadd.f32 1.0, %v3709_v0  ;;  %v3711_v55 = vpop.eup %3710 }
0x2223   :  { %v3713_v51 = vpop.eup %3712  ;;  %v2211_v2 = vadd.f32 1.0, %v3711_v55 }
0x2224   :  { %3714 = vrcp.f32 %v2208_v27  ;;  %v2209_v41 = vadd.f32 1.0, %v3713_v51  ;;  %v2238_v58 = vand.u32 2147483648, %v2208_v27  ;;  %vm2232_vm13 = vweird.f32 %v2208_v27 }
0x2225   :  { %3716 = vrcp.f32 %v2211_v2  ;;  %v2236_v60 = vand.u32 2147483647, %v2208_v27  ;;  %vm2277_vm2 = vweird.f32 %v2211_v2  ;;  %v2283_v20 = vand.u32 2147483648, %v2211_v2 }
0x2226   :  { %3718 = vrcp.f32 %v2209_v41  ;;  %v2239_v21 = vor.u32 1.1754944e-38, %v2238_v58  ;;  %vm2247_vm7 = vweird.f32 %v2209_v41 }
0x2227   :  { %vm2237_vm15 = vcmp.eq.f32.partialorder %v2236_v60, 8.507059e+37  ;;  %v2284_v24 = vor.u32 1.1754944e-38, %v2283_v20 }
0x2229   :  { %2294 = vrot.lane.b32.xlu2 %v2176_v62, %s3932_s2 }
0x222a   :  { %v3715_v7 = vpop.eup %3714 }
0x222b   :  { %v2228_v63 = vmul.f32 %v3715_v7, %v2208_v27  ;;  %v3717_v13 = vpop.eup %3716  ;;  %vm2233_vm12 = vweird.f32 %v3715_v7 }
0x222c   :  { %v3719_v14 = vpop.eup %3718  ;;  %v2273_v54 = vmul.f32 %v3717_v13, %v2211_v2  ;;  %vm2234_vm14 = vmor %vm2232_vm13, %vm2233_vm12  ;;  %vm2278_vm3 = vweird.f32 %v3717_v13 }
0x222d   :  { %v2229_v43 = vsub.f32 1.0, %v2228_v63  ;;  %v2243_v8 = vmul.f32 %v3719_v14, %v2209_v41  ;;  %vm4817_vm4 = vmor %vm2277_vm2, %vm2278_vm3  ;;  %vm2248_vm5 = vweird.f32 %v3719_v14 }
0x222e   :  { %v2274_v46 = vsub.f32 1.0, %v2273_v54  ;;  %vm2249_vm0 = vmor %vm2247_vm7, %vm2248_vm5  ;;  %v70_v54 = vld [vmem:[#allocation7 + $0x118] sm:$0xff] }
0x222f   :  { %v2230_v57 = vmul.f32 %v3715_v7, %v2229_v43  ;;  %v2244_v36 = vsub.f32 1.0, %v2243_v8 }
0x2230   :  { %v2275_v17 = vmul.f32 %v3717_v13, %v2274_v46  ;;  %v67_v46 = vld [vmem:[#allocation7 + $0x100] sm:$0xff] }
0x2231   :  { %2300 = vrot.lane.b32.xlu2 %v2185_v61, %s3932_s2  ;;  %v2231_v45 = vadd.f32 %v3715_v7, %v2230_v57  ;;  %v2245_v59 = vmul.f32 %v3719_v14, %v2244_v36  ;;  %v2281_v61 = vand.u32 2147483647, %v2211_v2  ;;  %v2190_v2 = vadd.f32 %v2182_v39, %v4773_v53 }
0x2232   :  { %v2276_v10 = vadd.f32 %v3717_v13, %v2275_v17 }
0x2233   :  { %v2235_v3 = vsel %vm2234_vm14, %v3715_v7, %v2231_v45  ;;  %v2246_v40 = vadd.f32 %v3719_v14, %v2245_v59  ;;  %vm2282_vm9 = vcmp.eq.f32.partialorder %v2281_v61, 8.507059e+37  ;;  %v3498_v7 = vmul.f32 -1.442695, %v2190_v2  ;;  %v3133_v61 = vld [vmem:[#allocation3 + $0x8] sm:$0xff] }
0x2234   :  { %v4814_v18 = vsel %vm2237_vm15, %v2239_v21, %v2235_v3  ;;  %v2280_v1 = vsel %vm4817_vm4, %v3717_v13, %v2276_v10 }
0x2235   :  { %v4827_v27 = vsel %vm2282_vm9, %v2284_v24, %v2280_v1  ;;  %3720 = vpow2.f32 %v3498_v7 }
0x225b   :  { %v1966_v30 = vpop.f32.mrf.mxu2 }
0x225c   :  { %v1971_v26 = vadd.f32 %v1966_v30, %v4805_v23  ;;  %v2253_v30 = vand.u32 2147483648, %v2209_v41 }
0x225e   :  { %v1974_v5 = vmax.f32 %v1971_v26, 0.0  ;;  %v2251_v26 = vand.u32 2147483647, %v2209_v41  ;;  %v2254_v0 = vor.u32 1.1754944e-38, %v2253_v30  ;;  %v3721_v41 = vpop.eup %3720  ;;  %v4860_v30 = vpop.f32.mrf.mxu1 }
0x225f   :  { %v2210_v63 = vadd.f32 1.0, %v3721_v41  ;;  %v2343_v41 = vsub.f32 1.0, %v4814_v18 }
0x2260   :  { %1997 = vmatmul.f32.gmra.mxu1 %v1974_v5  ;;  %v2250_v5 = vsel %vm2249_vm0, %v3719_v14, %v2246_v40  ;;  %vm2252_vm1 = vcmp.eq.f32.partialorder %v2251_v26, 8.507059e+37  ;;  %v3134_v40 = vld [vmem:[#allocation3 + $0x10] sm:$0xff] }
0x2261   :  { %v4830_v55 = vsel %vm2252_vm1, %v2254_v0, %v2250_v5  ;;  %3722 = vrcp.f32 %v2210_v63  ;;  %vm2262_vm11 = vweird.f32 %v2210_v63 }
0x2262   :  { %v2309_v51 = vmul.f32 %v2297_v4, %v4830_v55 }
0x2266   :  { %v4862_v24 = vpop.f32.mrf.mxu1 }
0x2267   :  { %v3723_v43 = vpop.eup %3722 }
0x2268   :  { %v2258_v13 = vmul.f32 %v3723_v43, %v2210_v63  ;;  %vm2263_vm10 = vweird.f32 %v3723_v43 }
0x2269   :  { %vm2264_vm12 = vmor %vm2262_vm11, %vm2263_vm10 }
0x226a   :  { %v2259_v14 = vsub.f32 1.0, %v2258_v13 }
0x226c   :  { %v2260_v57 = vmul.f32 %v3723_v43, %v2259_v14 }
0x226e   :  { %v2261_v8 = vadd.f32 %v3723_v43, %v2260_v57  ;;  %v4864_v26 = vpop.f32.mrf.mxu1  ;;  %v2344_v57 = vsub.f32 1.0, %v4830_v55 }
0x2270   :  { %v2265_v45 = vsel %vm2264_vm12, %v3723_v43, %v2261_v8 }
0x2276   :  { %v4866_v5 = vpop.f32.mrf.mxu1 }
0x227b   :  { %v2353_v49 = vpop.permute.xlu2 %2352 }
0x227c   :  { %v2367_v34 = vmul.f32 %v2353_v49, %v2342_v29  ;;  %v69_v29 = vld [vmem:[#allocation7 + $0x110] sm:$0xff]  ;;  %v2268_v49 = vand.u32 2147483648, %v2210_v63 }
0x227e   :  { %v2389_v38 = vadd.f32 %v2384_v11, %v2367_v34  ;;  %v2266_v11 = vand.u32 2147483647, %v2210_v63  ;;  %v68_v34 = vld [vmem:[#allocation7 + $0x108] sm:$0xff]  ;;  %v2269_v36 = vor.u32 1.1754944e-38, %v2268_v49  ;;  %v2346_v49 = vsub.f32 1.0, %v4827_v27 }
0x2280   :  { %2551 = vrot.lane.b32.xlu1 %v2389_v38, %s3933_s21  ;;  %vm2267_vm13 = vcmp.eq.f32.partialorder %v2266_v11, 8.507059e+37 }
0x2281   :  { %v4839_v60 = vsel %vm2267_vm13, %v2269_v36, %v2265_v45 }
0x2283   :  { %v2295_v6 = vpop.permute.xlu2 %2294 }
0x2284   :  { %v2308_v62 = vmul.f32 %v2295_v6, %v4814_v18  ;;  %v3132_v6 = vld [vmem:[#allocation3] sm:$0xff] }
0x2286   :  { %2319 = vrot.lane.b32.xlu0 %v2308_v62, %s3932_s2 }
0x2288   :  { %2298 = vrot.lane.b32.xlu1 %v2182_v39, %s3932_s2 }
0x228b   :  { %v2301_v25 = vpop.permute.xlu2 %2300 }
0x228c   :  { %v2311_v44 = vmul.f32 %v2301_v25, %v4827_v27 }
0x228e   :  { %2325 = vrot.lane.b32.xlu0 %v2311_v44, %s3932_s2 }
0x2290   :  { %2321 = vrot.lane.b32.xlu1 %v2309_v51, %s3932_s2  ;;  %v3879_v51 = vld [vmem:[#allocation7 + $0xb0] sm:$0xff] }
0x22f2   :  { %v2552_v42 = vpop.permute.xlu1 %2551 }
0x22f3   :  { %2554 = vst.msk [vmem:[#allocation3 + $0x20] sm:$0xff] %vm222_vm6, %v2552_v42  ;;  %3504 = vmatmul.msk.f32.vlgmr.msrb.gmra.mxu1 %vm222_vm6, %v2552_v42 }
0x22f4   :  { %3165 = vmatpush.msrb.mxu1 %v70_v54 }
0x22f6   :  { %3166 = vmatpush.msrb.mxu1 %v69_v29 }
0x22f8   :  { %v2320_v58 = vpop.permute.xlu0 %2319  ;;  %3167 = vmatpush.msrb.mxu1 %v68_v34 }
0x22f9   :  { %v2333_v38 = vadd.f32 %v2320_v58, %v4773_v53 }
0x22fa   :  { %v2299_v3 = vpop.permute.xlu1 %2298  ;;  %3168 = vmatpush.msrb.mxu1 %v67_v46 }
0x22fb   :  { %3724 = vtanh.f32 %v2333_v38  ;;  %v2310_v17 = vmul.f32 %v2299_v3, %v4839_v60  ;;  %3506 = vmatmul.msk.f32.vlgmr.msra.gmra.mxu1 %vm222_vm6, %v2552_v42 }
0x22fd   :  { %2323 = vrot.lane.b32.xlu2 %v2310_v17, %s3932_s2 }
0x2300   :  { %v2326_v62 = vpop.permute.xlu0 %2325 }
0x2301   :  { %v3725_v21 = vpop.eup %3724  ;;  %v2336_v10 = vadd.f32 %v2326_v62, %v4773_v53 }
0x2302   :  { %v2322_v59 = vpop.permute.xlu1 %2321  ;;  %2354 = vrot.lane.b32.xlu1 %v3725_v21, %s3933_s21 }
0x2303   :  { %v2334_v20 = vadd.f32 %v2322_v59, %v4773_v53  ;;  %3523 = vmatmul.msk.f32.vlgmr.msrb.gmra.mxu1 %vm222_vm6, %v3132_v6 }
0x2305   :  { %3726 = vtanh.f32 %v2334_v20  ;;  %2374 = vrot.lane.b32.xlu2 %v4735_v32, %s3934_s7  ;;  %v3135_v32 = vld [vmem:[#allocation3 + $0x18] sm:$0xff] }
0x2306   :  { %3728 = vtanh.f32 %v2336_v10 }
0x230a   :  { %2376 = vrot.lane.b32.xlu1 %v4731_v37, %s3934_s7  ;;  %v3136_v37 = vld [vmem:[#allocation3 + $0x20] sm:$0xff] }
0x230b   :  { %v3727_v22 = vpop.eup %3726  ;;  %3524 = vmatmul.msk.f32.gmra.mxu1 %vm222_vm6, %v3133_v61 }
0x230c   :  { %2356 = vrot.lane.b32.xlu0 %v3727_v22, %s3933_s21  ;;  %v3729_v39 = vpop.eup %3728 }
0x2312   :  { %2360 = vrot.lane.b32.xlu1 %v3729_v39, %s3933_s21 }
0x2313   :  { %3525 = vmatmul.msk.f32.gmra.mxu1 %vm222_vm6, %v3134_v40 }
0x2314   :  { %2378 = vrot.lane.b32.xlu0 %v4722_v15, %s3934_s7  ;;  %v4869_v15 = vpop.f32.mrf.mxu1 }
0x231b   :  { %3526 = vmatmul.msk.f32.gmra.mxu1 %vm222_vm6, %v3135_v32 }
0x231c   :  { %v4872_v25 = vpop.f32.mrf.mxu1 }
0x2323   :  { %3527 = vmatmul.msk.f32.gmra.mxu1 %vm222_vm6, %v3136_v37 }
0x2357   :  { %v2324_v1 = vpop.permute.xlu2 %2323 }
0x2358   :  { %v2335_v0 = vadd.f32 %v2324_v1, %v4773_v53 }
0x235a   :  { %3730 = vtanh.f32 %v2335_v0 }
0x235f   :  { %v2375_v7 = vpop.permute.xlu2 %2374 }
0x2360   :  { %v3731_v4 = vpop.eup %3730  ;;  %v2385_v43 = vmul.f32 %v2375_v7, %v4814_v18  ;;  %v2388_v18 = vmul.f32 %v4827_v27, %v4335_v52 }
0x2361   :  { %2358 = vrot.lane.b32.xlu2 %v3731_v4, %s3933_s21  ;;  %v2628_v4 = vld [vmem:[%s5407_s1 + $0x110] sm:$0xff] }
0x2370   :  { %v2574_v44 = vpop.f32.mrf.mxu1 }
0x2371   :  { %v2575_v2 = vadd.f32 %v3879_v51, %v2574_v44  ;;  %v2627_v51 = vld [vmem:[%s5407_s1 + $0x108] sm:$0xff] }
0x2373   :  { %2598 = vrot.lane.b32.xlu1 %v2575_v2, %s3933_s21  ;;  %v2577_v46 = vadd.f32 %v4699_v9, %v2575_v2 }
0x2374   :  { %v2355_v63 = vpop.permute.xlu1 %2354 }
0x2375   :  { %v2368_v53 = vmul.f32 %v2355_v63, %v2343_v41  ;;  %v3505_v58 = vmul.f32 -1.442695, %v2577_v46  ;;  %v2637_v41 = vmul.f32 %v2627_v51, %v4717_v50  ;;  %v2626_v63 = vld [vmem:[%s5407_s1 + $0x100] sm:$0xff] }
0x2377   :  { %v2390_v13 = vadd.f32 %v2385_v43, %v2368_v53  ;;  %3732 = vpow2.f32 %v3505_v58  ;;  %v2631_v43 = vld [vmem:[#allocation5 + $0x10] sm:$0xff] }
0x2379   :  { %2402 = vrot.lane.b32.xlu2 %v2390_v13, %s3933_s21  ;;  %v2636_v13 = vmul.f32 %v2631_v43, %v2626_v63 }
0x237c   :  { %v2377_v14 = vpop.permute.xlu1 %2376 }
0x237d   :  { %v2386_v42 = vmul.f32 %v2377_v14, %v4830_v55  ;;  %v2345_v55 = vsub.f32 1.0, %v4839_v60  ;;  %v3733_v59 = vpop.eup %3732  ;;  %v2625_v14 = vld [vmem:[%s5407_s1 + $0xf8] sm:$0xff] }
0x237e   :  { %v2357_v54 = vpop.permute.xlu0 %2356  ;;  %v2581_v6 = vadd.f32 1.0, %v3733_v59 }
0x237f   :  { %v2369_v8 = vmul.f32 %v2357_v54, %v2344_v57  ;;  %v2630_v57 = vld [vmem:[#allocation5 + $0x8] sm:$0xff] }
0x2380   :  { %3734 = vrcp.f32 %v2581_v6  ;;  %v2593_v22 = vand.u32 2147483648, %v2581_v6  ;;  %vm2587_vm15 = vweird.f32 %v2581_v6  ;;  %v2591_v39 = vand.u32 2147483647, %v2581_v6 }
0x2381   :  { %v2391_v29 = vadd.f32 %v2386_v42, %v2369_v8  ;;  %v2635_v50 = vmul.f32 %v2630_v57, %v2625_v14  ;;  %v2624_v8 = vld [vmem:[%s5407_s1 + $0xf0] sm:$0xff] }
0x2382   :  { %v2594_v40 = vor.u32 1.1754944e-38, %v2593_v22  ;;  %vm2592_vm3 = vcmp.eq.f32.partialorder %v2591_v39, 8.507059e+37 }
0x2383   :  { %2404 = vrot.lane.b32.xlu0 %v2391_v29, %s3933_s21 }
0x2384   :  { %v2361_v11 = vpop.permute.xlu1 %2360 }
0x2385   :  { %v2371_v34 = vmul.f32 %v2361_v11, %v2346_v49  ;;  %v2634_v49 = vmul.f32 %v2624_v8, %v4727_v56 }
0x2386   :  { %v2379_v36 = vpop.permute.xlu0 %2378  ;;  %v3735_v27 = vpop.eup %3734 }
0x2387   :  { %v2393_v45 = vadd.f32 %v2388_v18, %v2371_v34  ;;  %v2387_v3 = vmul.f32 %v2379_v36, %v4839_v60  ;;  %v2583_v20 = vmul.f32 %v3735_v27, %v2581_v6  ;;  %vm2588_vm14 = vweird.f32 %v3735_v27 }
0x2388   :  { %vm2589_vm2 = vmor %vm2587_vm15, %vm2588_vm14 }
0x2389   :  { %v2584_v9 = vsub.f32 1.0, %v2583_v20 }
0x238b   :  { %2408 = vrot.lane.b32.xlu0 %v2393_v45, %s3933_s21  ;;  %v2585_v10 = vmul.f32 %v3735_v27, %v2584_v9 }
0x238d   :  { %v2586_v61 = vadd.f32 %v3735_v27, %v2585_v10 }
0x238f   :  { %v2590_v60 = vsel %vm2589_vm2, %v3735_v27, %v2586_v61  ;;  %v4946_v27 = vld [vmem:[#allocation7 + $0x68] ss:$0 sm:$0xff] }
0x2390   :  { %v2595_v32 = vsel %vm2592_vm3, %v2594_v40, %v2590_v60  ;;  %v4960_v60 = vadd.f32 %v4770_v47, %v4860_v30 }
0x23bb   :  { %v2359_v38 = vpop.permute.xlu2 %2358 }
0x23bc   :  { %v2370_v17 = vmul.f32 %v2359_v38, %v2345_v55 }
0x23be   :  { %v2392_v21 = vadd.f32 %v2387_v3, %v2370_v17  ;;  %v4941_v3 = vadd.f32 %v4801_v19, %v4755_v31 }
0x23c0   :  { %2406 = vrot.lane.b32.xlu2 %v2392_v21, %s3933_s21 }
0x23d3   :  { %v2403_v62 = vpop.permute.xlu2 %2402 }
0x23d4   :  { %3500 = vmatmul.msk.f32.vlgmr.msra.gmra.mxu2 %vm222_vm6, %v2403_v62 }
0x23e5   :  { %v2599_v37 = vpop.permute.xlu1 %2598 }
0x23e6   :  { %v2601_v1 = vmul.f32 %v2599_v37, %v2595_v32 }
0x23e8   :  { %2602 = vst.msk [vmem:[#allocation5 + $0x20] sm:$0xff] %vm222_vm6, %v2601_v1 }
0x23ef   :  { %v2633_v44 = vld [vmem:[#allocation5 + $0x20] sm:$0xff] }
0x23f0   :  { %v4898_v2 = vmul.f32 %v2633_v44, %v2628_v4 }
0x23f2   :  { %v4906_v53 = vadd.f32 %v4898_v2, %v2637_v41 }
0x23f4   :  { %v4912_v54 = vadd.f32 %v4906_v53, %v2636_v13 }
0x23f5   :  { %v2405_v0 = vpop.permute.xlu0 %2404 }
0x23f6   :  { %3501 = vmatmul.msk.f32.gmra.mxu2 %vm222_vm6, %v2405_v0  ;;  %v4919_v29 = vadd.f32 %v4912_v54, %v2635_v50 }
0x23f8   :  { %v4923_v11 = vadd.f32 %v4919_v29, %v2634_v49 }
0x23fd   :  { %v2409_v42 = vpop.permute.xlu0 %2408 }
0x241a   :  { %v2407_v7 = vpop.permute.xlu2 %2406 }
0x241b   :  { %3502 = vmatmul.msk.f32.gmra.mxu2 %vm222_vm6, %v2407_v7 }
0x2423   :  { %3503 = vmatmul.msk.f32.gmra.mxu2 %vm222_vm6, %v2409_v42 }
0x242b   :  { %3507 = vmatmul.msk.f32.vlgmr.msrb.gmra.mxu2 %vm222_vm6, %v4923_v11 }
0x2433   :  { %3508 = vmatmul.msk.f32.gmra.mxu2 %vm222_vm6, %v4919_v29 }
0x243b   :  { %3509 = vmatmul.msk.f32.gmra.mxu2 %vm222_vm6, %v4912_v54 }
0x2443   :  { %3510 = vmatmul.msk.f32.gmra.mxu2 %vm222_vm6, %v4906_v53 }
0x244b   :  { %3511 = vmatmul.msk.f32.gmra.mxu2 %vm222_vm6, %v4898_v2 }
0x2453   :  { %2690 = vmatmul.f32.gmra.mxu2 %v3936_v33 }
0x2457   :  { %v2435_v56 = vpop.f32.mrf.mxu2 }
0x2458   :  { %v2447_v34 = vadd.f32 %v2435_v56, %v4469_v16 }
0x245a   :  { %v2451_v18 = vmax.f32 %v2447_v34, 0.0 }
0x245c   :  { %2471 = vmatmul.f32.vlgmr.msra.gmra.mxu0 %v2451_v18 }
0x2479   :  { %v2438_v45 = vpop.f32.mrf.mxu2 }
0x247a   :  { %v2448_v46 = vadd.f32 %v2438_v45, %v4688_v12 }
0x247c   :  { %v2452_v58 = vmax.f32 %v2448_v46, 0.0 }
0x247e   :  { %2474 = vmatmul.f32.gmra.mxu0 %v2452_v58 }
0x249e   :  { %v2441_v36 = vpop.f32.mrf.mxu2 }
0x249f   :  { %v2449_v55 = vadd.f32 %v2441_v36, %v4805_v23 }
0x24a1   :  { %v2453_v38 = vmax.f32 %v2449_v55, 0.0 }
0x24a3   :  { %2477 = vmatmul.f32.gmra.mxu0 %v2453_v38 }
0x24a6   :  { %v2444_v33 = vpop.f32.mrf.mxu2 }
0x24a7   :  { %v2450_v17 = vadd.f32 %v2444_v33, %v4941_v3 }
0x24a9   :  { %v2454_v21 = vmax.f32 %v2450_v17, 0.0 }
0x24ab   :  { %2480 = vmatmul.f32.gmra.mxu0 %v2454_v21 }
0x24ae   :  { %v4944_v59 = vpop.f32.mrf.mxu2 }
0x24b6   :  { %v2679_v6 = vpop.f32.mrf.mxu2 }
0x24b7   :  { %v2680_v20 = vadd.f32 %v4946_v27, %v2679_v6 }
0x24b9   :  { %2822 = vrot.lane.b32.xlu1 %v2680_v20, %s3932_s2  ;;  %v2695_v1 = vadd.f32 %v2680_v20, %v4960_v60 }
0x24bb   :  { %v3513_v4 = vmul.f32 -1.442695, %v2695_v1 }
0x24be   :  { %v2682_v62 = vpop.f32.mrf.mxu2 }
0x24bf   :  { %v2683_v9 = vadd.f32 %v4946_v27, %v2682_v62 }
0x24c1   :  { %2824 = vrot.lane.b32.xlu2 %v2683_v9, %s3932_s2  ;;  %v2696_v40 = vadd.f32 %v2683_v9, %v4960_v60 }
0x24c3   :  { %v3514_v32 = vmul.f32 -1.442695, %v2696_v40 }
0x24c5   :  { %3736 = vpow2.f32 %v3514_v32 }
0x24c6   :  { %v2685_v31 = vpop.f32.mrf.mxu2 }
0x24c7   :  { %v2686_v19 = vadd.f32 %v4946_v27, %v2685_v31 }
0x24c9   :  { %2826 = vrot.lane.b32.xlu0 %v2686_v19, %s3932_s2  ;;  %v2697_v47 = vadd.f32 %v2686_v19, %v4960_v60 }
0x24cb   :  { %v3737_v37 = vpop.eup %3736  ;;  %v3515_v13 = vmul.f32 -1.442695, %v2697_v47 }
0x24cc   :  { %v2720_v0 = vadd.f32 1.0, %v3737_v37 }
0x24ce   :  { %v2688_v10 = vpop.f32.mrf.mxu2  ;;  %3738 = vrcp.f32 %v2720_v0  ;;  %v2765_v56 = vand.u32 2147483648, %v2720_v0  ;;  %vm2759_vm5 = vweird.f32 %v2720_v0  ;;  %v2763_v18 = vand.u32 2147483647, %v2720_v0 }
0x24cf   :  { %v2689_v61 = vadd.f32 %v4946_v27, %v2688_v10  ;;  %3740 = vpow2.f32 %v3513_v4 }
0x24d0   :  { %v2766_v36 = vor.u32 1.1754944e-38, %v2765_v56  ;;  %vm2764_vm9 = vcmp.eq.f32.partialorder %v2763_v18, 8.507059e+37 }
0x24d1   :  { %2828 = vrot.lane.b32.xlu1 %v2689_v61, %s3932_s2  ;;  %v2698_v42 = vadd.f32 %v2689_v61, %v4960_v60 }
0x24d3   :  { %v3516_v34 = vmul.f32 -1.442695, %v2698_v42 }
0x24d4   :  { %v3739_v51 = vpop.eup %3738 }
0x24d5   :  { %v3741_v41 = vpop.eup %3740  ;;  %v2755_v63 = vmul.f32 %v3739_v51, %v2720_v0  ;;  %vm2760_vm4 = vweird.f32 %v3739_v51 }
0x24d6   :  { %v2691_v22 = vpop.f32.mrf.mxu2  ;;  %v2719_v30 = vadd.f32 1.0, %v3741_v41  ;;  %vm2761_vm7 = vmor %vm2759_vm5, %vm2760_vm4 }
0x24d7   :  { %v2692_v39 = vadd.f32 %v4946_v27, %v2691_v22  ;;  %v2756_v43 = vsub.f32 1.0, %v2755_v63 }
0x24d8   :  { %v2750_v22 = vand.u32 2147483648, %v2719_v30  ;;  %vm2744_vm1 = vweird.f32 %v2719_v30 }
0x24d9   :  { %2830 = vrot.lane.b32.xlu2 %v2692_v39, %s3932_s2  ;;  %v2699_v44 = vadd.f32 %v2692_v39, %v4960_v60  ;;  %v2757_v57 = vmul.f32 %v3739_v51, %v2756_v43  ;;  %v2748_v39 = vand.u32 2147483647, %v2719_v30 }
0x24da   :  { %v2751_v1 = vor.u32 1.1754944e-38, %v2750_v22 }
0x24db   :  { %v3517_v7 = vmul.f32 -1.442695, %v2699_v44  ;;  %v2758_v8 = vadd.f32 %v3739_v51, %v2757_v57  ;;  %vm2749_vm11 = vcmp.eq.f32.partialorder %v2748_v39, 8.507059e+37 }
0x24dd   :  { %3742 = vpow2.f32 %v3517_v7  ;;  %v2762_v46 = vsel %vm2761_vm7, %v3739_v51, %v2758_v8 }
0x24de   :  { %3744 = vrcp.f32 %v2719_v30  ;;  %v4967_v33 = vsel %vm2764_vm9, %v2766_v36, %v2762_v46 }
0x24df   :  { %3746 = vpow2.f32 %v3515_v13 }
0x24e3   :  { %v3743_v14 = vpop.eup %3742 }
0x24e4   :  { %v2723_v50 = vadd.f32 1.0, %v3743_v14  ;;  %v3745_v49 = vpop.eup %3744 }
0x24e5   :  { %v3747_v45 = vpop.eup %3746  ;;  %v2740_v58 = vmul.f32 %v3745_v49, %v2719_v30  ;;  %vm2745_vm0 = vweird.f32 %v3745_v49 }
0x24e6   :  { %3748 = vrcp.f32 %v2723_v50  ;;  %v2721_v55 = vadd.f32 1.0, %v3747_v45  ;;  %vm2746_vm10 = vmor %vm2744_vm1, %vm2745_vm0  ;;  %v2810_v63 = vand.u32 2147483648, %v2723_v50  ;;  %vm2804_vm13 = vweird.f32 %v2723_v50 }
0x24e7   :  { %3750 = vpow2.f32 %v3516_v34  ;;  %v2741_v21 = vsub.f32 1.0, %v2740_v58  ;;  %v2808_v47 = vand.u32 2147483647, %v2723_v50 }
0x24e8   :  { %3752 = vrcp.f32 %v2721_v55  ;;  %v2811_v14 = vor.u32 1.1754944e-38, %v2810_v63  ;;  %v2780_v34 = vand.u32 2147483648, %v2721_v55  ;;  %vm2774_vm3 = vweird.f32 %v2721_v55 }
0x24e9   :  { %v2742_v62 = vmul.f32 %v3745_v49, %v2741_v21  ;;  %vm2809_vm15 = vcmp.eq.f32.partialorder %v2808_v47, 8.507059e+37  ;;  %v2778_v18 = vand.u32 2147483647, %v2721_v55 }
0x24ea   :  { %v2781_v46 = vor.u32 1.1754944e-38, %v2780_v34 }
0x24eb   :  { %v2743_v19 = vadd.f32 %v3745_v49, %v2742_v62  ;;  %vm2779_vm5 = vcmp.eq.f32.partialorder %v2778_v18, 8.507059e+37 }
0x24ec   :  { %v3749_v6 = vpop.eup %3748 }
0x24ed   :  { %v3751_v20 = vpop.eup %3750  ;;  %v2800_v9 = vmul.f32 %v3749_v6, %v2723_v50  ;;  %v2747_v40 = vsel %vm2746_vm10, %v3745_v49, %v2743_v19  ;;  %vm2805_vm12 = vweird.f32 %v3749_v6 }
0x24ee   :  { %v2722_v31 = vadd.f32 1.0, %v3751_v20  ;;  %v3753_v61 = vpop.eup %3752  ;;  %v4971_v4 = vsel %vm2749_vm11, %v2751_v1, %v2747_v40  ;;  %vm2806_vm14 = vmor %vm2804_vm13, %vm2805_vm12 }
0x24ef   :  { %v2801_v10 = vsub.f32 1.0, %v2800_v9  ;;  %v2770_v37 = vmul.f32 %v3753_v61, %v2721_v55  ;;  %vm2775_vm2 = vweird.f32 %v3753_v61  ;;  %v2881_v63 = vsub.f32 1.0, %v4971_v4 }
0x24f0   :  { %3754 = vrcp.f32 %v2722_v31  ;;  %vm2776_vm4 = vmor %vm2774_vm3, %vm2775_vm2  ;;  %v2795_v21 = vand.u32 2147483648, %v2722_v31  ;;  %vm2789_vm9 = vweird.f32 %v2722_v31 }
0x24f1   :  { %v2802_v32 = vmul.f32 %v3749_v6, %v2801_v10  ;;  %v2771_v7 = vsub.f32 1.0, %v2770_v37 }
0x24f2   :  { %v2796_v55 = vor.u32 1.1754944e-38, %v2795_v21 }
0x24f3   :  { %v2803_v51 = vadd.f32 %v3749_v6, %v2802_v32  ;;  %v2772_v43 = vmul.f32 %v3753_v61, %v2771_v7 }
0x24f5   :  { %v2807_v30 = vsel %vm2806_vm14, %v3749_v6, %v2803_v51  ;;  %v2773_v49 = vadd.f32 %v3753_v61, %v2772_v43  ;;  %v2793_v6 = vand.u32 2147483647, %v2722_v31  ;;  %vm1286_vm14 = vcmask 7168  }
0x24f6   :  { %v3755_v41 = vpop.eup %3754  ;;  %v4975_v57 = vsel %vm2809_vm15, %v2811_v14, %v2807_v30  ;;  %vm3412_vm15 = vcmask 138368  }
0x24f7   :  { %v2785_v13 = vmul.f32 %v3755_v41, %v2722_v31  ;;  %v2777_v50 = vsel %vm2776_vm4, %v3753_v61, %v2773_v49  ;;  %vm2790_vm7 = vweird.f32 %v3755_v41  ;;  %vm2794_vm1 = vcmp.eq.f32.partialorder %v2793_v6, 8.507059e+37 }
0x24f8   :  { %v4979_v36 = vsel %vm2779_vm5, %v2781_v46, %v2777_v50  ;;  %vm2791_vm0 = vmor %vm2789_vm9, %vm2790_vm7 }
0x24f9   :  { %v2786_v56 = vsub.f32 1.0, %v2785_v13  ;;  %v2882_v13 = vsub.f32 1.0, %v4967_v33 }
0x24fb   :  { %v2787_v45 = vmul.f32 %v3755_v41, %v2786_v56  ;;  %v2883_v56 = vsub.f32 1.0, %v4979_v36 }
0x251b   :  { %v2825_v38 = vpop.permute.xlu2 %2824 }
0x251c   :  { %v2840_v17 = vmul.f32 %v2825_v38, %v4967_v33 }
0x251e   :  { %2854 = vrot.lane.b32.xlu1 %v2840_v17, %s3932_s2  ;;  %v2788_v17 = vadd.f32 %v3755_v41, %v2787_v45 }
0x2520   :  { %v2792_v20 = vsel %vm2791_vm0, %v3755_v41, %v2788_v17 }
0x2521   :  { %v2797_v62 = vsel %vm2794_vm1, %v2796_v55, %v2792_v20  ;;  %v2936_v55 = vmul.f32 %v4975_v57, %v4335_v52  ;;  %v80_v52 = vld [vmem:[#allocation7 + $0x168] sm:$0xff] }
0x2522   :  { %v2884_v46 = vsub.f32 1.0, %v2797_v62 }
0x252b   :  { %v2823_v0 = vpop.permute.xlu1 %2822 }
0x252c   :  { %v2839_v44 = vmul.f32 %v2823_v0, %v4971_v4 }
0x252e   :  { %2852 = vrot.lane.b32.xlu0 %v2839_v44, %s3932_s2 }
0x2533   :  { %v2831_v42 = vpop.permute.xlu2 %2830 }
0x2534   :  { %v2843_v8 = vmul.f32 %v2831_v42, %v4975_v57 }
0x2536   :  { %2860 = vrot.lane.b32.xlu1 %v2843_v8, %s3932_s2 }
0x253b   :  { %v2827_v58 = vpop.permute.xlu0 %2826 }
0x253c   :  { %v2841_v38 = vmul.f32 %v2827_v58, %v4979_v36 }
0x253e   :  { %2856 = vrot.lane.b32.xlu2 %v2841_v38, %s3932_s2 }
0x2543   :  { %v2829_v9 = vpop.permute.xlu1 %2828 }
0x2544   :  { %v2842_v19 = vmul.f32 %v2829_v9, %v2797_v62 }
0x2546   :  { %2858 = vrot.lane.b32.xlu0 %v2842_v19, %s3932_s2  ;;  %v87_v19 = vld [vmem:[#allocation7 + $0x1a0] sm:$0xff] }
0x2547   :  { %3191 = vmatpush.msrb.mxu3 %v87_v19 }
0x254e   :  { %2918 = vrot.lane.b32.xlu0 %v4919_v29, %s3934_s7 }
0x2590   :  { %v2855_v10 = vpop.permute.xlu1 %2854 }
0x2591   :  { %v2870_v61 = vadd.f32 %v2855_v10, %v4960_v60  ;;  %v86_v10 = vld [vmem:[#allocation7 + $0x198] sm:$0xff] }
0x2592   :  { %3192 = vmatpush.msrb.mxu3 %v86_v10 }
0x2593   :  { %3756 = vtanh.f32 %v2870_v61  ;;  %v85_v61 = vld [vmem:[#allocation7 + $0x190] sm:$0xff] }
0x2594   :  { %3193 = vmatpush.msrb.mxu3 %v85_v61  ;;  %v3881_v61 = vld [vmem:[#allocation7 + $0x1f0] ss:$0 sm:$0xff] }
0x2598   :  { %v2857_v22 = vpop.permute.xlu2 %2856 }
0x2599   :  { %v3757_v39 = vpop.eup %3756  ;;  %v2871_v31 = vadd.f32 %v2857_v22, %v4960_v60  ;;  %v84_v22 = vld [vmem:[#allocation7 + $0x188] sm:$0xff] }
0x259a   :  { %2896 = vrot.lane.b32.xlu1 %v3757_v39, %s3933_s21  ;;  %v83_v39 = vld [vmem:[#allocation7 + $0x180] sm:$0xff]  ;;  %3194 = vmatpush.msrb.mxu3 %v84_v22 }
0x259b   :  { %3758 = vtanh.f32 %v2871_v31  ;;  %v82_v31 = vld [vmem:[#allocation7 + $0x178] sm:$0xff] }
0x259c   :  { %3195 = vmatpush.msrb.mxu3 %v83_v39 }
0x259e   :  { %3196 = vmatpush.msrb.mxu3 %v82_v31  ;;  %v3567_v31 = vld [vmem:[#allocation7 + $0x1a8] ss:$0 sm:$0xff] }
0x25a0   :  { %v2853_v40 = vpop.permute.xlu0 %2852 }
0x25a1   :  { %v3759_v32 = vpop.eup %3758  ;;  %v2869_v37 = vadd.f32 %v2853_v40, %v4960_v60  ;;  %v81_v40 = vld [vmem:[#allocation7 + $0x170] sm:$0xff] }
0x25a2   :  { %2922 = vrot.lane.b32.xlu1 %v4906_v53, %s3934_s7  ;;  %2898 = vrot.lane.b32.xlu0 %v3759_v32, %s3933_s21  ;;  %v78_v32 = vld [vmem:[#allocation7 + $0x158] sm:$0xff] }
0x25a3   :  { %3760 = vtanh.f32 %v2869_v37  ;;  %3197 = vmatpush.msrb.mxu3 %v81_v40  ;;  %v77_v37 = vld [vmem:[#allocation7 + $0x150] sm:$0xff] }
0x25a5   :  { %3198 = vmatpush.msrb.mxu3 %v80_v52 }
0x25a8   :  { %v2861_v29 = vpop.permute.xlu1 %2860 }
0x25a9   :  { %v3761_v1 = vpop.eup %3760  ;;  %v2873_v0 = vadd.f32 %v2861_v29, %v4960_v60  ;;  %v76_v29 = vld [vmem:[#allocation7 + $0x148] sm:$0xff] }
0x25aa   :  { %2924 = vrot.lane.b32.xlu0 %v4898_v2, %s3934_s7  ;;  %2894 = vrot.lane.b32.xlu2 %v3761_v1, %s3933_s21  ;;  %v75_v1 = vld [vmem:[#allocation7 + $0x140] sm:$0xff] }
0x25ab   :  { %3762 = vtanh.f32 %v2873_v0  ;;  %v74_v0 = vld [vmem:[#allocation7 + $0x138] sm:$0xff] }
0x25b1   :  { %v3763_v44 = vpop.eup %3762 }
0x25b2   :  { %2902 = vrot.lane.b32.xlu1 %v3763_v44, %s3933_s21  ;;  %2920 = vrot.lane.b32.xlu2 %v4912_v54, %s3934_s7  ;;  %v73_v44 = vld [vmem:[#allocation7 + $0x130] sm:$0xff] }
0x25b8   :  { %v2859_v53 = vpop.permute.xlu0 %2858 }
0x25b9   :  { %v2872_v51 = vadd.f32 %v2859_v53, %v4960_v60  ;;  %v72_v53 = vld [vmem:[#allocation7 + $0x128] sm:$0xff] }
0x25bb   :  { %3764 = vtanh.f32 %v2872_v51 }
0x25c0   :  { %v2919_v41 = vpop.permute.xlu0 %2918 }
0x25c1   :  { %v3765_v7 = vpop.eup %3764  ;;  %v2932_v47 = vmul.f32 %v2919_v41, %v4971_v4 }
0x25c2   :  { %2900 = vrot.lane.b32.xlu2 %v3765_v7, %s3933_s21  ;;  %v2620_v7 = vpop.f32.mrf.mxu1 }
0x2604   :  { %v2895_v2 = vpop.permute.xlu2 %2894 }
0x2605   :  { %v2911_v30 = vmul.f32 %v2895_v2, %v2881_v63  ;;  %v3170_v63 = vpop.f32.mrf.mxu1 }
0x2607   :  { %v2938_v43 = vadd.f32 %v2932_v47, %v2911_v30  ;;  %v3566_v47 = vld [vmem:[#allocation7 + $0x120] ss:$0 sm:$0xff] }
0x2609   :  { %2953 = vrot.lane.b32.xlu2 %v2938_v43, %s3933_s21 }
0x260c   :  { %v2897_v54 = vpop.permute.xlu1 %2896  ;;  %v2921_v14 = vpop.permute.xlu2 %2920 }
0x260d   :  { %v2912_v42 = vmul.f32 %v2897_v54, %v2882_v13  ;;  %v2933_v8 = vmul.f32 %v2921_v14, %v4967_v33  ;;  %v2885_v33 = vsub.f32 1.0, %v4975_v57  ;;  %v79_v57 = vld [vmem:[#allocation7 + $0x160] sm:$0xff]  ;;  %v3173_v43 = vpop.f32.mrf.mxu1  ;;  %v3171_v13 = vadd.f32 %v3566_v47, %v3170_v63 }
0x260e   :  { %3199 = vmatpush.msrb.mxu3 %v79_v57  ;;  %v3174_v14 = vadd.f32 %v3566_v47, %v3173_v43 }
0x260f   :  { %v2939_v49 = vadd.f32 %v2933_v8, %v2912_v42  ;;  %v3185_v54 = vmax.f32 %v3171_v13, 0.0 }
0x2610   :  { %3200 = vmatpush.msrb.mxu3 %v78_v32  ;;  %v3186_v8 = vmax.f32 %v3174_v14, 0.0  ;;  %v5070_v14 = vld [vmem:[%s5406_s0 + $0x18] sm:$0xff] }
0x2611   :  { %2955 = vrot.lane.b32.xlu0 %v2939_v49, %s3933_s21 }
0x2612   :  { %3201 = vmatpush.msrb.mxu3 %v77_v37 }
0x2614   :  { %v2923_v34 = vpop.permute.xlu1 %2922  ;;  %v2899_v18 = vpop.permute.xlu0 %2898  ;;  %3202 = vmatpush.msrb.mxu3 %v76_v29 }
0x2615   :  { %v2934_v4 = vmul.f32 %v2923_v34, %v4979_v36  ;;  %v2913_v50 = vmul.f32 %v2899_v18, %v2883_v56  ;;  %v3176_v42 = vpop.f32.mrf.mxu1 }
0x2616   :  { %3203 = vmatpush.msrb.mxu3 %v75_v1  ;;  %v3177_v49 = vadd.f32 %v3566_v47, %v3176_v42 }
0x2617   :  { %v2940_v45 = vadd.f32 %v2934_v4, %v2913_v50 }
0x2618   :  { %3204 = vmatpush.msrb.mxu3 %v74_v0  ;;  %v3187_v34 = vmax.f32 %v3177_v49, 0.0  ;;  %v5078_v49 = vld [vmem:[%s5406_s0 + $0x20] sm:$0xff] }
0x2619   :  { %2957 = vrot.lane.b32.xlu1 %v2940_v45, %s3933_s21 }
0x261a   :  { %3205 = vmatpush.msrb.mxu3 %v73_v44 }
0x261c   :  { %v2901_v58 = vpop.permute.xlu2 %2900  ;;  %v2925_v38 = vpop.permute.xlu0 %2924  ;;  %3206 = vmatpush.msrb.mxu3 %v72_v53 }
0x261d   :  { %v2914_v17 = vmul.f32 %v2901_v58, %v2884_v46  ;;  %v2935_v21 = vmul.f32 %v2925_v38, %v2797_v62  ;;  %v3179_v56 = vpop.f32.mrf.mxu1 }
0x261e   :  { %v3180_v18 = vadd.f32 %v3566_v47, %v3179_v56  ;;  %v5083_v56 = vpop.f32.mrf.mxu0 }
0x261f   :  { %v2941_v6 = vadd.f32 %v2935_v21, %v2914_v17 }
0x2620   :  { %v3188_v4 = vmax.f32 %v3180_v18, 0.0 }
0x2621   :  { %2959 = vrot.lane.b32.xlu2 %v2941_v6, %s3933_s21 }
0x2624   :  { %v2903_v20 = vpop.permute.xlu1 %2902 }
0x2625   :  { %v2915_v9 = vmul.f32 %v2903_v20, %v2885_v33  ;;  %v3182_v50 = vpop.f32.mrf.mxu1 }
0x2626   :  { %v3183_v45 = vadd.f32 %v3566_v47, %v3182_v50  ;;  %v3380_v47 = vmul.f32 %v4228_v28, %v4228_v28 }
0x2627   :  { %v2942_v36 = vadd.f32 %v2936_v55, %v2915_v9 }
0x2628   :  { %v3189_v46 = vmax.f32 %v3183_v45, 0.0 }
0x2629   :  { %2961 = vrot.lane.b32.xlu0 %v2942_v36, %s3933_s21 }
0x2663   :  { %v2954_v62 = vpop.permute.xlu2 %2953 }
0x2664   :  { %3518 = vmatmul.msk.f32.vlgmr.msra.gmra.mxu3 %vm222_vm6, %v2954_v62  ;;  %v2621_v62 = vadd.f32 %v3881_v61, %v2620_v7  ;;  %v5046_v7 = vld [vmem:[%s5406_s0 + $0x10] sm:$0xff] }
0x267b   :  { %v2960_v2 = vpop.permute.xlu2 %2959 }
0x2683   :  { %v2956_v51 = vpop.permute.xlu0 %2955 }
0x2684   :  { %3519 = vmatmul.msk.f32.gmra.mxu3 %vm222_vm6, %v2956_v51 }
0x268b   :  { %v2958_v41 = vpop.permute.xlu1 %2957 }
0x268c   :  { %3520 = vmatmul.msk.f32.gmra.mxu3 %vm222_vm6, %v2958_v41 }
0x2694   :  { %3521 = vmatmul.msk.f32.gmra.mxu3 %vm222_vm6, %v2960_v2 }
0x269b   :  { %v2962_v30 = vpop.permute.xlu0 %2961 }
0x269c   :  { %3522 = vmatmul.msk.f32.gmra.mxu3 %vm222_vm6, %v2962_v30  ;;  %vm3223_vm6 = vcmask 39936   ;;  %v5059_v30 = vld [vmem:[%s5406_s0 + $0x8] sm:$0xff] }
0x26a4   :  { %3207 = vmatmul.f32.vlgmr.msrb.gmra.mxu3 %v3185_v54  ;;  %v2677_v54 = vadd.f32 %v4946_v27, %v4944_v59 }
0x26ac   :  { %3210 = vmatmul.f32.gmra.mxu3 %v3186_v8 }
0x26b4   :  { %3213 = vmatmul.f32.gmra.mxu3 %v3187_v34  ;;  %v5085_v34 = vpop.f32.mrf.mxu0 }
0x26bc   :  { %3216 = vmatmul.f32.gmra.mxu3 %v3188_v4  ;;  %v5087_v18 = vpop.f32.mrf.mxu0 }
0x26c4   :  { %3219 = vmatmul.f32.gmra.mxu3 %v3189_v46  ;;  %v2694_v46 = vadd.f32 %v2677_v54, %v4960_v60 }
0x26e7   :  { %v2990_v58 = vpop.f32.mrf.mxu3 }
0x26e8   :  { %v3005_v38 = vadd.f32 %v2990_v58, %v4469_v16  ;;  %v5094_v58 = vpop.f32.mrf.mxu0 }
0x26ea   :  { %v3010_v17 = vmax.f32 %v3005_v38, 0.0 }
0x26ec   :  { %3031 = vmatmul.f32.vlgmr.msrb.gmra.mxu0 %v3010_v17  ;;  %v3512_v17 = vmul.f32 -1.442695, %v2694_v46 }
0x2707   :  { %v2993_v21 = vpop.f32.mrf.mxu3 }
0x2708   :  { %v3006_v6 = vadd.f32 %v2993_v21, %v4688_v12 }
0x270a   :  { %v3011_v33 = vmax.f32 %v3006_v6, 0.0 }
0x270c   :  { %3034 = vmatmul.f32.gmra.mxu0 %v3011_v33 }
0x270f   :  { %v2996_v20 = vpop.f32.mrf.mxu3 }
0x2710   :  { %v3007_v55 = vadd.f32 %v2996_v20, %v4805_v23 }
0x2712   :  { %v3012_v9 = vmax.f32 %v3007_v55, 0.0  ;;  %v5101_v55 = vld [vmem:[#allocation7 + $0x278] ss:$0 sm:$0xff] }
0x2713   :  { %v5111_v61 = vadd.f32 %v5101_v55, %v4554_v48 }
0x2714   :  { %3037 = vmatmul.f32.gmra.mxu0 %v3012_v9 }
0x2717   :  { %v2999_v36 = vpop.f32.mrf.mxu3 }
0x2718   :  { %v3008_v19 = vadd.f32 %v2999_v36, %v4941_v3 }
0x271a   :  { %v3013_v10 = vmax.f32 %v3008_v19, 0.0 }
0x271c   :  { %3040 = vmatmul.f32.gmra.mxu0 %v3013_v10 }
0x271f   :  { %v3002_v16 = vpop.f32.mrf.mxu3 }
0x2720   :  { %v3009_v22 = vadd.f32 %v3002_v16, %v2621_v62 }
0x2722   :  { %v3014_v39 = vmax.f32 %v3009_v22, 0.0 }
0x2724   :  { %3043 = vmatmul.f32.gmra.mxu0 %v3014_v39  ;;  %v5116_v39 = vadd.f32 %v5101_v55, %v4862_v24 }
0x2727   :  { %v3208_v12 = vpop.f32.mrf.mxu3 }
0x2728   :  { %v5025_v40 = vadd.f32 %v3567_v31, %v3208_v12 }
0x272a   :  { %v3224_v23 = vsel %vm3223_vm6, %v5025_v40, -inf  ;;  %v3313_v43 = vsub.f32 %v5025_v40, %v5059_v30 }
0x272b   :  { %3225 = vmax.xlane.f32.xlu1 %v3224_v23 }
0x272c   :  { %v3318_v13 = vmul.f32 %v3313_v43, %v3313_v43 }
0x272f   :  { %v3211_v52 = vpop.f32.mrf.mxu3 }
0x2730   :  { %v5029_v57 = vadd.f32 %v3567_v31, %v3211_v52 }
0x2732   :  { %v3227_v3 = vsel %vm3223_vm6, %v5029_v57, -inf  ;;  %v3314_v41 = vsub.f32 %v5029_v57, %v5046_v7 }
0x2733   :  { %3228 = vmax.xlane.f32.xlu2 %v3227_v3  ;;  %v1600_v3 = vand.u32 2147483647, %v5116_v39 }
0x2734   :  { %v3319_v2 = vmul.f32 %v3314_v41, %v3314_v41 }
0x2735   :  { %v1602_v41 = vsub.f32 0.0, %v1600_v3 }
0x2737   :  { %v3214_v32 = vpop.f32.mrf.mxu3 }
0x2738   :  { %v5033_v37 = vadd.f32 %v3567_v31, %v3214_v32 }
0x273a   :  { %v3230_v29 = vsel %vm3223_vm6, %v5033_v37, -inf  ;;  %v3315_v42 = vsub.f32 %v5033_v37, %v5070_v14 }
0x273b   :  { %3231 = vmax.xlane.f32.xlu0 %v3230_v29 }
0x273c   :  { %v3320_v8 = vmul.f32 %v3315_v42, %v3315_v42 }
0x273f   :  { %v3217_v1 = vpop.f32.mrf.mxu3 }
0x2740   :  { %v5037_v0 = vadd.f32 %v3567_v31, %v3217_v1  ;;  %v5131_v1 = vadd.f32 %v5101_v55, %v4864_v26 }
0x2742   :  { %v3233_v44 = vsel %vm3223_vm6, %v5037_v0, -inf  ;;  %v3316_v59 = vsub.f32 %v5037_v0, %v5078_v49 }
0x2743   :  { %3234 = vmax.xlane.f32.xlu2 %v3233_v44  ;;  %v5135_v44 = vadd.f32 %v5101_v55, %v4869_v15  ;;  %v5150_v15 = vadd.f32 %v5101_v55, %v4872_v25 }
0x2744   :  { %v3321_v27 = vmul.f32 %v3316_v59, %v3316_v59 }
0x2745   :  { %v2006_v25 = vand.u32 2147483647, %v5150_v15 }
0x2747   :  { %v3220_v53 = vpop.f32.mrf.mxu3 }
0x2748   :  { %v5041_v51 = vadd.f32 %v3567_v31, %v3220_v53  ;;  %v1275_v31 = vand.u32 2147483647, %v5111_v61 }
0x274a   :  { %v3236_v63 = vsel %vm3223_vm6, %v5041_v51, -inf  ;;  %v1276_v32 = vsub.f32 0.0, %v1275_v31 }
0x274b   :  { %3237 = vmax.xlane.f32.xlu1 %v3236_v63 }
0x274c   :  { %v1277_v63 = vmul.f32 1.442695, %v1276_v32 }
0x274f   :  { %3330 = vrot.lane.b32.xlu0 %v3319_v2, %s3937_s5  ;;  %v1601_v2 = vand.u32 2147483647, %v5131_v1 }
0x275b   :  { %3382 = vrot.lane.b32.xlu2 %v3380_v47, %s3931_s18  ;;  %v5141_v47 = vadd.f32 %v5101_v55, %v4866_v5  ;;  %v1603_v5 = vsub.f32 0.0, %v1601_v2 }
0x2763   :  { %3328 = vrot.lane.b32.xlu2 %v3318_v13, %s3937_s5  ;;  %v2005_v13 = vand.u32 2147483647, %v5135_v44 }
0x2764   :  { %2820 = vrot.lane.b32.xlu1 %v2677_v54, %s3932_s2 }
0x2769   :  { %v5103_v9 = vpop.f32.mrf.mxu0 }
0x276b   :  { %3332 = vrot.lane.b32.xlu2 %v3320_v8, %s3937_s5  ;;  %v1604_v8 = vmul.f32 1.442695, %v1602_v41  ;;  %v5164_v41 = vadd.f32 %v5101_v55, %v5083_v56 }
0x2773   :  { %3334 = vrot.lane.b32.xlu2 %v3321_v27, %s3937_s5 }
0x2789   :  { %v5121_v23 = vpop.f32.mrf.mxu0 }
0x278a   :  { %v5179_v56 = vadd.f32 %v5101_v55, %v5121_v23 }
0x2791   :  { %v3038_v54 = vpop.f32.mrf.mxu0 }
0x279e   :  { %v5089_v4 = vpop.xlane.xlu1 %3225 }
0x279f   :  { %v3239_v50 = vsub.f32 %v5025_v40, %v5089_v4 }
0x27a1   :  { %v3244_v45 = vmul.f32 1.442695, %v3239_v50  ;;  %v2004_v50 = vand.u32 2147483647, %v5141_v47 }
0x27a3   :  { %3766 = vpow2.f32 %v3244_v45 }
0x27a4   :  { %3768 = vpow2.f32 %v3512_v17  ;;  %v2008_v17 = vsub.f32 0.0, %v2005_v13  ;;  %v5174_v13 = vadd.f32 %v5101_v55, %v5087_v18  ;;  %v5186_v18 = vadd.f32 %v5101_v55, %v5103_v9 }
0x27a6   :  { %v5096_v38 = vpop.xlane.xlu2 %3228  ;;  %v2490_v9 = vand.u32 2147483647, %v5174_v13 }
0x27a7   :  { %v3240_v21 = vsub.f32 %v5029_v57, %v5096_v38 }
0x27a9   :  { %v3246_v6 = vmul.f32 1.442695, %v3240_v21  ;;  %v3767_v33 = vpop.eup %3766  ;;  %v1606_v21 = vmul.f32 1.442695, %v1603_v5  ;;  %v3379_v5 = vadd.f32 1.0, %v4228_v28 }
0x27aa   :  { %v3254_v20 = vsel %vm3223_vm6, %v3767_v33, 0.0  ;;  %v3769_v10 = vpop.eup %3768 }
0x27ab   :  { %3770 = vpow2.f32 %v3246_v6  ;;  %3255 = vadd.xlane.f32.xlu0 %v3254_v20  ;;  %v5119_v12 = vadd.f32 1.0, %v3769_v10  ;;  %v2007_v6 = vsub.f32 0.0, %v2004_v50  ;;  %v2009_v10 = vsub.f32 0.0, %v2006_v25 }
0x27ad   :  { %v2010_v31 = vmul.f32 1.442695, %v2007_v6  ;;  %v2014_v32 = vmul.f32 1.442695, %v2009_v10  ;;  %vm2729_vm11 = vweird.f32 %v5119_v12 }
0x27ae   :  { %v5105_v36 = vpop.xlane.xlu0 %3231 }
0x27af   :  { %v3241_v19 = vsub.f32 %v5033_v37, %v5105_v36 }
0x27b1   :  { %v3248_v62 = vmul.f32 1.442695, %v3241_v19  ;;  %v3771_v16 = vpop.eup %3770  ;;  %v2012_v19 = vmul.f32 1.442695, %v2008_v17 }
0x27b2   :  { %v3257_v22 = vsel %vm3223_vm6, %v3771_v16, 0.0  ;;  %v3041_v16 = vpop.f32.mrf.mxu0 }
0x27b3   :  { %3772 = vpow2.f32 %v3248_v62  ;;  %3258 = vadd.xlane.f32.xlu1 %v3257_v22 }
0x27b4   :  { %3774 = vrcp.f32 %v5119_v12 }
0x27b6   :  { %v5123_v52 = vpop.xlane.xlu2 %3234 }
0x27b7   :  { %v3242_v48 = vsub.f32 %v5037_v0, %v5123_v52 }
0x27b9   :  { %v3250_v24 = vmul.f32 1.442695, %v3242_v48  ;;  %v3773_v29 = vpop.eup %3772 }
0x27ba   :  { %v3260_v53 = vsel %vm3223_vm6, %v3773_v29, 0.0  ;;  %v5145_v26 = vpop.eup %3774  ;;  %v3044_v25 = vpop.f32.mrf.mxu0 }
0x27bb   :  { %3776 = vpow2.f32 %v3250_v24  ;;  %3261 = vadd.xlane.f32.xlu0 %v3260_v53  ;;  %v2725_v46 = vmul.f32 %v5145_v26, %v5119_v12  ;;  %v3386_v24 = vmul.f32 1.442695, %v4228_v28  ;;  %vm2730_vm10 = vweird.f32 %v5145_v26 }
0x27bc   :  { %3778 = vpow2.f32 %v1277_v63  ;;  %v5168_v63 = vadd.f32 %v5101_v55, %v5085_v34  ;;  %v2733_v34 = vand.u32 2147483647, %v5119_v12  ;;  %vm5189_vm12 = vmor %vm2729_vm11, %vm2730_vm10  ;;  %v5203_v28 = vadd.f32 %v5101_v55, %v5094_v58 }
0x27bd   :  { %v2726_v33 = vsub.f32 1.0, %v2725_v46 }
0x27be   :  { %v5143_v43 = vpop.xlane.xlu1 %3237  ;;  %v2489_v23 = vand.u32 2147483647, %v5168_v63  ;;  %vm2734_vm13 = vcmp.eq.f32.partialorder %v2733_v34, 8.507059e+37 }
0x27bf   :  { %v3243_v42 = vsub.f32 %v5041_v51, %v5143_v43  ;;  %v2727_v3 = vmul.f32 %v5145_v26, %v2726_v33 }
0x27c0   :  { %v2493_v58 = vsub.f32 0.0, %v2489_v23 }
0x27c1   :  { %v3777_v59 = vpop.eup %3776  ;;  %v3252_v27 = vmul.f32 1.442695, %v3243_v42  ;;  %v2728_v2 = vadd.f32 %v5145_v26, %v2727_v3  ;;  %v2735_v42 = vand.u32 2147483648, %v5119_v12  ;;  %v3383_v12 = vpop.permute.xlu2 %3382  ;;  %v5214_v3 = vadd.f32 %v5101_v55, %v3044_v25 }
0x27c2   :  { %v3263_v45 = vsel %vm3223_vm6, %v3777_v59, 0.0  ;;  %v3779_v20 = vpop.eup %3778 }
0x27c3   :  { %3780 = vpow2.f32 %v3252_v27  ;;  %3264 = vadd.xlane.f32.xlu1 %v3263_v45  ;;  %v1279_v29 = vadd.f32 1.0, %v3779_v20  ;;  %v2488_v27 = vand.u32 2147483647, %v5164_v41  ;;  %v5195_v45 = vadd.f32 %v5101_v55, %v3038_v54 }
0x27c4   :  { %3782 = vpow2.f32 %v1604_v8  ;;  %v2732_v46 = vsel %vm5189_vm12, %v5145_v26, %v2728_v2  ;;  %v3053_v20 = vand.u32 2147483647, %v5179_v56  ;;  %v5207_v54 = vadd.f32 %v5101_v55, %v3041_v16  ;;  %v5219_v16 = vld [vmem:[%s5406_s0 + $0x28] sm:$0xff]  ;;  %s3938_s0 = smov 120  }
0x27c5   :  { %3784 = vpow2.f32 %v1606_v21  ;;  %v2736_v21 = vor.u32 1.1754944e-38, %v2735_v42  ;;  %v2492_v10 = vsub.f32 0.0, %v2488_v27  ;;  %v3052_v26 = vand.u32 2147483647, %v5186_v18 }
0x27c6   :  { %3786 = vpow2.f32 %v2012_v19  ;;  %v2494_v2 = vsub.f32 0.0, %v2490_v9  ;;  %v2491_v42 = vand.u32 2147483647, %v5203_v28  ;;  %v3055_v27 = vand.u32 2147483647, %v5207_v54 }
0x27c7   :  { %3788 = vpow2.f32 %v2010_v31  ;;  %v3057_v50 = vsub.f32 0.0, %v3052_v26  ;;  %v3056_v9 = vand.u32 2147483647, %v5214_v3 }
0x27c8   :  { %3790 = vpow2.f32 %v2014_v32 }
0x27c9   :  { %v3781_v62 = vpop.eup %3780  ;;  %3792 = vpow2.f32 %v3386_v24  ;;  %v3317_v24 = vsub.f32 %v5041_v51, %v5219_v16 }
0x27ca   :  { %v3783_v22 = vpop.eup %3782  ;;  %v3266_v48 = vsel %vm3223_vm6, %v3781_v62, 0.0  ;;  %3794 = vlog2.f32 %v1279_v29  ;;  %v3385_v62 = vsub.f32 %v3379_v5, %v3383_v12  ;;  %v2496_v5 = vmul.f32 1.442695, %v2492_v10 }
0x27cb   :  { %3267 = vadd.xlane.f32.xlu0 %v3266_v48  ;;  %v1608_v53 = vadd.f32 1.0, %v3783_v22  ;;  %v3785_v8 = vpop.eup %3784  ;;  %v5210_v22 = vsel %vm2734_vm13, %v2736_v21, %v2732_v46  ;;  %v3054_v48 = vand.u32 2147483647, %v5195_v45  ;;  %v2498_v12 = vmul.f32 1.442695, %v2493_v58 }
0x27cc   :  { %v3787_v59 = vpop.eup %3786  ;;  %v1609_v17 = vadd.f32 1.0, %v3785_v8  ;;  %v3322_v25 = vmul.f32 %v3317_v24, %v3317_v24  ;;  %v2500_v21 = vmul.f32 1.442695, %v2494_v2 }
0x27cd   :  { %3796 = vlog2.f32 %v1608_v53  ;;  %v3789_v6 = vpop.eup %3788  ;;  %v2017_v33 = vadd.f32 1.0, %v3787_v59  ;;  %v3058_v59 = vsub.f32 0.0, %v3053_v20  ;;  %v3059_v46 = vsub.f32 0.0, %v3054_v48 }
0x27ce   :  { %v3791_v19 = vpop.eup %3790  ;;  %v2016_v53 = vadd.f32 1.0, %v3789_v6  ;;  %3798 = vlog2.f32 %v1609_v17  ;;  %v2495_v6 = vsub.f32 0.0, %v2491_v42 }
0x27cf   :  { %v3793_v31 = vpop.eup %3792  ;;  %v2018_v55 = vadd.f32 1.0, %v3791_v19  ;;  %3800 = vlog2.f32 %v2017_v33  ;;  %v3064_v17 = vmul.f32 1.442695, %v3058_v59  ;;  %v3060_v19 = vsub.f32 0.0, %v3055_v27 }
0x27d0   :  { %v3795_v29 = vpop.eup %3794  ;;  %v3388_v23 = vsub.f32 %v3385_v62, %v3793_v31  ;;  %3802 = vlog2.f32 %v2016_v53  ;;  %v3062_v33 = vmul.f32 1.442695, %v3057_v50  ;;  %v3066_v26 = vmul.f32 1.442695, %v3059_v46 }
0x27d1   :  { %3804 = vlog2.f32 %v2018_v55  ;;  %v3061_v62 = vsub.f32 0.0, %v3056_v9  ;;  %v2502_v58 = vmul.f32 1.442695, %v2495_v6  ;;  %v3068_v48 = vmul.f32 1.442695, %v3060_v19 }
0x27d2   :  { %3806 = vpow2.f32 %v2496_v5  ;;  %v3389_v20 = vmul.f32 %v3388_v23, %v4225_v35  ;;  %v2002_v59 = vmax.f32 %v5135_v44, 0.0  ;;  %v2001_v23 = vmax.f32 %v5141_v47, 0.0 }
0x27d3   :  { %v5225_v34 = vpop.eup %3796  ;;  %3808 = vpow2.f32 %v2498_v12  ;;  %v3070_v53 = vmul.f32 1.442695, %v3061_v62 }
0x27d4   :  { %v3799_v10 = vpop.eup %3798  ;;  %3810 = vpow2.f32 %v2500_v21  ;;  %v1281_v21 = vmul.f32 0.6931472, %v3795_v29 }
0x27d5   :  { %v3801_v31 = vpop.eup %3800  ;;  %3812 = vpow2.f32 %v3064_v17 }
0x27d6   :  { %v2821_v32 = vpop.permute.xlu1 %2820  ;;  %3814 = vpow2.f32 %v3062_v33  ;;  %v2022_v42 = vmul.f32 0.6931472, %v3801_v31  ;;  %v3887_v33 = vld [vmem:[%s5407_s1 + $0x98] sm:$0xff] }
0x27d7   :  { %v2838_v8 = vmul.f32 %v2821_v32, %v5210_v22  ;;  %v3803_v32 = vpop.eup %3802  ;;  %3816 = vpow2.f32 %v3066_v26  ;;  %v2003_v26 = vmax.f32 %v5150_v15, 0.0 }
0x27d8   :  { %v3805_v24 = vpop.eup %3804  ;;  %3818 = vpow2.f32 %v2502_v58  ;;  %v2020_v55 = vmul.f32 0.6931472, %v3803_v32  ;;  %v2026_v12 = vadd.f32 %v2022_v42, %v2002_v59  ;;  %v1613_v58 = vmul.f32 0.6931472, %v3799_v10 }
0x27d9   :  { %2850 = vrot.lane.b32.xlu2 %v2838_v8, %s3932_s2  ;;  %v3807_v2 = vpop.eup %3806  ;;  %3820 = vpow2.f32 %v3068_v48  ;;  %v2024_v46 = vmul.f32 0.6931472, %v3805_v24  ;;  %v3888_v48 = vld [vmem:[%s5407_s1 + $0x90] sm:$0xff] }
0x27da   :  { %v3809_v35 = vpop.eup %3808  ;;  %v2504_v5 = vadd.f32 1.0, %v3807_v2  ;;  %3822 = vpow2.f32 %v3070_v53  ;;  %v2025_v19 = vadd.f32 %v2020_v55, %v2001_v23  ;;  %v2028_v29 = vmul.f32 %v3888_v48, %v5141_v47  ;;  %v3889_v55 = vld [vmem:[%s5407_s1 + $0xa0] sm:$0xff] }
0x27db   :  { %v3811_v8 = vpop.eup %3810  ;;  %v2505_v9 = vadd.f32 1.0, %v3809_v35  ;;  %v2027_v53 = vadd.f32 %v2024_v46, %v2003_v26  ;;  %v1599_v35 = vmax.f32 %v5131_v1, 0.0  ;;  %v2030_v47 = vmul.f32 %v3889_v55, %v5150_v15  ;;  %v3890_v15 = vld [vmem:[%s5407_s1 + $0x68] sm:$0xff] }
0x27dc   :  { %3336 = vrot.lane.b32.xlu1 %v3322_v25, %s3937_s5  ;;  %v3813_v27 = vpop.eup %3812  ;;  %v2506_v6 = vadd.f32 1.0, %v3811_v8  ;;  %3824 = vlog2.f32 %v2504_v5  ;;  %v2031_v10 = vsub.f32 %v2028_v29, %v2025_v19  ;;  %v1598_v5 = vmax.f32 %v5116_v39, 0.0 }
0x27dd   :  { %v3815_v50 = vpop.eup %3814  ;;  %v3073_v62 = vadd.f32 1.0, %v3813_v27  ;;  %3826 = vlog2.f32 %v2505_v9  ;;  %v1274_v27 = vmax.f32 %v5111_v61, 0.0  ;;  %v2033_v23 = vsub.f32 %v2030_v47, %v2027_v53 }
0x27de   :  { %v3817_v25 = vpop.eup %3816  ;;  %v3072_v32 = vadd.f32 1.0, %v3815_v50  ;;  %3828 = vlog2.f32 %v2506_v6  ;;  %v1615_v50 = vadd.f32 %v1613_v58, %v1599_v35  ;;  %v5258_v6 = vld [vmem:[#allocation7 + $0x290] sm:$0xff] }
0x27df   :  { %3391 = vrot.lane.b32.xlu0 %v3389_v20, %s3938_s0  ;;  %v3819_v17 = vpop.eup %3818  ;;  %v2029_v20 = vmul.f32 %v3887_v33, %v5135_v44  ;;  %v3074_v2 = vadd.f32 1.0, %v3817_v25  ;;  %v1611_v44 = vmul.f32 0.6931472, %v5225_v34  ;;  %3830 = vlog2.f32 %v3073_v62  ;;  %v5251_v34 = vld [vmem:[#allocation7 + $0x288] sm:$0xff] }
0x27e0   :  { %v3821_v31 = vpop.eup %3820  ;;  %v2507_v8 = vadd.f32 1.0, %v3819_v17  ;;  %3832 = vlog2.f32 %v3072_v32  ;;  %v1617_v25 = vmul.f32 %v3890_v15, %v5131_v1  ;;  %v5260_v19 = vadd.f32 %v1281_v21, %v1274_v27  ;;  %v3893_v21 = vld [vmem:[%s5407_s1 + $0x60] sm:$0xff] }
0x27e1   :  { %v2032_v24 = vsub.f32 %v2029_v20, %v2026_v12  ;;  %v3823_v42 = vpop.eup %3822  ;;  %v3075_v59 = vadd.f32 1.0, %v3821_v31  ;;  %3834 = vlog2.f32 %v3074_v2  ;;  %v5262_v33 = vadd.f32 %v1611_v44, %v1598_v5  ;;  %v5264_v20 = vld [vmem:[#allocation7 + $0x280] sm:$0xff]  ;;  %v3892_v31 = vld [vmem:[%s5407_s1 + $0x30] sm:$0xff] }
0x27e2   :  { %v3076_v12 = vadd.f32 1.0, %v3823_v42  ;;  %v3825_v9 = vpop.eup %3824  ;;  %3836 = vlog2.f32 %v2507_v8  ;;  %v2034_v26 = vmul.f32 %v5264_v20, %v2031_v10  ;;  %v5271_v1 = vmul.f32 %v3892_v31, %v5111_v61 }
0x27e3   :  { %v2035_v46 = vmul.f32 %v2032_v24, %v5251_v34  ;;  %v3827_v17 = vpop.eup %3826  ;;  %3838 = vlog2.f32 %v3075_v59  ;;  %v1619_v58 = vsub.f32 %v1617_v25, %v1615_v50  ;;  %v5277_v29 = vmul.f32 %v3893_v21, %v5116_v39 }
0x27e4   :  { %v3829_v62 = vpop.eup %3828  ;;  %3840 = vlog2.f32 %v3076_v12  ;;  %v2036_v32 = vmul.f32 %v2033_v23, %v5258_v6  ;;  %v2511_v42 = vmul.f32 0.6931472, %v3827_v17  ;;  %v2037_v44 = vsel %vm1286_vm14, %v2034_v26, 0.0 }
0x27e5   :  { %v3831_v48 = vpop.eup %3830  ;;  %v2038_v24 = vsel %vm1286_vm14, %v2035_v46, 0.0  ;;  %v1618_v61 = vsub.f32 %v5277_v29, %v5262_v33  ;;  %v1284_v35 = vsub.f32 %v5271_v1, %v5260_v19  ;;  %v2509_v10 = vmul.f32 0.6931472, %v3825_v9  ;;  %v3894_v46 = vld [vmem:[%s5407_s1 + $0xc0] sm:$0xff] }
0x27e6   :  { %v3833_v53 = vpop.eup %3832  ;;  %v3080_v39 = vmul.f32 0.6931472, %v3831_v48  ;;  %v2039_v55 = vadd.f32 %v2038_v24, %v2037_v44  ;;  %v5287_v47 = vmul.f32 %v1619_v58, %v5251_v34  ;;  %v2485_v27 = vmax.f32 %v5168_v63, 0.0 }
0x27e7   :  { %v3835_v2 = vpop.eup %3834  ;;  %v2513_v5 = vmul.f32 0.6931472, %v3829_v62  ;;  %v3078_v50 = vmul.f32 0.6931472, %v3833_v53  ;;  %v2040_v23 = vsel %vm1286_vm14, %v2036_v32, 0.0  ;;  %v2484_v12 = vmax.f32 %v5164_v41, 0.0 }
0x27e8   :  { %v3837_v8 = vpop.eup %3836  ;;  %v2520_v9 = vmul.f32 %v3894_v46, %v5164_v41  ;;  %v3048_v15 = vmax.f32 %v5179_v56, 0.0  ;;  %v3082_v25 = vmul.f32 0.6931472, %v3835_v2  ;;  %v2517_v19 = vadd.f32 %v2511_v42, %v2485_v27  ;;  %v3895_v32 = vld [vmem:[%s5407_s1 + $0xc8] sm:$0xff]  ;;  %v3896_v42 = vld [vmem:[%s5407_s1 + $0xf8] sm:$0xff]  ;;  %v3897_v27 = vld [vmem:[%s5407_s1 + $0xd0] sm:$0xff] }
0x27e9   :  { %v3839_v59 = vpop.eup %3838  ;;  %v2486_v26 = vmax.f32 %v5174_v13, 0.0  ;;  %v2515_v31 = vmul.f32 0.6931472, %v3837_v8  ;;  %v3047_v62 = vmax.f32 %v5186_v18, 0.0  ;;  %v2516_v1 = vadd.f32 %v2509_v10, %v2484_v12 }
0x27ea   :  { %v3841_v17 = vpop.eup %3840  ;;  %v3088_v58 = vadd.f32 %v3080_v39, %v3048_v15  ;;  %v3049_v48 = vmax.f32 %v5195_v45, 0.0  ;;  %v3084_v21 = vmul.f32 0.6931472, %v3839_v59  ;;  %v2521_v41 = vmul.f32 %v3895_v32, %v5168_v63 }
0x27eb   :  { %v2518_v24 = vadd.f32 %v2513_v5, %v2486_v26  ;;  %v2487_v53 = vmax.f32 %v5203_v28, 0.0  ;;  %v3087_v2 = vadd.f32 %v3078_v50, %v3047_v62  ;;  %v3093_v44 = vmul.f32 %v3896_v42, %v5179_v56  ;;  %v3898_v50 = vld [vmem:[%s5407_s1 + $0xf0] sm:$0xff]  ;;  %v3899_v56 = vld [vmem:[%s5407_s1 + $0x100] sm:$0xff] }
0x27ec   :  { %v3089_v8 = vadd.f32 %v3082_v25, %v3049_v48  ;;  %v3050_v10 = vmax.f32 %v5207_v54, 0.0  ;;  %v3086_v39 = vmul.f32 0.6931472, %v3841_v17  ;;  %v2525_v59 = vsub.f32 %v2521_v41, %v2517_v19  ;;  %v3901_v48 = vld [vmem:[%s5407_s1 + $0x108] sm:$0xff]  ;;  %v3902_v41 = vld [vmem:[%s5407_s1 + $0x110] sm:$0xff] }
0x27ed   :  { %v2522_v63 = vmul.f32 %v3897_v27, %v5174_v13  ;;  %v2519_v5 = vadd.f32 %v2515_v31, %v2487_v53  ;;  %v3092_v12 = vmul.f32 %v3898_v50, %v5186_v18  ;;  %v3098_v46 = vsub.f32 %v3093_v44, %v3088_v58  ;;  %v3900_v13 = vld [vmem:[%s5407_s1 + $0xd8] sm:$0xff] }
0x27ee   :  { %v3094_v15 = vmul.f32 %v3899_v56, %v5195_v45  ;;  %v3090_v25 = vadd.f32 %v3084_v21, %v3050_v10  ;;  %v3051_v17 = vmax.f32 %v5214_v3, 0.0  ;;  %v2524_v19 = vsub.f32 %v2520_v9, %v2516_v1  ;;  %v5351_v10 = vld [vmem:[#allocation7 + $0x2a0] sm:$0xff] }
0x27ef   :  { %v2526_v26 = vsub.f32 %v2522_v63, %v2518_v24  ;;  %v2523_v31 = vmul.f32 %v3900_v13, %v5203_v28  ;;  %v2041_v62 = vadd.f32 %v2040_v23, %v2039_v55  ;;  %v3097_v18 = vsub.f32 %v3092_v12, %v3087_v2  ;;  %v5337_v55 = vld [vmem:[#allocation7 + $0x298] sm:$0xff] }
0x27f0   :  { %v3099_v58 = vsub.f32 %v3094_v15, %v3089_v8  ;;  %v3095_v45 = vmul.f32 %v3901_v48, %v5207_v54  ;;  %v3091_v21 = vadd.f32 %v3086_v39, %v3051_v17  ;;  %v1285_v9 = vmul.f32 %v5264_v20, %v1284_v35 }
0x27f1   :  { %v2527_v32 = vsub.f32 %v2523_v31, %v2519_v5  ;;  %v2529_v1 = vmul.f32 %v2525_v59, %v5251_v34  ;;  %v3096_v28 = vmul.f32 %v3902_v41, %v5214_v3  ;;  %v1620_v54 = vmul.f32 %v5264_v20, %v1618_v61 }
0x27f2   :  { %v3100_v23 = vsub.f32 %v3095_v45, %v3090_v25  ;;  %v3103_v24 = vmul.f32 %v3098_v46, %v5251_v34  ;;  %v2528_v35 = vmul.f32 %v5264_v20, %v2524_v19  ;;  %v2530_v53 = vmul.f32 %v2526_v26, %v5258_v6  ;;  %v3329_v45 = vpop.permute.xlu2 %3328 }
0x27f3   :  { %v3102_v2 = vmul.f32 %v5264_v20, %v3097_v18  ;;  %v3104_v42 = vmul.f32 %v3099_v58, %v5258_v6  ;;  %v3101_v3 = vsub.f32 %v3096_v28, %v3091_v21  ;;  %v1623_v44 = vsel %vm1286_vm14, %v5287_v47, 0.0 }
0x27f4   :  { %v2531_v8 = vmul.f32 %v2527_v32, %v5337_v55  ;;  %v1287_v33 = vsel %vm1286_vm14, %v1285_v9, 0.0  ;;  %v2533_v29 = vsel %vm1286_vm14, %v2529_v1, 0.0  ;;  %v3105_v61 = vmul.f32 %v3100_v23, %v5337_v55 }
0x27f5   :  { %v1622_v39 = vsel %vm1286_vm14, %v1620_v54, 0.0  ;;  %v3108_v20 = vsel %vm1286_vm14, %v3103_v24, 0.0  ;;  %v2532_v27 = vsel %vm1286_vm14, %v2528_v35, 0.0  ;;  %v2535_v47 = vsel %vm1286_vm14, %v2530_v53, 0.0 }
0x27f6   :  { %v1624_v59 = vadd.f32 %v1623_v44, %v1622_v39  ;;  %v3106_v63 = vmul.f32 %v3101_v3, %v5351_v10  ;;  %v2534_v5 = vadd.f32 %v2533_v29, %v2532_v27  ;;  %v3107_v50 = vsel %vm1286_vm14, %v3102_v2, 0.0 }
0x27f7   :  { %v3110_v12 = vsel %vm1286_vm14, %v3104_v42, 0.0  ;;  %v2537_v46 = vsel %vm1286_vm14, %v2531_v8, 0.0  ;;  %v3109_v56 = vadd.f32 %v3108_v20, %v3107_v50  ;;  %v3112_v25 = vsel %vm1286_vm14, %v3105_v61, 0.0 }
0x27f8   :  { %v2536_v15 = vadd.f32 %v2535_v47, %v2534_v5  ;;  %v3114_v19 = vsel %vm1286_vm14, %v3106_v63, 0.0 }
0x27f9   :  { %v3111_v17 = vadd.f32 %v3110_v12, %v3109_v56  ;;  %v120_v12 = vld [vmem:[#allocation7 + $0x2a8] sm:$0xff] }
0x27fa   :  { %v2538_v26 = vadd.f32 %v2537_v46, %v2536_v15  ;;  %v3333_v24 = vpop.permute.xlu2 %3332 }
0x27fb   :  { %v3113_v13 = vadd.f32 %v3112_v25, %v3111_v17 }
0x27fd   :  { %v3115_v31 = vadd.f32 %v3114_v19, %v3113_v13 }
0x2802   :  { %2042 = vadd.xlane.f32.xlu2 %v2041_v62  ;;  %v3331_v62 = vpop.permute.xlu0 %3330  ;;  %v3335_v20 = vpop.permute.xlu2 %3334 }
0x2806   :  { %1288 = vadd.xlane.f32.xlu1 %v1287_v33 }
0x2809   :  { %1625 = vadd.xlane.f32.xlu0 %v1624_v59 }
0x280e   :  { %2539 = vadd.xlane.f32.xlu1 %v2538_v26 }
0x2811   :  { %3116 = vadd.xlane.f32.xlu0 %v3115_v31 }
0x281e   :  { %v3256_v18 = vpop.xlane.xlu0 %3255 }
0x2826   :  { %v3259_v58 = vpop.xlane.xlu1 %3258 }
0x2827   :  { %3842 = vlog2.f32 %v3259_v58 }
0x2828   :  { %3844 = vlog2.f32 %v3256_v18 }
0x282d   :  { %v3843_v21 = vpop.eup %3842 }
0x282e   :  { %v3262_v48 = vpop.xlane.xlu0 %3261  ;;  %v3845_v32 = vpop.eup %3844  ;;  %v3272_v1 = vmul.f32 0.6931472, %v3843_v21 }
0x282f   :  { %3846 = vlog2.f32 %v3262_v48  ;;  %v3270_v28 = vmul.f32 0.6931472, %v3845_v32 }
0x2830   :  { %v3280_v54 = vadd.f32 %v3272_v1, %v5096_v38 }
0x2831   :  { %v3279_v35 = vadd.f32 %v3270_v28, %v5089_v4 }
0x2832   :  { %v3285_v42 = vsub.f32 %v5029_v57, %v3280_v54  ;;  %v3343_v57 = vmul.f32 %v3329_v45, %v5251_v34  ;;  %v3346_v34 = vmul.f32 %v3335_v20, %v5351_v10 }
0x2833   :  { %v3284_v8 = vsub.f32 %v5025_v40, %v3279_v35 }
0x2834   :  { %v3290_v61 = vmul.f32 %v5046_v7, %v3285_v42  ;;  %v3353_v46 = vsel %vm1286_vm14, %v3346_v34, 0.0 }
0x2835   :  { %v3847_v9 = vpop.eup %3846  ;;  %v3289_v4 = vmul.f32 %v5059_v30, %v3284_v8 }
0x2836   :  { %v3265_v41 = vpop.xlane.xlu1 %3264  ;;  %v3274_v23 = vmul.f32 0.6931472, %v3847_v9  ;;  %v3295_v59 = vsel %vm3223_vm6, %v3290_v61, 0.0 }
0x2837   :  { %3848 = vlog2.f32 %v3265_v41  ;;  %v3294_v7 = vsel %vm3223_vm6, %v3289_v4, 0.0 }
0x2838   :  { %v3281_v53 = vadd.f32 %v3274_v23, %v5105_v36  ;;  %v3296_v47 = vadd.f32 %v3295_v59, %v3294_v7 }
0x283a   :  { %v3286_v33 = vsub.f32 %v5033_v37, %v3281_v53  ;;  %v3344_v37 = vmul.f32 %v3331_v62, %v5258_v6 }
0x283c   :  { %v3291_v36 = vmul.f32 %v5070_v14, %v3286_v33  ;;  %v3348_v14 = vsel %vm1286_vm14, %v3343_v57, 0.0  ;;  %v3349_v5 = vsel %vm1286_vm14, %v3344_v37, 0.0 }
0x283d   :  { %v3849_v2 = vpop.eup %3848  ;;  %v3350_v50 = vadd.f32 %v3349_v5, %v3348_v14 }
0x283e   :  { %v3276_v3 = vmul.f32 0.6931472, %v3849_v2  ;;  %v3268_v44 = vpop.xlane.xlu0 %3267  ;;  %v3297_v30 = vsel %vm3223_vm6, %v3291_v36, 0.0 }
0x283f   :  { %3850 = vlog2.f32 %v3268_v44 }
0x2840   :  { %v3282_v29 = vadd.f32 %v3276_v3, %v5123_v52  ;;  %v3345_v52 = vmul.f32 %v3333_v24, %v5337_v55  ;;  %v3298_v55 = vadd.f32 %v3297_v30, %v3296_v47 }
0x2842   :  { %v3287_v38 = vsub.f32 %v5037_v0, %v3282_v29  ;;  %v3351_v6 = vsel %vm1286_vm14, %v3345_v52, 0.0 }
0x2843   :  { %v3352_v15 = vadd.f32 %v3351_v6, %v3350_v50 }
0x2844   :  { %v3292_v40 = vmul.f32 %v5078_v49, %v3287_v38 }
0x2845   :  { %v3851_v39 = vpop.eup %3850  ;;  %v3354_v19 = vadd.f32 %v3353_v46, %v3352_v15 }
0x2846   :  { %v3278_v27 = vmul.f32 0.6931472, %v3851_v39  ;;  %v3299_v49 = vsel %vm3223_vm6, %v3292_v40, 0.0 }
0x2847   :  { %v3300_v56 = vadd.f32 %v3299_v49, %v3298_v55 }
0x2848   :  { %v3283_v0 = vadd.f32 %v3278_v27, %v5143_v43 }
0x284a   :  { %v3288_v63 = vsub.f32 %v5041_v51, %v3283_v0 }
0x284c   :  { %v3293_v43 = vmul.f32 %v5219_v16, %v3288_v63  ;;  %v2851_v16 = vpop.permute.xlu2 %2850 }
0x284d   :  { %v2868_v18 = vadd.f32 %v2851_v16, %v4960_v60 }
0x284e   :  { %v3337_v25 = vpop.permute.xlu1 %3336  ;;  %v3301_v10 = vsel %vm3223_vm6, %v3293_v43, 0.0 }
0x284f   :  { %v3347_v17 = vmul.f32 %v3337_v25, %v120_v12  ;;  %v3302_v51 = vadd.f32 %v3301_v10, %v3300_v56  ;;  %3852 = vtanh.f32 %v2868_v18 }
0x2851   :  { %v3355_v26 = vsel %vm1286_vm14, %v3347_v17, 0.0  ;;  %v3392_v13 = vpop.permute.xlu0 %3391  ;;  %3303 = vadd.xlane.f32.xlu2 %v3302_v51 }
0x2852   :  { %v3356_v31 = vadd.f32 %v3355_v26, %v3354_v19  ;;  %v3394_v62 = vsel %vm902_vm8, %v3392_v13, 0.0  ;;  %v2880_v13 = vsub.f32 1.0, %v5210_v22 }
0x2853   :  { %3395 = vadd.xlane.f32.xlu0 %v3394_v62 }
0x2854   :  { %3357 = vadd.xlane.f32.xlu1 %v3356_v31 }
0x2855   :  { %v3853_v58 = vpop.eup %3852 }
0x2869   :  { %2892 = vrot.lane.b32.xlu2 %v3853_v58, %s3933_s21  ;;  %v3939_v58 = vmov 100.0  }
0x286a   :  { %3854 = vrcp.f32 %v3939_v58 }
0x286d   :  { %2916 = vrot.lane.b32.xlu1 %v4923_v11, %s3934_s7 }
0x2875   :  { %v2043_v48 = vpop.xlane.xlu2 %2042 }
0x2876   :  { %v2044_v45 = vrot.slane %v2043_v48, 4 }
0x2878   :  { %v2045_v21 = vadd.f32 %v2044_v45, %v2043_v48  ;;  %v3855_v48 = vpop.eup %3854 }
0x2879   :  { %v1289_v32 = vpop.xlane.xlu1 %1288  ;;  %v3369_v45 = vmul.f32 100.0, %v3855_v48  ;;  %vm3373_vm8 = vweird.f32 %v3855_v48 }
0x287a   :  { %v1290_v9 = vrot.slane %v1289_v32, 4  ;;  %v2046_v1 = vrot.slane %v2045_v21, 2 }
0x287c   :  { %v1291_v41 = vadd.f32 %v1290_v9, %v1289_v32  ;;  %v1626_v28 = vpop.xlane.xlu0 %1625  ;;  %v2047_v60 = vadd.f32 %v2046_v1, %v2045_v21  ;;  %v3370_v21 = vsub.f32 1.0, %v3369_v45 }
0x287d   :  { %v1627_v23 = vrot.slane %v1626_v28, 4 }
0x287e   :  { %v1292_v54 = vrot.slane %v1291_v41, 2  ;;  %v2048_v29 = vrot.slane %v2047_v60, 1  ;;  %v3371_v1 = vmul.f32 %v3855_v48, %v3370_v21 }
0x287f   :  { %v1628_v24 = vadd.f32 %v1627_v23, %v1626_v28 }
0x2880   :  { %v1293_v35 = vadd.f32 %v1292_v54, %v1291_v41  ;;  %v2049_v57 = vadd.f32 %v2048_v29, %v2047_v60  ;;  %v3372_v23 = vadd.f32 %v3855_v48, %v3371_v1 }
0x2881   :  { %v1629_v53 = vrot.slane %v1628_v24, 2  ;;  %v2540_v2 = vpop.xlane.xlu1 %2539 }
0x2882   :  { %v2541_v42 = vrot.slane %v2540_v2, 4  ;;  %v1294_v3 = vrot.slane %v1293_v35, 1 }
0x2883   :  { %v1630_v44 = vadd.f32 %v1629_v53, %v1628_v24 }
0x2884   :  { %v2542_v8 = vadd.f32 %v2541_v42, %v2540_v2  ;;  %v3117_v11 = vpop.xlane.xlu0 %3116  ;;  %v1295_v33 = vadd.f32 %v1294_v3, %v1293_v35  ;;  %v3374_v35 = vsel %vm3373_vm8, %v3855_v48, %v3372_v23 }
0x2885   :  { %v3118_v61 = vrot.slane %v3117_v11, 4  ;;  %v1631_v38 = vrot.slane %v1630_v44, 1 }
0x2886   :  { %v2543_v4 = vrot.slane %v2542_v8, 2  ;;  %3528 = vpush %v1295_v33 }
0x2887   :  { %v3119_v36 = vadd.f32 %v3118_v61, %v3117_v11  ;;  %v1632_v39 = vadd.f32 %v1631_v38, %v1630_v44 }
0x2888   :  { %v2544_v20 = vadd.f32 %v2543_v4, %v2542_v8 }
0x2889   :  { %v3120_v59 = vrot.slane %v3119_v36, 2  ;;  %3530 = vpush %v1632_v39 }
0x288a   :  { %3532 = vpush %v2049_v57  ;;  %v2545_v40 = vrot.slane %v2544_v20, 1 }
0x288b   :  { %v3121_v27 = vadd.f32 %v3120_v59, %v3119_v36 }
0x288c   :  { %v2546_v37 = vadd.f32 %v2545_v40, %v2544_v20 }
0x288d   :  { %v3122_v52 = vrot.slane %v3121_v27, 1 }
0x288e   :  { %3534 = vpush %v2546_v37 }
0x288f   :  { %v3123_v7 = vadd.f32 %v3122_v52, %v3121_v27 }
0x2891   :  { %3536 = vpush %v3123_v7 }
0x28b7   :  { %s3529_s1 = spop %3528 }
0x28b8   :  { %v1297_v9 = vstv %s3529_s1 }
0x28ba   :  { %s3531_s7 = spop %3530 }
0x28bb   :  { %v1634_v32 = vstv %s3531_s7  ;;  %s3533_s16 = spop %3532 }
0x28bc   :  { %v1635_v41 = vadd.f32 %v1634_v32, %v1297_v9  ;;  %v2051_v28 = vstv %s3533_s16 }
0x28be   :  { %v2052_v54 = vadd.f32 %v2051_v28, %v1635_v41 }
0x28bf   :  { %s3535_s17 = spop %3534 }
0x28c2   :  { %s3537_s19 = spop %3536 }
0x28c3   :  { %v3125_v2 = vstv %s3537_s19 }
0x28c4   :  { %v3304_v0 = vpop.xlane.xlu2 %3303 }
0x28c5   :  { %v3305_v30 = vrot.slane %v3304_v0, 4 }
0x28c6   :  { %v3396_v14 = vpop.xlane.xlu0 %3395 }
0x28c7   :  { %v3306_v34 = vadd.f32 %v3305_v30, %v3304_v0  ;;  %v3397_v47 = vrot.slane %v3396_v14, 4  ;;  %v3358_v63 = vpop.xlane.xlu1 %3357 }
0x28c8   :  { %v3359_v49 = vrot.slane %v3358_v63, 4 }
0x28c9   :  { %v3307_v5 = vrot.slane %v3306_v34, 2  ;;  %v3398_v6 = vadd.f32 %v3397_v47, %v3396_v14 }
0x28ca   :  { %v3360_v55 = vadd.f32 %v3359_v49, %v3358_v63 }
0x28cb   :  { %v3399_v50 = vrot.slane %v3398_v6, 2  ;;  %v3308_v12 = vadd.f32 %v3307_v5, %v3306_v34 }
0x28cc   :  { %v3361_v43 = vrot.slane %v3360_v55, 2  ;;  %v2893_v26 = vpop.permute.xlu2 %2892 }
0x28cd   :  { %v3309_v46 = vrot.slane %v3308_v12, 1  ;;  %v3400_v56 = vadd.f32 %v3399_v50, %v3398_v6  ;;  %v2910_v62 = vmul.f32 %v2893_v26, %v2880_v13 }
0x28ce   :  { %v3362_v15 = vadd.f32 %v3361_v43, %v3360_v55 }
0x28cf   :  { %v3310_v25 = vadd.f32 %v3309_v46, %v3308_v12  ;;  %v3401_v10 = vrot.slane %v3400_v56, 1 }
0x28d0   :  { %v3363_v17 = vrot.slane %v3362_v15, 1 }
0x28d1   :  { %3538 = vpush %v3310_v25  ;;  %v3402_v51 = vadd.f32 %v3401_v10, %v3400_v56 }
0x28d2   :  { %v3364_v19 = vadd.f32 %v3363_v17, %v3362_v15 }
0x28d4   :  { %3540 = vpush %v3364_v19 }
0x28d5   :  { %3542 = vpush %v3402_v51 }
0x28df   :  { %v2917_v31 = vpop.permute.xlu1 %2916 }
0x28e0   :  { %v2931_v16 = vmul.f32 %v2917_v31, %v5210_v22  ;;  %v2548_v22 = vstv %s3535_s17 }
0x28e1   :  { %v2549_v60 = vadd.f32 %v2548_v22, %v2052_v54 }
0x28e2   :  { %v2937_v18 = vadd.f32 %v2931_v16, %v2910_v62 }
0x28e3   :  { %v3126_v8 = vadd.f32 %v3125_v2, %v2549_v60 }
0x28e4   :  { %3128 = vrot.lane.b32.xlu0 %v2937_v18, %s3933_s21 }
0x2902   :  { %s3539_s21 = spop %3538 }
0x2903   :  { %v3312_v44 = vstv %s3539_s21 }
0x2905   :  { %s3541_s20 = spop %3540 }
0x2906   :  { %v3366_v24 = vstv %s3541_s20  ;;  %s3543_s22 = spop %3542 }
0x2907   :  { %v3367_v53 = vmul.f32 0.01, %v3366_v24  ;;  %v3404_v42 = vstv %s3543_s22 }
0x2908   :  { %v3405_v33 = vmul.f32 -0.5, %v3404_v42 }
0x2909   :  { %v3375_v3 = vmul.f32 %v3374_v35, %v3367_v53 }
0x290a   :  { %v3406_v38 = vmul.f32 0.005, %v3405_v33 }
0x290b   :  { %v3376_v11 = vsub.f32 %v3312_v44, %v3375_v3 }
0x290d   :  { %v3377_v29 = vadd.f32 %v3376_v11, %v3126_v8 }
0x290f   :  { %v3378_v61 = vsub.f32 0.0, %v3377_v29 }
0x2911   :  { %v3407_v4 = vadd.f32 %v3406_v38, %v3378_v61 }
0x2913   :  { %3413 = vst.msk [vmem:[%s5409_s3] sm:$0xff] %vm3412_vm15, %v3407_v4 }
0x2956   :  { %v3129_v36 = vpop.permute.xlu0 %3128 }
0x2957   :  { %3418 = vsyncpa [#allocation8], 1 }

</bundles_post_ra>
